<compile_context>
chip_gen: v7x
topology: tpu7x:2x2x1
jax: 0.10.0
libtpu: 0.0.40
codegen_flags: <defaults>
</compile_context>

<pallas_src>
import functools

import jax
import jax.numpy as jnp
from jax import lax
from jax.experimental import pallas as pl
from jax.experimental.pallas import tpu as pltpu


# ---------------------------------------------------------------------------
# In-kernel 3x3x3 conv for one output depth plane, as 27 shifted MXU matmuls.
# ---------------------------------------------------------------------------
def _conv3x3x3_plane(x3, w_ref, H, W):
    """x3: (3, H+2, W+2, Cin) bf16 values (3 padded depth planes).
    w_ref: (27, Cin, Cout) bf16 ref, tap order (kd, kh, kw), BN scale pre-folded.
    Returns (H*W, Cout) f32."""
    cin = x3.shape[-1]
    acc = None
    t = 0
    for kd in range(3):
        for kh in range(3):
            for kw in range(3):
                patch = x3[kd, kh:kh + H, kw:kw + W, :].reshape(H * W, cin)
                part = jnp.dot(patch, w_ref[t], preferred_element_type=jnp.float32)
                acc = part if acc is None else acc + part
                t += 1
    return acc


# ---------------------------------------------------------------------------
# Fused BasicBlock kernel: conv1+bn1+relu -> (VMEM) -> conv2+bn2+residual+relu
# ---------------------------------------------------------------------------
def _basic_block_kernel(xpad_ref, w1_ref, b1_ref, w2_ref, b2_ref, out_ref, y1_ref):
    # xpad_ref : (D+2, H+2, W+2, C)   bf16, zero-padded input volume (one batch elem)
    # w1_ref   : (27, C, P) bf16      conv1 weights * bn1 scale
    # b1_ref   : (1, P)  f32          bn1 folded bias
    # w2_ref   : (27, P, P) bf16      conv2 weights * bn2 scale
    # b2_ref   : (1, P)  f32          bn2 folded bias
    # out_ref  : (D, H*W, P) f32      output volume (one batch elem)
    # y1_ref   : (D+2, H+2, W+2, P)   bf16 VMEM scratch holding padded y1
    D, HW, P = out_ref.shape
    Hp2, Wp2 = xpad_ref.shape[1], xpad_ref.shape[2]
    H, W = Hp2 - 2, Wp2 - 2

    # Zero the scratch once so its 1-voxel halo provides conv2's zero padding.
    y1_ref[...] = jnp.zeros_like(y1_ref)

    # ---- conv1 -> bn1 (folded) -> relu : write interior of y1 scratch ------
    def conv1_body(d, carry):
        x3 = xpad_ref[pl.ds(d, 3)]                            # (3, H+2, W+2, C)
        y = _conv3x3x3_plane(x3, w1_ref, H, W)                # (H*W, P) f32
        y = jnp.maximum(y + b1_ref[...], 0.0)
        y1_ref[pl.ds(d + 1, 1), 1:H + 1, 1:W + 1, :] = (
            y.reshape(1, H, W, P).astype(y1_ref.dtype))
        return carry

    lax.fori_loop(0, D, conv1_body, 0)

    # ---- conv2 -> bn2 (folded) -> + identity -> relu ------------------------
    def conv2_body(d, carry):
        y3 = y1_ref[pl.ds(d, 3)]                              # (3, H+2, W+2, P)
        z = _conv3x3x3_plane(y3, w2_ref, H, W)                # (H*W, P) f32
        identity = xpad_ref[pl.ds(d + 1, 1), 1:H + 1, 1:W + 1, :]   # (1, H, W, C)
        z = z + b2_ref[...] + identity.reshape(H * W, P).astype(jnp.float32)
        out_ref[pl.ds(d, 1)] = (
            jnp.maximum(z, 0.0).reshape(1, HW, P).astype(out_ref.dtype))
        return carry

    lax.fori_loop(0, D, conv2_body, 0)


# ---------------------------------------------------------------------------
# Wrapper: layout prep (NCDHW -> padded NDHWC), BN folding, pallas_call
# ---------------------------------------------------------------------------
def fold_bn(gamma, beta, running_mean, running_var, eps=1e-5):
    scale = gamma / jnp.sqrt(running_var + eps)
    bias = beta - running_mean * scale
    return scale, bias


def basic_block_pallas(x_ncdhw, params):
    N, C, D, H, W = x_ncdhw.shape
    P = params["w1_taps"].shape[-1]
    assert P == C, "downsample=None requires inplanes == planes"

    x = jnp.transpose(x_ncdhw, (0, 2, 3, 4, 1))               # NCDHW -> NDHWC
    xpad = jnp.pad(x, ((0, 0), (1, 1), (1, 1), (1, 1), (0, 0)))
    xpad = xpad.astype(jnp.bfloat16)

    scale1, bias1 = fold_bn(*params["bn1"])
    scale2, bias2 = fold_bn(*params["bn2"])
    # Fold BN scale into the conv weight columns; kernel only adds the bias.
    w1 = (params["w1_taps"] * scale1).astype(jnp.bfloat16)    # (27, C, P)
    w2 = (params["w2_taps"] * scale2).astype(jnp.bfloat16)    # (27, P, P)
    b1 = bias1.reshape(1, P).astype(jnp.float32)
    b2 = bias2.reshape(1, P).astype(jnp.float32)

    # VMEM budget per grid step: double-buffered input/output/weight blocks plus
    # the y1 scratch. Capped at 64 MiB so it is valid on v7x as well.
    blk_in = (D + 2) * (H + 2) * (W + 2) * C * 2              # bf16 input block
    blk_out = D * H * W * P * 4                               # f32 output block
    scratch_b = (D + 2) * (H + 2) * (W + 2) * P * 2           # bf16 y1 scratch
    wts = (w1.size + w2.size) * 2 + (b1.size + b2.size) * 4
    need = 2 * (blk_in + blk_out + wts) + scratch_b
    vmem_limit = int(min(64 * 1024 * 1024, max(16 * 1024 * 1024, 2 * need)))

    out = pl.pallas_call(
        _basic_block_kernel,
        out_shape=jax.ShapeDtypeStruct((N, D, H * W, P), jnp.float32),
        grid=(N,),
        in_specs=[
            pl.BlockSpec((None, D + 2, H + 2, W + 2, C), lambda n: (n, 0, 0, 0, 0)),
            pl.BlockSpec((27, C, P), lambda n: (0, 0, 0)),    # conv1 weights (resident)
            pl.BlockSpec((1, P), lambda n: (0, 0)),           # bn1 bias
            pl.BlockSpec((27, P, P), lambda n: (0, 0, 0)),    # conv2 weights (resident)
            pl.BlockSpec((1, P), lambda n: (0, 0)),           # bn2 bias
        ],
        out_specs=pl.BlockSpec((None, D, H * W, P), lambda n: (n, 0, 0, 0)),
        scratch_shapes=[pltpu.VMEM((D + 2, H + 2, W + 2, P), jnp.bfloat16)],
        compiler_params=pltpu.CompilerParams(
            dimension_semantics=("parallel",),
            vmem_limit_bytes=vmem_limit,
        ),
    )(xpad, w1, b1, w2, b2)

    out = out.reshape(N, D, H, W, P)
    return jnp.transpose(out, (0, 4, 1, 2, 3))                # back to NCDHW


# ---------------------------------------------------------------------------
# Pure-JAX reference (XLA conv) for validation
# ---------------------------------------------------------------------------
def basic_block_ref(x_ncdhw, params):
    x = jnp.transpose(x_ncdhw, (0, 2, 3, 4, 1))               # NDHWC

    def conv3(inp, w_dhwio):
        return lax.conv_general_dilated(
            inp, w_dhwio, window_strides=(1, 1, 1), padding="SAME",
            dimension_numbers=("NDHWC", "DHWIO", "NDHWC"))

    scale1, bias1 = fold_bn(*params["bn1"])
    scale2, bias2 = fold_bn(*params["bn2"])

    y = conv3(x, params["w1_dhwio"])
    y = jnp.maximum(y * scale1 + bias1, 0.0)
    y = conv3(y, params["w2_dhwio"])
    y = jnp.maximum(y * scale2 + bias2 + x, 0.0)
    return jnp.transpose(y, (0, 4, 1, 2, 3))


# ---------------------------------------------------------------------------
# Deterministic parameter init (shapes follow BasicBlock.__init__)
# ---------------------------------------------------------------------------
def init_params(key, inplanes, planes):
    ks = jax.random.split(key, 4)
    # conv weights in PyTorch layout (Cout, Cin, 3, 3, 3), bias=False
    w1 = 0.1 * jax.random.normal(ks[0], (planes, inplanes, 3, 3, 3), jnp.float32)
    w2 = 0.1 * jax.random.normal(ks[1], (planes, planes, 3, 3, 3), jnp.float32)

    def to_dhwio(w):                                          # (Co,Ci,kd,kh,kw) -> (kd,kh,kw,Ci,Co)
        return jnp.transpose(w, (2, 3, 4, 1, 0))

    def to_taps(w_dhwio):                                     # -> (27, Ci, Co), tap order (kd,kh,kw)
        kd, kh, kw, ci, co = w_dhwio.shape
        return w_dhwio.reshape(kd * kh * kw, ci, co)

    def bn_params(k, c):
        k1, k2, k3, k4 = jax.random.split(k, 4)
        gamma = 1.0 + 0.1 * jax.random.normal(k1, (c,), jnp.float32)
        beta = 0.1 * jax.random.normal(k2, (c,), jnp.float32)
        rmean = 0.1 * jax.random.normal(k3, (c,), jnp.float32)
        rvar = 1.0 + 0.1 * jax.random.uniform(k4, (c,), jnp.float32)
        return gamma, beta, rmean, rvar

    w1_dhwio, w2_dhwio = to_dhwio(w1), to_dhwio(w2)
    return {
        "w1_dhwio": w1_dhwio, "w2_dhwio": w2_dhwio,
        "w1_taps": to_taps(w1_dhwio), "w2_taps": to_taps(w2_dhwio),
        "bn1": bn_params(ks[2], planes), "bn2": bn_params(ks[3], planes),
    }


if __name__ == "__main__":
    key = jax.random.PRNGKey(0)
    k_x, k_p = jax.random.split(key)

    N, C, D, H, W = 2, 8, 8, 8, 8                             # inplanes == planes, stride=1
    x = jax.random.normal(k_x, (N, C, D, H, W), jnp.float32)  # NCDHW, as in PyTorch
    params = init_params(k_p, inplanes=C, planes=C)

    fwd = jax.jit(functools.partial(basic_block_pallas, params=params))
    out = jax.block_until_ready(fwd(x))

    ref = basic_block_ref(x, params)
    assert out.shape == (N, C, D, H, W)
    assert jnp.allclose(out, ref, atol=5e-2, rtol=5e-2), float(jnp.max(jnp.abs(out - ref)))

    print("KERNEL_OK")
</pallas_src>

<mosaic_0001>
module attributes {stable_mosaic.version = 11 : i64} {
  func.func @_basic_block_kernel(%arg0: i32, %arg1: memref<1x10x10x10x8xbf16, #tpu.memory_space<vmem>>, %arg2: memref<27x8x8xbf16, #tpu.memory_space<vmem>>, %arg3: memref<1x8xf32, #tpu.memory_space<vmem>>, %arg4: memref<27x8x8xbf16, #tpu.memory_space<vmem>>, %arg5: memref<1x8xf32, #tpu.memory_space<vmem>>, %arg6: memref<1x8x64x8xf32, #tpu.memory_space<vmem>>, %arg7: memref<10x10x10x8xbf16, #tpu.memory_space<vmem>>) attributes {dimension_semantics = [#tpu.dimension_semantics<parallel>], iteration_bounds = array<i64: 2>, scalar_prefetch = 0 : i64, scratch_operands = 1 : i64, tpu.core_type = #tpu.core_type<tc>, window_params = [{transform_indices = @transform_0, window_bounds = array<i64: 1, 10, 10, 10, 8>}, {pipeline_mode = #tpu.pipeline_mode<synchronous>, transform_indices = @transform_1, window_bounds = array<i64: 27, 8, 8>}, {pipeline_mode = #tpu.pipeline_mode<synchronous>, transform_indices = @transform_2, window_bounds = array<i64: 1, 8>}, {pipeline_mode = #tpu.pipeline_mode<synchronous>, transform_indices = @transform_3, window_bounds = array<i64: 27, 8, 8>}, {pipeline_mode = #tpu.pipeline_mode<synchronous>, transform_indices = @transform_4, window_bounds = array<i64: 1, 8>}, {transform_indices = @transform_5, window_bounds = array<i64: 1, 8, 64, 8>}]} {
    %cst = arith.constant 0.000000e+00 : bf16
    %0 = vector.broadcast %cst : bf16 to vector<10x10x10x8xbf16>
    %c0 = arith.constant 0 : index
    %c0_0 = arith.constant 0 : index
    %c0_1 = arith.constant 0 : index
    %c0_2 = arith.constant 0 : index
    %1 = vector.load %arg7[%c0, %c0_0, %c0_1, %c0_2] : memref<10x10x10x8xbf16, #tpu.memory_space<vmem>>, vector<10x10x10x8xbf16>
    tpu.vector_store %arg7[%c0, %c0_0, %c0_1, %c0_2], %0 {strides = array<i32>} : memref<10x10x10x8xbf16, #tpu.memory_space<vmem>>, vector<10x10x10x8xbf16>,
    %c0_i32 = arith.constant 0 : i32
    %c8_i32 = arith.constant 8 : i32
    %2 = arith.addi %c0_i32, %c8_i32 : i32
    %c1_i32 = arith.constant 1 : i32
    scf.for %arg8 = %c0_i32 to %2 step %c1_i32  : i32 {
      %c0_8 = arith.constant 0 : index
      %4 = arith.index_cast %arg8 : i32 to index
      %c0_9 = arith.constant 0 : index
      %c0_10 = arith.constant 0 : index
      %c0_11 = arith.constant 0 : index
      %5 = vector.load %arg1[%c0_8, %4, %c0_9, %c0_10, %c0_11] : memref<1x10x10x10x8xbf16, #tpu.memory_space<vmem>>, vector<1x3x10x10x8xbf16>
      %6 = vector.shape_cast %5 : vector<1x3x10x10x8xbf16> to vector<3x10x10x8xbf16>
      %7 = vector.extract_strided_slice %6 {offsets = [0, 0, 0, 0], sizes = [1, 8, 8, 8], strides = [1, 1, 1, 1]} : vector<3x10x10x8xbf16> to vector<1x8x8x8xbf16>
      %8 = vector.shape_cast %7 : vector<1x8x8x8xbf16> to vector<8x8x8xbf16>
      %9 = vector.shape_cast %8 : vector<8x8x8xbf16> to vector<64x8xbf16>
      %c0_12 = arith.constant 0 : index
      %c0_13 = arith.constant 0 : index
      %c0_14 = arith.constant 0 : index
      %10 = vector.load %arg2[%c0_12, %c0_13, %c0_14] : memref<27x8x8xbf16, #tpu.memory_space<vmem>>, vector<1x8x8xbf16>
      %11 = vector.shape_cast %10 : vector<1x8x8xbf16> to vector<8x8xbf16>
      %cst_15 = arith.constant dense<0.000000e+00> : vector<64x8xf32>
      %12 = tpu.matmul %9, %11, %cst_15 {dimension_numbers = #tpu.dot_dimension_numbers<[1], [0], [0], [1], [0, 0, 1, 1], [], []>} : vector<64x8xbf16>, vector<8x8xbf16>, vector<64x8xf32> -> vector<64x8xf32>
      %13 = vector.extract_strided_slice %6 {offsets = [0, 0, 1, 0], sizes = [1, 8, 8, 8], strides = [1, 1, 1, 1]} : vector<3x10x10x8xbf16> to vector<1x8x8x8xbf16>
      %14 = vector.shape_cast %13 : vector<1x8x8x8xbf16> to vector<8x8x8xbf16>
      %15 = vector.shape_cast %14 : vector<8x8x8xbf16> to vector<64x8xbf16>
      %c1 = arith.constant 1 : index
      %c0_16 = arith.constant 0 : index
      %c0_17 = arith.constant 0 : index
      %16 = vector.load %arg2[%c1, %c0_16, %c0_17] : memref<27x8x8xbf16, #tpu.memory_space<vmem>>, vector<1x8x8xbf16>
      %17 = vector.shape_cast %16 : vector<1x8x8xbf16> to vector<8x8xbf16>
      %cst_18 = arith.constant dense<0.000000e+00> : vector<64x8xf32>
      %18 = tpu.matmul %15, %17, %cst_18 {dimension_numbers = #tpu.dot_dimension_numbers<[1], [0], [0], [1], [0, 0, 1, 1], [], []>} : vector<64x8xbf16>, vector<8x8xbf16>, vector<64x8xf32> -> vector<64x8xf32>
      %19 = arith.addf %12, %18 : vector<64x8xf32>
      %20 = vector.extract_strided_slice %6 {offsets = [0, 0, 2, 0], sizes = [1, 8, 8, 8], strides = [1, 1, 1, 1]} : vector<3x10x10x8xbf16> to vector<1x8x8x8xbf16>
      %21 = vector.shape_cast %20 : vector<1x8x8x8xbf16> to vector<8x8x8xbf16>
      %22 = vector.shape_cast %21 : vector<8x8x8xbf16> to vector<64x8xbf16>
      %c2 = arith.constant 2 : index
      %c0_19 = arith.constant 0 : index
      %c0_20 = arith.constant 0 : index
      %23 = vector.load %arg2[%c2, %c0_19, %c0_20] : memref<27x8x8xbf16, #tpu.memory_space<vmem>>, vector<1x8x8xbf16>
      %24 = vector.shape_cast %23 : vector<1x8x8xbf16> to vector<8x8xbf16>
      %cst_21 = arith.constant dense<0.000000e+00> : vector<64x8xf32>
      %25 = tpu.matmul %22, %24, %cst_21 {dimension_numbers = #tpu.dot_dimension_numbers<[1], [0], [0], [1], [0, 0, 1, 1], [], []>} : vector<64x8xbf16>, vector<8x8xbf16>, vector<64x8xf32> -> vector<64x8xf32>
      %26 = arith.addf %19, %25 : vector<64x8xf32>
      %27 = vector.extract_strided_slice %6 {offsets = [0, 1, 0, 0], sizes = [1, 8, 8, 8], strides = [1, 1, 1, 1]} : vector<3x10x10x8xbf16> to vector<1x8x8x8xbf16>
      %28 = vector.shape_cast %27 : vector<1x8x8x8xbf16> to vector<8x8x8xbf16>
      %29 = vector.shape_cast %28 : vector<8x8x8xbf16> to vector<64x8xbf16>
      %c3 = arith.constant 3 : index
      %c0_22 = arith.constant 0 : index
      %c0_23 = arith.constant 0 : index
      %30 = vector.load %arg2[%c3, %c0_22, %c0_23] : memref<27x8x8xbf16, #tpu.memory_space<vmem>>, vector<1x8x8xbf16>
      %31 = vector.shape_cast %30 : vector<1x8x8xbf16> to vector<8x8xbf16>
      %cst_24 = arith.constant dense<0.000000e+00> : vector<64x8xf32>
      %32 = tpu.matmul %29, %31, %cst_24 {dimension_numbers = #tpu.dot_dimension_numbers<[1], [0], [0], [1], [0, 0, 1, 1], [], []>} : vector<64x8xbf16>, vector<8x8xbf16>, vector<64x8xf32> -> vector<64x8xf32>
      %33 = arith.addf %26, %32 : vector<64x8xf32>
      %34 = vector.extract_strided_slice %6 {offsets = [0, 1, 1, 0], sizes = [1, 8, 8, 8], strides = [1, 1, 1, 1]} : vector<3x10x10x8xbf16> to vector<1x8x8x8xbf16>
      %35 = vector.shape_cast %34 : vector<1x8x8x8xbf16> to vector<8x8x8xbf16>
      %36 = vector.shape_cast %35 : vector<8x8x8xbf16> to vector<64x8xbf16>
      %c4 = arith.constant 4 : index
      %c0_25 = arith.constant 0 : index
      %c0_26 = arith.constant 0 : index
      %37 = vector.load %arg2[%c4, %c0_25, %c0_26] : memref<27x8x8xbf16, #tpu.memory_space<vmem>>, vector<1x8x8xbf16>
      %38 = vector.shape_cast %37 : vector<1x8x8xbf16> to vector<8x8xbf16>
      %cst_27 = arith.constant dense<0.000000e+00> : vector<64x8xf32>
      %39 = tpu.matmul %36, %38, %cst_27 {dimension_numbers = #tpu.dot_dimension_numbers<[1], [0], [0], [1], [0, 0, 1, 1], [], []>} : vector<64x8xbf16>, vector<8x8xbf16>, vector<64x8xf32> -> vector<64x8xf32>
      %40 = arith.addf %33, %39 : vector<64x8xf32>
      %41 = vector.extract_strided_slice %6 {offsets = [0, 1, 2, 0], sizes = [1, 8, 8, 8], strides = [1, 1, 1, 1]} : vector<3x10x10x8xbf16> to vector<1x8x8x8xbf16>
      %42 = vector.shape_cast %41 : vector<1x8x8x8xbf16> to vector<8x8x8xbf16>
      %43 = vector.shape_cast %42 : vector<8x8x8xbf16> to vector<64x8xbf16>
      %c5 = arith.constant 5 : index
      %c0_28 = arith.constant 0 : index
      %c0_29 = arith.constant 0 : index
      %44 = vector.load %arg2[%c5, %c0_28, %c0_29] : memref<27x8x8xbf16, #tpu.memory_space<vmem>>, vector<1x8x8xbf16>
      %45 = vector.shape_cast %44 : vector<1x8x8xbf16> to vector<8x8xbf16>
      %cst_30 = arith.constant dense<0.000000e+00> : vector<64x8xf32>
      %46 = tpu.matmul %43, %45, %cst_30 {dimension_numbers = #tpu.dot_dimension_numbers<[1], [0], [0], [1], [0, 0, 1, 1], [], []>} : vector<64x8xbf16>, vector<8x8xbf16>, vector<64x8xf32> -> vector<64x8xf32>
      %47 = arith.addf %40, %46 : vector<64x8xf32>
      %48 = vector.extract_strided_slice %6 {offsets = [0, 2, 0, 0], sizes = [1, 8, 8, 8], strides = [1, 1, 1, 1]} : vector<3x10x10x8xbf16> to vector<1x8x8x8xbf16>
      %49 = vector.shape_cast %48 : vector<1x8x8x8xbf16> to vector<8x8x8xbf16>
      %50 = vector.shape_cast %49 : vector<8x8x8xbf16> to vector<64x8xbf16>
      %c6 = arith.constant 6 : index
      %c0_31 = arith.constant 0 : index
      %c0_32 = arith.constant 0 : index
      %51 = vector.load %arg2[%c6, %c0_31, %c0_32] : memref<27x8x8xbf16, #tpu.memory_space<vmem>>, vector<1x8x8xbf16>
      %52 = vector.shape_cast %51 : vector<1x8x8xbf16> to vector<8x8xbf16>
      %cst_33 = arith.constant dense<0.000000e+00> : vector<64x8xf32>
      %53 = tpu.matmul %50, %52, %cst_33 {dimension_numbers = #tpu.dot_dimension_numbers<[1], [0], [0], [1], [0, 0, 1, 1], [], []>} : vector<64x8xbf16>, vector<8x8xbf16>, vector<64x8xf32> -> vector<64x8xf32>
      %54 = arith.addf %47, %53 : vector<64x8xf32>
      %55 = vector.extract_strided_slice %6 {offsets = [0, 2, 1, 0], sizes = [1, 8, 8, 8], strides = [1, 1, 1, 1]} : vector<3x10x10x8xbf16> to vector<1x8x8x8xbf16>
      %56 = vector.shape_cast %55 : vector<1x8x8x8xbf16> to vector<8x8x8xbf16>
      %57 = vector.shape_cast %56 : vector<8x8x8xbf16> to vector<64x8xbf16>
      %c7 = arith.constant 7 : index
      %c0_34 = arith.constant 0 : index
      %c0_35 = arith.constant 0 : index
      %58 = vector.load %arg2[%c7, %c0_34, %c0_35] : memref<27x8x8xbf16, #tpu.memory_space<vmem>>, vector<1x8x8xbf16>
      %59 = vector.shape_cast %58 : vector<1x8x8xbf16> to vector<8x8xbf16>
      %cst_36 = arith.constant dense<0.000000e+00> : vector<64x8xf32>
      %60 = tpu.matmul %57, %59, %cst_36 {dimension_numbers = #tpu.dot_dimension_numbers<[1], [0], [0], [1], [0, 0, 1, 1], [], []>} : vector<64x8xbf16>, vector<8x8xbf16>, vector<64x8xf32> -> vector<64x8xf32>
      %61 = arith.addf %54, %60 : vector<64x8xf32>
      %62 = vector.extract_strided_slice %6 {offsets = [0, 2, 2, 0], sizes = [1, 8, 8, 8], strides = [1, 1, 1, 1]} : vector<3x10x10x8xbf16> to vector<1x8x8x8xbf16>
      %63 = vector.shape_cast %62 : vector<1x8x8x8xbf16> to vector<8x8x8xbf16>
      %64 = vector.shape_cast %63 : vector<8x8x8xbf16> to vector<64x8xbf16>
      %c8 = arith.constant 8 : index
      %c0_37 = arith.constant 0 : index
      %c0_38 = arith.constant 0 : index
      %65 = vector.load %arg2[%c8, %c0_37, %c0_38] : memref<27x8x8xbf16, #tpu.memory_space<vmem>>, vector<1x8x8xbf16>
      %66 = vector.shape_cast %65 : vector<1x8x8xbf16> to vector<8x8xbf16>
      %cst_39 = arith.constant dense<0.000000e+00> : vector<64x8xf32>
      %67 = tpu.matmul %64, %66, %cst_39 {dimension_numbers = #tpu.dot_dimension_numbers<[1], [0], [0], [1], [0, 0, 1, 1], [], []>} : vector<64x8xbf16>, vector<8x8xbf16>, vector<64x8xf32> -> vector<64x8xf32>
      %68 = arith.addf %61, %67 : vector<64x8xf32>
      %69 = vector.extract_strided_slice %6 {offsets = [1, 0, 0, 0], sizes = [1, 8, 8, 8], strides = [1, 1, 1, 1]} : vector<3x10x10x8xbf16> to vector<1x8x8x8xbf16>
      %70 = vector.shape_cast %69 : vector<1x8x8x8xbf16> to vector<8x8x8xbf16>
      %71 = vector.shape_cast %70 : vector<8x8x8xbf16> to vector<64x8xbf16>
      %c9 = arith.constant 9 : index
      %c0_40 = arith.constant 0 : index
      %c0_41 = arith.constant 0 : index
      %72 = vector.load %arg2[%c9, %c0_40, %c0_41] : memref<27x8x8xbf16, #tpu.memory_space<vmem>>, vector<1x8x8xbf16>
      %73 = vector.shape_cast %72 : vector<1x8x8xbf16> to vector<8x8xbf16>
      %cst_42 = arith.constant dense<0.000000e+00> : vector<64x8xf32>
      %74 = tpu.matmul %71, %73, %cst_42 {dimension_numbers = #tpu.dot_dimension_numbers<[1], [0], [0], [1], [0, 0, 1, 1], [], []>} : vector<64x8xbf16>, vector<8x8xbf16>, vector<64x8xf32> -> vector<64x8xf32>
      %75 = arith.addf %68, %74 : vector<64x8xf32>
      %76 = vector.extract_strided_slice %6 {offsets = [1, 0, 1, 0], sizes = [1, 8, 8, 8], strides = [1, 1, 1, 1]} : vector<3x10x10x8xbf16> to vector<1x8x8x8xbf16>
      %77 = vector.shape_cast %76 : vector<1x8x8x8xbf16> to vector<8x8x8xbf16>
      %78 = vector.shape_cast %77 : vector<8x8x8xbf16> to vector<64x8xbf16>
      %c10 = arith.constant 10 : index
      %c0_43 = arith.constant 0 : index
      %c0_44 = arith.constant 0 : index
      %79 = vector.load %arg2[%c10, %c0_43, %c0_44] : memref<27x8x8xbf16, #tpu.memory_space<vmem>>, vector<1x8x8xbf16>
      %80 = vector.shape_cast %79 : vector<1x8x8xbf16> to vector<8x8xbf16>
      %cst_45 = arith.constant dense<0.000000e+00> : vector<64x8xf32>
      %81 = tpu.matmul %78, %80, %cst_45 {dimension_numbers = #tpu.dot_dimension_numbers<[1], [0], [0], [1], [0, 0, 1, 1], [], []>} : vector<64x8xbf16>, vector<8x8xbf16>, vector<64x8xf32> -> vector<64x8xf32>
      %82 = arith.addf %75, %81 : vector<64x8xf32>
      %83 = vector.extract_strided_slice %6 {offsets = [1, 0, 2, 0], sizes = [1, 8, 8, 8], strides = [1, 1, 1, 1]} : vector<3x10x10x8xbf16> to vector<1x8x8x8xbf16>
      %84 = vector.shape_cast %83 : vector<1x8x8x8xbf16> to vector<8x8x8xbf16>
      %85 = vector.shape_cast %84 : vector<8x8x8xbf16> to vector<64x8xbf16>
      %c11 = arith.constant 11 : index
      %c0_46 = arith.constant 0 : index
      %c0_47 = arith.constant 0 : index
      %86 = vector.load %arg2[%c11, %c0_46, %c0_47] : memref<27x8x8xbf16, #tpu.memory_space<vmem>>, vector<1x8x8xbf16>
      %87 = vector.shape_cast %86 : vector<1x8x8xbf16> to vector<8x8xbf16>
      %cst_48 = arith.constant dense<0.000000e+00> : vector<64x8xf32>
      %88 = tpu.matmul %85, %87, %cst_48 {dimension_numbers = #tpu.dot_dimension_numbers<[1], [0], [0], [1], [0, 0, 1, 1], [], []>} : vector<64x8xbf16>, vector<8x8xbf16>, vector<64x8xf32> -> vector<64x8xf32>
      %89 = arith.addf %82, %88 : vector<64x8xf32>
      %90 = vector.extract_strided_slice %6 {offsets = [1, 1, 0, 0], sizes = [1, 8, 8, 8], strides = [1, 1, 1, 1]} : vector<3x10x10x8xbf16> to vector<1x8x8x8xbf16>
      %91 = vector.shape_cast %90 : vector<1x8x8x8xbf16> to vector<8x8x8xbf16>
      %92 = vector.shape_cast %91 : vector<8x8x8xbf16> to vector<64x8xbf16>
      %c12 = arith.constant 12 : index
      %c0_49 = arith.constant 0 : index
      %c0_50 = arith.constant 0 : index
      %93 = vector.load %arg2[%c12, %c0_49, %c0_50] : memref<27x8x8xbf16, #tpu.memory_space<vmem>>, vector<1x8x8xbf16>
      %94 = vector.shape_cast %93 : vector<1x8x8xbf16> to vector<8x8xbf16>
      %cst_51 = arith.constant dense<0.000000e+00> : vector<64x8xf32>
      %95 = tpu.matmul %92, %94, %cst_51 {dimension_numbers = #tpu.dot_dimension_numbers<[1], [0], [0], [1], [0, 0, 1, 1], [], []>} : vector<64x8xbf16>, vector<8x8xbf16>, vector<64x8xf32> -> vector<64x8xf32>
      %96 = arith.addf %89, %95 : vector<64x8xf32>
      %97 = vector.extract_strided_slice %6 {offsets = [1, 1, 1, 0], sizes = [1, 8, 8, 8], strides = [1, 1, 1, 1]} : vector<3x10x10x8xbf16> to vector<1x8x8x8xbf16>
      %98 = vector.shape_cast %97 : vector<1x8x8x8xbf16> to vector<8x8x8xbf16>
      %99 = vector.shape_cast %98 : vector<8x8x8xbf16> to vector<64x8xbf16>
      %c13 = arith.constant 13 : index
      %c0_52 = arith.constant 0 : index
      %c0_53 = arith.constant 0 : index
      %100 = vector.load %arg2[%c13, %c0_52, %c0_53] : memref<27x8x8xbf16, #tpu.memory_space<vmem>>, vector<1x8x8xbf16>
      %101 = vector.shape_cast %100 : vector<1x8x8xbf16> to vector<8x8xbf16>
      %cst_54 = arith.constant dense<0.000000e+00> : vector<64x8xf32>
      %102 = tpu.matmul %99, %101, %cst_54 {dimension_numbers = #tpu.dot_dimension_numbers<[1], [0], [0], [1], [0, 0, 1, 1], [], []>} : vector<64x8xbf16>, vector<8x8xbf16>, vector<64x8xf32> -> vector<64x8xf32>
      %103 = arith.addf %96, %102 : vector<64x8xf32>
      %104 = vector.extract_strided_slice %6 {offsets = [1, 1, 2, 0], sizes = [1, 8, 8, 8], strides = [1, 1, 1, 1]} : vector<3x10x10x8xbf16> to vector<1x8x8x8xbf16>
      %105 = vector.shape_cast %104 : vector<1x8x8x8xbf16> to vector<8x8x8xbf16>
      %106 = vector.shape_cast %105 : vector<8x8x8xbf16> to vector<64x8xbf16>
      %c14 = arith.constant 14 : index
      %c0_55 = arith.constant 0 : index
      %c0_56 = arith.constant 0 : index
      %107 = vector.load %arg2[%c14, %c0_55, %c0_56] : memref<27x8x8xbf16, #tpu.memory_space<vmem>>, vector<1x8x8xbf16>
      %108 = vector.shape_cast %107 : vector<1x8x8xbf16> to vector<8x8xbf16>
      %cst_57 = arith.constant dense<0.000000e+00> : vector<64x8xf32>
      %109 = tpu.matmul %106, %108, %cst_57 {dimension_numbers = #tpu.dot_dimension_numbers<[1], [0], [0], [1], [0, 0, 1, 1], [], []>} : vector<64x8xbf16>, vector<8x8xbf16>, vector<64x8xf32> -> vector<64x8xf32>
      %110 = arith.addf %103, %109 : vector<64x8xf32>
      %111 = vector.extract_strided_slice %6 {offsets = [1, 2, 0, 0], sizes = [1, 8, 8, 8], strides = [1, 1, 1, 1]} : vector<3x10x10x8xbf16> to vector<1x8x8x8xbf16>
      %112 = vector.shape_cast %111 : vector<1x8x8x8xbf16> to vector<8x8x8xbf16>
      %113 = vector.shape_cast %112 : vector<8x8x8xbf16> to vector<64x8xbf16>
      %c15 = arith.constant 15 : index
      %c0_58 = arith.constant 0 : index
      %c0_59 = arith.constant 0 : index
      %114 = vector.load %arg2[%c15, %c0_58, %c0_59] : memref<27x8x8xbf16, #tpu.memory_space<vmem>>, vector<1x8x8xbf16>
      %115 = vector.shape_cast %114 : vector<1x8x8xbf16> to vector<8x8xbf16>
      %cst_60 = arith.constant dense<0.000000e+00> : vector<64x8xf32>
      %116 = tpu.matmul %113, %115, %cst_60 {dimension_numbers = #tpu.dot_dimension_numbers<[1], [0], [0], [1], [0, 0, 1, 1], [], []>} : vector<64x8xbf16>, vector<8x8xbf16>, vector<64x8xf32> -> vector<64x8xf32>
      %117 = arith.addf %110, %116 : vector<64x8xf32>
      %118 = vector.extract_strided_slice %6 {offsets = [1, 2, 1, 0], sizes = [1, 8, 8, 8], strides = [1, 1, 1, 1]} : vector<3x10x10x8xbf16> to vector<1x8x8x8xbf16>
      %119 = vector.shape_cast %118 : vector<1x8x8x8xbf16> to vector<8x8x8xbf16>
      %120 = vector.shape_cast %119 : vector<8x8x8xbf16> to vector<64x8xbf16>
      %c16 = arith.constant 16 : index
      %c0_61 = arith.constant 0 : index
      %c0_62 = arith.constant 0 : index
      %121 = vector.load %arg2[%c16, %c0_61, %c0_62] : memref<27x8x8xbf16, #tpu.memory_space<vmem>>, vector<1x8x8xbf16>
      %122 = vector.shape_cast %121 : vector<1x8x8xbf16> to vector<8x8xbf16>
      %cst_63 = arith.constant dense<0.000000e+00> : vector<64x8xf32>
      %123 = tpu.matmul %120, %122, %cst_63 {dimension_numbers = #tpu.dot_dimension_numbers<[1], [0], [0], [1], [0, 0, 1, 1], [], []>} : vector<64x8xbf16>, vector<8x8xbf16>, vector<64x8xf32> -> vector<64x8xf32>
      %124 = arith.addf %117, %123 : vector<64x8xf32>
      %125 = vector.extract_strided_slice %6 {offsets = [1, 2, 2, 0], sizes = [1, 8, 8, 8], strides = [1, 1, 1, 1]} : vector<3x10x10x8xbf16> to vector<1x8x8x8xbf16>
      %126 = vector.shape_cast %125 : vector<1x8x8x8xbf16> to vector<8x8x8xbf16>
      %127 = vector.shape_cast %126 : vector<8x8x8xbf16> to vector<64x8xbf16>
      %c17 = arith.constant 17 : index
      %c0_64 = arith.constant 0 : index
      %c0_65 = arith.constant 0 : index
      %128 = vector.load %arg2[%c17, %c0_64, %c0_65] : memref<27x8x8xbf16, #tpu.memory_space<vmem>>, vector<1x8x8xbf16>
      %129 = vector.shape_cast %128 : vector<1x8x8xbf16> to vector<8x8xbf16>
      %cst_66 = arith.constant dense<0.000000e+00> : vector<64x8xf32>
      %130 = tpu.matmul %127, %129, %cst_66 {dimension_numbers = #tpu.dot_dimension_numbers<[1], [0], [0], [1], [0, 0, 1, 1], [], []>} : vector<64x8xbf16>, vector<8x8xbf16>, vector<64x8xf32> -> vector<64x8xf32>
      %131 = arith.addf %124, %130 : vector<64x8xf32>
      %132 = vector.extract_strided_slice %6 {offsets = [2, 0, 0, 0], sizes = [1, 8, 8, 8], strides = [1, 1, 1, 1]} : vector<3x10x10x8xbf16> to vector<1x8x8x8xbf16>
      %133 = vector.shape_cast %132 : vector<1x8x8x8xbf16> to vector<8x8x8xbf16>
      %134 = vector.shape_cast %133 : vector<8x8x8xbf16> to vector<64x8xbf16>
      %c18 = arith.constant 18 : index
      %c0_67 = arith.constant 0 : index
      %c0_68 = arith.constant 0 : index
      %135 = vector.load %arg2[%c18, %c0_67, %c0_68] : memref<27x8x8xbf16, #tpu.memory_space<vmem>>, vector<1x8x8xbf16>
      %136 = vector.shape_cast %135 : vector<1x8x8xbf16> to vector<8x8xbf16>
      %cst_69 = arith.constant dense<0.000000e+00> : vector<64x8xf32>
      %137 = tpu.matmul %134, %136, %cst_69 {dimension_numbers = #tpu.dot_dimension_numbers<[1], [0], [0], [1], [0, 0, 1, 1], [], []>} : vector<64x8xbf16>, vector<8x8xbf16>, vector<64x8xf32> -> vector<64x8xf32>
      %138 = arith.addf %131, %137 : vector<64x8xf32>
      %139 = vector.extract_strided_slice %6 {offsets = [2, 0, 1, 0], sizes = [1, 8, 8, 8], strides = [1, 1, 1, 1]} : vector<3x10x10x8xbf16> to vector<1x8x8x8xbf16>
      %140 = vector.shape_cast %139 : vector<1x8x8x8xbf16> to vector<8x8x8xbf16>
      %141 = vector.shape_cast %140 : vector<8x8x8xbf16> to vector<64x8xbf16>
      %c19 = arith.constant 19 : index
      %c0_70 = arith.constant 0 : index
      %c0_71 = arith.constant 0 : index
      %142 = vector.load %arg2[%c19, %c0_70, %c0_71] : memref<27x8x8xbf16, #tpu.memory_space<vmem>>, vector<1x8x8xbf16>
      %143 = vector.shape_cast %142 : vector<1x8x8xbf16> to vector<8x8xbf16>
      %cst_72 = arith.constant dense<0.000000e+00> : vector<64x8xf32>
      %144 = tpu.matmul %141, %143, %cst_72 {dimension_numbers = #tpu.dot_dimension_numbers<[1], [0], [0], [1], [0, 0, 1, 1], [], []>} : vector<64x8xbf16>, vector<8x8xbf16>, vector<64x8xf32> -> vector<64x8xf32>
      %145 = arith.addf %138, %144 : vector<64x8xf32>
      %146 = vector.extract_strided_slice %6 {offsets = [2, 0, 2, 0], sizes = [1, 8, 8, 8], strides = [1, 1, 1, 1]} : vector<3x10x10x8xbf16> to vector<1x8x8x8xbf16>
      %147 = vector.shape_cast %146 : vector<1x8x8x8xbf16> to vector<8x8x8xbf16>
      %148 = vector.shape_cast %147 : vector<8x8x8xbf16> to vector<64x8xbf16>
      %c20 = arith.constant 20 : index
      %c0_73 = arith.constant 0 : index
      %c0_74 = arith.constant 0 : index
      %149 = vector.load %arg2[%c20, %c0_73, %c0_74] : memref<27x8x8xbf16, #tpu.memory_space<vmem>>, vector<1x8x8xbf16>
      %150 = vector.shape_cast %149 : vector<1x8x8xbf16> to vector<8x8xbf16>
      %cst_75 = arith.constant dense<0.000000e+00> : vector<64x8xf32>
      %151 = tpu.matmul %148, %150, %cst_75 {dimension_numbers = #tpu.dot_dimension_numbers<[1], [0], [0], [1], [0, 0, 1, 1], [], []>} : vector<64x8xbf16>, vector<8x8xbf16>, vector<64x8xf32> -> vector<64x8xf32>
      %152 = arith.addf %145, %151 : vector<64x8xf32>
      %153 = vector.extract_strided_slice %6 {offsets = [2, 1, 0, 0], sizes = [1, 8, 8, 8], strides = [1, 1, 1, 1]} : vector<3x10x10x8xbf16> to vector<1x8x8x8xbf16>
      %154 = vector.shape_cast %153 : vector<1x8x8x8xbf16> to vector<8x8x8xbf16>
      %155 = vector.shape_cast %154 : vector<8x8x8xbf16> to vector<64x8xbf16>
      %c21 = arith.constant 21 : index
      %c0_76 = arith.constant 0 : index
      %c0_77 = arith.constant 0 : index
      %156 = vector.load %arg2[%c21, %c0_76, %c0_77] : memref<27x8x8xbf16, #tpu.memory_space<vmem>>, vector<1x8x8xbf16>
      %157 = vector.shape_cast %156 : vector<1x8x8xbf16> to vector<8x8xbf16>
      %cst_78 = arith.constant dense<0.000000e+00> : vector<64x8xf32>
      %158 = tpu.matmul %155, %157, %cst_78 {dimension_numbers = #tpu.dot_dimension_numbers<[1], [0], [0], [1], [0, 0, 1, 1], [], []>} : vector<64x8xbf16>, vector<8x8xbf16>, vector<64x8xf32> -> vector<64x8xf32>
      %159 = arith.addf %152, %158 : vector<64x8xf32>
      %160 = vector.extract_strided_slice %6 {offsets = [2, 1, 1, 0], sizes = [1, 8, 8, 8], strides = [1, 1, 1, 1]} : vector<3x10x10x8xbf16> to vector<1x8x8x8xbf16>
      %161 = vector.shape_cast %160 : vector<1x8x8x8xbf16> to vector<8x8x8xbf16>
      %162 = vector.shape_cast %161 : vector<8x8x8xbf16> to vector<64x8xbf16>
      %c22 = arith.constant 22 : index
      %c0_79 = arith.constant 0 : index
      %c0_80 = arith.constant 0 : index
      %163 = vector.load %arg2[%c22, %c0_79, %c0_80] : memref<27x8x8xbf16, #tpu.memory_space<vmem>>, vector<1x8x8xbf16>
      %164 = vector.shape_cast %163 : vector<1x8x8xbf16> to vector<8x8xbf16>
      %cst_81 = arith.constant dense<0.000000e+00> : vector<64x8xf32>
      %165 = tpu.matmul %162, %164, %cst_81 {dimension_numbers = #tpu.dot_dimension_numbers<[1], [0], [0], [1], [0, 0, 1, 1], [], []>} : vector<64x8xbf16>, vector<8x8xbf16>, vector<64x8xf32> -> vector<64x8xf32>
      %166 = arith.addf %159, %165 : vector<64x8xf32>
      %167 = vector.extract_strided_slice %6 {offsets = [2, 1, 2, 0], sizes = [1, 8, 8, 8], strides = [1, 1, 1, 1]} : vector<3x10x10x8xbf16> to vector<1x8x8x8xbf16>
      %168 = vector.shape_cast %167 : vector<1x8x8x8xbf16> to vector<8x8x8xbf16>
      %169 = vector.shape_cast %168 : vector<8x8x8xbf16> to vector<64x8xbf16>
      %c23 = arith.constant 23 : index
      %c0_82 = arith.constant 0 : index
      %c0_83 = arith.constant 0 : index
      %170 = vector.load %arg2[%c23, %c0_82, %c0_83] : memref<27x8x8xbf16, #tpu.memory_space<vmem>>, vector<1x8x8xbf16>
      %171 = vector.shape_cast %170 : vector<1x8x8xbf16> to vector<8x8xbf16>
      %cst_84 = arith.constant dense<0.000000e+00> : vector<64x8xf32>
      %172 = tpu.matmul %169, %171, %cst_84 {dimension_numbers = #tpu.dot_dimension_numbers<[1], [0], [0], [1], [0, 0, 1, 1], [], []>} : vector<64x8xbf16>, vector<8x8xbf16>, vector<64x8xf32> -> vector<64x8xf32>
      %173 = arith.addf %166, %172 : vector<64x8xf32>
      %174 = vector.extract_strided_slice %6 {offsets = [2, 2, 0, 0], sizes = [1, 8, 8, 8], strides = [1, 1, 1, 1]} : vector<3x10x10x8xbf16> to vector<1x8x8x8xbf16>
      %175 = vector.shape_cast %174 : vector<1x8x8x8xbf16> to vector<8x8x8xbf16>
      %176 = vector.shape_cast %175 : vector<8x8x8xbf16> to vector<64x8xbf16>
      %c24 = arith.constant 24 : index
      %c0_85 = arith.constant 0 : index
      %c0_86 = arith.constant 0 : index
      %177 = vector.load %arg2[%c24, %c0_85, %c0_86] : memref<27x8x8xbf16, #tpu.memory_space<vmem>>, vector<1x8x8xbf16>
      %178 = vector.shape_cast %177 : vector<1x8x8xbf16> to vector<8x8xbf16>
      %cst_87 = arith.constant dense<0.000000e+00> : vector<64x8xf32>
      %179 = tpu.matmul %176, %178, %cst_87 {dimension_numbers = #tpu.dot_dimension_numbers<[1], [0], [0], [1], [0, 0, 1, 1], [], []>} : vector<64x8xbf16>, vector<8x8xbf16>, vector<64x8xf32> -> vector<64x8xf32>
      %180 = arith.addf %173, %179 : vector<64x8xf32>
      %181 = vector.extract_strided_slice %6 {offsets = [2, 2, 1, 0], sizes = [1, 8, 8, 8], strides = [1, 1, 1, 1]} : vector<3x10x10x8xbf16> to vector<1x8x8x8xbf16>
      %182 = vector.shape_cast %181 : vector<1x8x8x8xbf16> to vector<8x8x8xbf16>
      %183 = vector.shape_cast %182 : vector<8x8x8xbf16> to vector<64x8xbf16>
      %c25 = arith.constant 25 : index
      %c0_88 = arith.constant 0 : index
      %c0_89 = arith.constant 0 : index
      %184 = vector.load %arg2[%c25, %c0_88, %c0_89] : memref<27x8x8xbf16, #tpu.memory_space<vmem>>, vector<1x8x8xbf16>
      %185 = vector.shape_cast %184 : vector<1x8x8xbf16> to vector<8x8xbf16>
      %cst_90 = arith.constant dense<0.000000e+00> : vector<64x8xf32>
      %186 = tpu.matmul %183, %185, %cst_90 {dimension_numbers = #tpu.dot_dimension_numbers<[1], [0], [0], [1], [0, 0, 1, 1], [], []>} : vector<64x8xbf16>, vector<8x8xbf16>, vector<64x8xf32> -> vector<64x8xf32>
      %187 = arith.addf %180, %186 : vector<64x8xf32>
      %188 = vector.extract_strided_slice %6 {offsets = [2, 2, 2, 0], sizes = [1, 8, 8, 8], strides = [1, 1, 1, 1]} : vector<3x10x10x8xbf16> to vector<1x8x8x8xbf16>
      %189 = vector.shape_cast %188 : vector<1x8x8x8xbf16> to vector<8x8x8xbf16>
      %190 = vector.shape_cast %189 : vector<8x8x8xbf16> to vector<64x8xbf16>
      %c26 = arith.constant 26 : index
      %c0_91 = arith.constant 0 : index
      %c0_92 = arith.constant 0 : index
      %191 = vector.load %arg2[%c26, %c0_91, %c0_92] : memref<27x8x8xbf16, #tpu.memory_space<vmem>>, vector<1x8x8xbf16>
      %192 = vector.shape_cast %191 : vector<1x8x8xbf16> to vector<8x8xbf16>
      %cst_93 = arith.constant dense<0.000000e+00> : vector<64x8xf32>
      %193 = tpu.matmul %190, %192, %cst_93 {dimension_numbers = #tpu.dot_dimension_numbers<[1], [0], [0], [1], [0, 0, 1, 1], [], []>} : vector<64x8xbf16>, vector<8x8xbf16>, vector<64x8xf32> -> vector<64x8xf32>
      %194 = arith.addf %187, %193 : vector<64x8xf32>
      %c0_94 = arith.constant 0 : index
      %c0_95 = arith.constant 0 : index
      %195 = vector.load %arg3[%c0_94, %c0_95] : memref<1x8xf32, #tpu.memory_space<vmem>>, vector<1x8xf32>
      %196 = vector.broadcast %195 : vector<1x8xf32> to vector<64x8xf32>
      %197 = arith.addf %194, %196 : vector<64x8xf32>
      %cst_96 = arith.constant 0.000000e+00 : f32
      %198 = vector.broadcast %cst_96 : f32 to vector<64x8xf32>
      %199 = arith.maximumf %197, %198 : vector<64x8xf32>
      %200 = vector.shape_cast %199 : vector<64x8xf32> to vector<1x8x8x8xf32>
      %201 = arith.truncf %200 : vector<1x8x8x8xf32> to vector<1x8x8x8xbf16>
      %c1_i32_97 = arith.constant 1 : i32
      %202 = arith.addi %arg8, %c1_i32_97 : i32
      %203 = arith.index_cast %202 : i32 to index
      %c1_98 = arith.constant 1 : index
      %c1_99 = arith.constant 1 : index
      %c0_100 = arith.constant 0 : index
      %204 = vector.load %arg7[%203, %c1_98, %c1_99, %c0_100] : memref<10x10x10x8xbf16, #tpu.memory_space<vmem>>, vector<1x8x8x8xbf16>
      tpu.vector_store %arg7[%203, %c1_98, %c1_99, %c0_100], %201 {strides = array<i32>} : memref<10x10x10x8xbf16, #tpu.memory_space<vmem>>, vector<1x8x8x8xbf16>,
    }
    %c8_i32_3 = arith.constant 8 : i32
    %c0_i32_4 = arith.constant 0 : i32
    %c8_i32_5 = arith.constant 8 : i32
    %3 = arith.addi %c0_i32_4, %c8_i32_5 : i32
    %c1_i32_6 = arith.constant 1 : i32
    scf.for %arg8 = %c0_i32_4 to %3 step %c1_i32_6  : i32 {
      %4 = arith.index_cast %arg8 : i32 to index
      %c0_8 = arith.constant 0 : index
      %c0_9 = arith.constant 0 : index
      %c0_10 = arith.constant 0 : index
      %5 = vector.load %arg7[%4, %c0_8, %c0_9, %c0_10] : memref<10x10x10x8xbf16, #tpu.memory_space<vmem>>, vector<3x10x10x8xbf16>
      %6 = vector.extract_strided_slice %5 {offsets = [0, 0, 0, 0], sizes = [1, 8, 8, 8], strides = [1, 1, 1, 1]} : vector<3x10x10x8xbf16> to vector<1x8x8x8xbf16>
      %7 = vector.shape_cast %6 : vector<1x8x8x8xbf16> to vector<8x8x8xbf16>
      %8 = vector.shape_cast %7 : vector<8x8x8xbf16> to vector<64x8xbf16>
      %c0_11 = arith.constant 0 : index
      %c0_12 = arith.constant 0 : index
      %c0_13 = arith.constant 0 : index
      %9 = vector.load %arg4[%c0_11, %c0_12, %c0_13] : memref<27x8x8xbf16, #tpu.memory_space<vmem>>, vector<1x8x8xbf16>
      %10 = vector.shape_cast %9 : vector<1x8x8xbf16> to vector<8x8xbf16>
      %cst_14 = arith.constant dense<0.000000e+00> : vector<64x8xf32>
      %11 = tpu.matmul %8, %10, %cst_14 {dimension_numbers = #tpu.dot_dimension_numbers<[1], [0], [0], [1], [0, 0, 1, 1], [], []>} : vector<64x8xbf16>, vector<8x8xbf16>, vector<64x8xf32> -> vector<64x8xf32>
      %12 = vector.extract_strided_slice %5 {offsets = [0, 0, 1, 0], sizes = [1, 8, 8, 8], strides = [1, 1, 1, 1]} : vector<3x10x10x8xbf16> to vector<1x8x8x8xbf16>
      %13 = vector.shape_cast %12 : vector<1x8x8x8xbf16> to vector<8x8x8xbf16>
      %14 = vector.shape_cast %13 : vector<8x8x8xbf16> to vector<64x8xbf16>
      %c1 = arith.constant 1 : index
      %c0_15 = arith.constant 0 : index
      %c0_16 = arith.constant 0 : index
      %15 = vector.load %arg4[%c1, %c0_15, %c0_16] : memref<27x8x8xbf16, #tpu.memory_space<vmem>>, vector<1x8x8xbf16>
      %16 = vector.shape_cast %15 : vector<1x8x8xbf16> to vector<8x8xbf16>
      %cst_17 = arith.constant dense<0.000000e+00> : vector<64x8xf32>
      %17 = tpu.matmul %14, %16, %cst_17 {dimension_numbers = #tpu.dot_dimension_numbers<[1], [0], [0], [1], [0, 0, 1, 1], [], []>} : vector<64x8xbf16>, vector<8x8xbf16>, vector<64x8xf32> -> vector<64x8xf32>
      %18 = arith.addf %11, %17 : vector<64x8xf32>
      %19 = vector.extract_strided_slice %5 {offsets = [0, 0, 2, 0], sizes = [1, 8, 8, 8], strides = [1, 1, 1, 1]} : vector<3x10x10x8xbf16> to vector<1x8x8x8xbf16>
      %20 = vector.shape_cast %19 : vector<1x8x8x8xbf16> to vector<8x8x8xbf16>
      %21 = vector.shape_cast %20 : vector<8x8x8xbf16> to vector<64x8xbf16>
      %c2 = arith.constant 2 : index
      %c0_18 = arith.constant 0 : index
      %c0_19 = arith.constant 0 : index
      %22 = vector.load %arg4[%c2, %c0_18, %c0_19] : memref<27x8x8xbf16, #tpu.memory_space<vmem>>, vector<1x8x8xbf16>
      %23 = vector.shape_cast %22 : vector<1x8x8xbf16> to vector<8x8xbf16>
      %cst_20 = arith.constant dense<0.000000e+00> : vector<64x8xf32>
      %24 = tpu.matmul %21, %23, %cst_20 {dimension_numbers = #tpu.dot_dimension_numbers<[1], [0], [0], [1], [0, 0, 1, 1], [], []>} : vector<64x8xbf16>, vector<8x8xbf16>, vector<64x8xf32> -> vector<64x8xf32>
      %25 = arith.addf %18, %24 : vector<64x8xf32>
      %26 = vector.extract_strided_slice %5 {offsets = [0, 1, 0, 0], sizes = [1, 8, 8, 8], strides = [1, 1, 1, 1]} : vector<3x10x10x8xbf16> to vector<1x8x8x8xbf16>
      %27 = vector.shape_cast %26 : vector<1x8x8x8xbf16> to vector<8x8x8xbf16>
      %28 = vector.shape_cast %27 : vector<8x8x8xbf16> to vector<64x8xbf16>
      %c3 = arith.constant 3 : index
      %c0_21 = arith.constant 0 : index
      %c0_22 = arith.constant 0 : index
      %29 = vector.load %arg4[%c3, %c0_21, %c0_22] : memref<27x8x8xbf16, #tpu.memory_space<vmem>>, vector<1x8x8xbf16>
      %30 = vector.shape_cast %29 : vector<1x8x8xbf16> to vector<8x8xbf16>
      %cst_23 = arith.constant dense<0.000000e+00> : vector<64x8xf32>
      %31 = tpu.matmul %28, %30, %cst_23 {dimension_numbers = #tpu.dot_dimension_numbers<[1], [0], [0], [1], [0, 0, 1, 1], [], []>} : vector<64x8xbf16>, vector<8x8xbf16>, vector<64x8xf32> -> vector<64x8xf32>
      %32 = arith.addf %25, %31 : vector<64x8xf32>
      %33 = vector.extract_strided_slice %5 {offsets = [0, 1, 1, 0], sizes = [1, 8, 8, 8], strides = [1, 1, 1, 1]} : vector<3x10x10x8xbf16> to vector<1x8x8x8xbf16>
      %34 = vector.shape_cast %33 : vector<1x8x8x8xbf16> to vector<8x8x8xbf16>
      %35 = vector.shape_cast %34 : vector<8x8x8xbf16> to vector<64x8xbf16>
      %c4 = arith.constant 4 : index
      %c0_24 = arith.constant 0 : index
      %c0_25 = arith.constant 0 : index
      %36 = vector.load %arg4[%c4, %c0_24, %c0_25] : memref<27x8x8xbf16, #tpu.memory_space<vmem>>, vector<1x8x8xbf16>
      %37 = vector.shape_cast %36 : vector<1x8x8xbf16> to vector<8x8xbf16>
      %cst_26 = arith.constant dense<0.000000e+00> : vector<64x8xf32>
      %38 = tpu.matmul %35, %37, %cst_26 {dimension_numbers = #tpu.dot_dimension_numbers<[1], [0], [0], [1], [0, 0, 1, 1], [], []>} : vector<64x8xbf16>, vector<8x8xbf16>, vector<64x8xf32> -> vector<64x8xf32>
      %39 = arith.addf %32, %38 : vector<64x8xf32>
      %40 = vector.extract_strided_slice %5 {offsets = [0, 1, 2, 0], sizes = [1, 8, 8, 8], strides = [1, 1, 1, 1]} : vector<3x10x10x8xbf16> to vector<1x8x8x8xbf16>
      %41 = vector.shape_cast %40 : vector<1x8x8x8xbf16> to vector<8x8x8xbf16>
      %42 = vector.shape_cast %41 : vector<8x8x8xbf16> to vector<64x8xbf16>
      %c5 = arith.constant 5 : index
      %c0_27 = arith.constant 0 : index
      %c0_28 = arith.constant 0 : index
      %43 = vector.load %arg4[%c5, %c0_27, %c0_28] : memref<27x8x8xbf16, #tpu.memory_space<vmem>>, vector<1x8x8xbf16>
      %44 = vector.shape_cast %43 : vector<1x8x8xbf16> to vector<8x8xbf16>
      %cst_29 = arith.constant dense<0.000000e+00> : vector<64x8xf32>
      %45 = tpu.matmul %42, %44, %cst_29 {dimension_numbers = #tpu.dot_dimension_numbers<[1], [0], [0], [1], [0, 0, 1, 1], [], []>} : vector<64x8xbf16>, vector<8x8xbf16>, vector<64x8xf32> -> vector<64x8xf32>
      %46 = arith.addf %39, %45 : vector<64x8xf32>
      %47 = vector.extract_strided_slice %5 {offsets = [0, 2, 0, 0], sizes = [1, 8, 8, 8], strides = [1, 1, 1, 1]} : vector<3x10x10x8xbf16> to vector<1x8x8x8xbf16>
      %48 = vector.shape_cast %47 : vector<1x8x8x8xbf16> to vector<8x8x8xbf16>
      %49 = vector.shape_cast %48 : vector<8x8x8xbf16> to vector<64x8xbf16>
      %c6 = arith.constant 6 : index
      %c0_30 = arith.constant 0 : index
      %c0_31 = arith.constant 0 : index
      %50 = vector.load %arg4[%c6, %c0_30, %c0_31] : memref<27x8x8xbf16, #tpu.memory_space<vmem>>, vector<1x8x8xbf16>
      %51 = vector.shape_cast %50 : vector<1x8x8xbf16> to vector<8x8xbf16>
      %cst_32 = arith.constant dense<0.000000e+00> : vector<64x8xf32>
      %52 = tpu.matmul %49, %51, %cst_32 {dimension_numbers = #tpu.dot_dimension_numbers<[1], [0], [0], [1], [0, 0, 1, 1], [], []>} : vector<64x8xbf16>, vector<8x8xbf16>, vector<64x8xf32> -> vector<64x8xf32>
      %53 = arith.addf %46, %52 : vector<64x8xf32>
      %54 = vector.extract_strided_slice %5 {offsets = [0, 2, 1, 0], sizes = [1, 8, 8, 8], strides = [1, 1, 1, 1]} : vector<3x10x10x8xbf16> to vector<1x8x8x8xbf16>
      %55 = vector.shape_cast %54 : vector<1x8x8x8xbf16> to vector<8x8x8xbf16>
      %56 = vector.shape_cast %55 : vector<8x8x8xbf16> to vector<64x8xbf16>
      %c7 = arith.constant 7 : index
      %c0_33 = arith.constant 0 : index
      %c0_34 = arith.constant 0 : index
      %57 = vector.load %arg4[%c7, %c0_33, %c0_34] : memref<27x8x8xbf16, #tpu.memory_space<vmem>>, vector<1x8x8xbf16>
      %58 = vector.shape_cast %57 : vector<1x8x8xbf16> to vector<8x8xbf16>
      %cst_35 = arith.constant dense<0.000000e+00> : vector<64x8xf32>
      %59 = tpu.matmul %56, %58, %cst_35 {dimension_numbers = #tpu.dot_dimension_numbers<[1], [0], [0], [1], [0, 0, 1, 1], [], []>} : vector<64x8xbf16>, vector<8x8xbf16>, vector<64x8xf32> -> vector<64x8xf32>
      %60 = arith.addf %53, %59 : vector<64x8xf32>
      %61 = vector.extract_strided_slice %5 {offsets = [0, 2, 2, 0], sizes = [1, 8, 8, 8], strides = [1, 1, 1, 1]} : vector<3x10x10x8xbf16> to vector<1x8x8x8xbf16>
      %62 = vector.shape_cast %61 : vector<1x8x8x8xbf16> to vector<8x8x8xbf16>
      %63 = vector.shape_cast %62 : vector<8x8x8xbf16> to vector<64x8xbf16>
      %c8 = arith.constant 8 : index
      %c0_36 = arith.constant 0 : index
      %c0_37 = arith.constant 0 : index
      %64 = vector.load %arg4[%c8, %c0_36, %c0_37] : memref<27x8x8xbf16, #tpu.memory_space<vmem>>, vector<1x8x8xbf16>
      %65 = vector.shape_cast %64 : vector<1x8x8xbf16> to vector<8x8xbf16>
      %cst_38 = arith.constant dense<0.000000e+00> : vector<64x8xf32>
      %66 = tpu.matmul %63, %65, %cst_38 {dimension_numbers = #tpu.dot_dimension_numbers<[1], [0], [0], [1], [0, 0, 1, 1], [], []>} : vector<64x8xbf16>, vector<8x8xbf16>, vector<64x8xf32> -> vector<64x8xf32>
      %67 = arith.addf %60, %66 : vector<64x8xf32>
      %68 = vector.extract_strided_slice %5 {offsets = [1, 0, 0, 0], sizes = [1, 8, 8, 8], strides = [1, 1, 1, 1]} : vector<3x10x10x8xbf16> to vector<1x8x8x8xbf16>
      %69 = vector.shape_cast %68 : vector<1x8x8x8xbf16> to vector<8x8x8xbf16>
      %70 = vector.shape_cast %69 : vector<8x8x8xbf16> to vector<64x8xbf16>
      %c9 = arith.constant 9 : index
      %c0_39 = arith.constant 0 : index
      %c0_40 = arith.constant 0 : index
      %71 = vector.load %arg4[%c9, %c0_39, %c0_40] : memref<27x8x8xbf16, #tpu.memory_space<vmem>>, vector<1x8x8xbf16>
      %72 = vector.shape_cast %71 : vector<1x8x8xbf16> to vector<8x8xbf16>
      %cst_41 = arith.constant dense<0.000000e+00> : vector<64x8xf32>
      %73 = tpu.matmul %70, %72, %cst_41 {dimension_numbers = #tpu.dot_dimension_numbers<[1], [0], [0], [1], [0, 0, 1, 1], [], []>} : vector<64x8xbf16>, vector<8x8xbf16>, vector<64x8xf32> -> vector<64x8xf32>
      %74 = arith.addf %67, %73 : vector<64x8xf32>
      %75 = vector.extract_strided_slice %5 {offsets = [1, 0, 1, 0], sizes = [1, 8, 8, 8], strides = [1, 1, 1, 1]} : vector<3x10x10x8xbf16> to vector<1x8x8x8xbf16>
      %76 = vector.shape_cast %75 : vector<1x8x8x8xbf16> to vector<8x8x8xbf16>
      %77 = vector.shape_cast %76 : vector<8x8x8xbf16> to vector<64x8xbf16>
      %c10 = arith.constant 10 : index
      %c0_42 = arith.constant 0 : index
      %c0_43 = arith.constant 0 : index
      %78 = vector.load %arg4[%c10, %c0_42, %c0_43] : memref<27x8x8xbf16, #tpu.memory_space<vmem>>, vector<1x8x8xbf16>
      %79 = vector.shape_cast %78 : vector<1x8x8xbf16> to vector<8x8xbf16>
      %cst_44 = arith.constant dense<0.000000e+00> : vector<64x8xf32>
      %80 = tpu.matmul %77, %79, %cst_44 {dimension_numbers = #tpu.dot_dimension_numbers<[1], [0], [0], [1], [0, 0, 1, 1], [], []>} : vector<64x8xbf16>, vector<8x8xbf16>, vector<64x8xf32> -> vector<64x8xf32>
      %81 = arith.addf %74, %80 : vector<64x8xf32>
      %82 = vector.extract_strided_slice %5 {offsets = [1, 0, 2, 0], sizes = [1, 8, 8, 8], strides = [1, 1, 1, 1]} : vector<3x10x10x8xbf16> to vector<1x8x8x8xbf16>
      %83 = vector.shape_cast %82 : vector<1x8x8x8xbf16> to vector<8x8x8xbf16>
      %84 = vector.shape_cast %83 : vector<8x8x8xbf16> to vector<64x8xbf16>
      %c11 = arith.constant 11 : index
      %c0_45 = arith.constant 0 : index
      %c0_46 = arith.constant 0 : index
      %85 = vector.load %arg4[%c11, %c0_45, %c0_46] : memref<27x8x8xbf16, #tpu.memory_space<vmem>>, vector<1x8x8xbf16>
      %86 = vector.shape_cast %85 : vector<1x8x8xbf16> to vector<8x8xbf16>
      %cst_47 = arith.constant dense<0.000000e+00> : vector<64x8xf32>
      %87 = tpu.matmul %84, %86, %cst_47 {dimension_numbers = #tpu.dot_dimension_numbers<[1], [0], [0], [1], [0, 0, 1, 1], [], []>} : vector<64x8xbf16>, vector<8x8xbf16>, vector<64x8xf32> -> vector<64x8xf32>
      %88 = arith.addf %81, %87 : vector<64x8xf32>
      %89 = vector.extract_strided_slice %5 {offsets = [1, 1, 0, 0], sizes = [1, 8, 8, 8], strides = [1, 1, 1, 1]} : vector<3x10x10x8xbf16> to vector<1x8x8x8xbf16>
      %90 = vector.shape_cast %89 : vector<1x8x8x8xbf16> to vector<8x8x8xbf16>
      %91 = vector.shape_cast %90 : vector<8x8x8xbf16> to vector<64x8xbf16>
      %c12 = arith.constant 12 : index
      %c0_48 = arith.constant 0 : index
      %c0_49 = arith.constant 0 : index
      %92 = vector.load %arg4[%c12, %c0_48, %c0_49] : memref<27x8x8xbf16, #tpu.memory_space<vmem>>, vector<1x8x8xbf16>
      %93 = vector.shape_cast %92 : vector<1x8x8xbf16> to vector<8x8xbf16>
      %cst_50 = arith.constant dense<0.000000e+00> : vector<64x8xf32>
      %94 = tpu.matmul %91, %93, %cst_50 {dimension_numbers = #tpu.dot_dimension_numbers<[1], [0], [0], [1], [0, 0, 1, 1], [], []>} : vector<64x8xbf16>, vector<8x8xbf16>, vector<64x8xf32> -> vector<64x8xf32>
      %95 = arith.addf %88, %94 : vector<64x8xf32>
      %96 = vector.extract_strided_slice %5 {offsets = [1, 1, 1, 0], sizes = [1, 8, 8, 8], strides = [1, 1, 1, 1]} : vector<3x10x10x8xbf16> to vector<1x8x8x8xbf16>
      %97 = vector.shape_cast %96 : vector<1x8x8x8xbf16> to vector<8x8x8xbf16>
      %98 = vector.shape_cast %97 : vector<8x8x8xbf16> to vector<64x8xbf16>
      %c13 = arith.constant 13 : index
      %c0_51 = arith.constant 0 : index
      %c0_52 = arith.constant 0 : index
      %99 = vector.load %arg4[%c13, %c0_51, %c0_52] : memref<27x8x8xbf16, #tpu.memory_space<vmem>>, vector<1x8x8xbf16>
      %100 = vector.shape_cast %99 : vector<1x8x8xbf16> to vector<8x8xbf16>
      %cst_53 = arith.constant dense<0.000000e+00> : vector<64x8xf32>
      %101 = tpu.matmul %98, %100, %cst_53 {dimension_numbers = #tpu.dot_dimension_numbers<[1], [0], [0], [1], [0, 0, 1, 1], [], []>} : vector<64x8xbf16>, vector<8x8xbf16>, vector<64x8xf32> -> vector<64x8xf32>
      %102 = arith.addf %95, %101 : vector<64x8xf32>
      %103 = vector.extract_strided_slice %5 {offsets = [1, 1, 2, 0], sizes = [1, 8, 8, 8], strides = [1, 1, 1, 1]} : vector<3x10x10x8xbf16> to vector<1x8x8x8xbf16>
      %104 = vector.shape_cast %103 : vector<1x8x8x8xbf16> to vector<8x8x8xbf16>
      %105 = vector.shape_cast %104 : vector<8x8x8xbf16> to vector<64x8xbf16>
      %c14 = arith.constant 14 : index
      %c0_54 = arith.constant 0 : index
      %c0_55 = arith.constant 0 : index
      %106 = vector.load %arg4[%c14, %c0_54, %c0_55] : memref<27x8x8xbf16, #tpu.memory_space<vmem>>, vector<1x8x8xbf16>
      %107 = vector.shape_cast %106 : vector<1x8x8xbf16> to vector<8x8xbf16>
      %cst_56 = arith.constant dense<0.000000e+00> : vector<64x8xf32>
      %108 = tpu.matmul %105, %107, %cst_56 {dimension_numbers = #tpu.dot_dimension_numbers<[1], [0], [0], [1], [0, 0, 1, 1], [], []>} : vector<64x8xbf16>, vector<8x8xbf16>, vector<64x8xf32> -> vector<64x8xf32>
      %109 = arith.addf %102, %108 : vector<64x8xf32>
      %110 = vector.extract_strided_slice %5 {offsets = [1, 2, 0, 0], sizes = [1, 8, 8, 8], strides = [1, 1, 1, 1]} : vector<3x10x10x8xbf16> to vector<1x8x8x8xbf16>
      %111 = vector.shape_cast %110 : vector<1x8x8x8xbf16> to vector<8x8x8xbf16>
      %112 = vector.shape_cast %111 : vector<8x8x8xbf16> to vector<64x8xbf16>
      %c15 = arith.constant 15 : index
      %c0_57 = arith.constant 0 : index
      %c0_58 = arith.constant 0 : index
      %113 = vector.load %arg4[%c15, %c0_57, %c0_58] : memref<27x8x8xbf16, #tpu.memory_space<vmem>>, vector<1x8x8xbf16>
      %114 = vector.shape_cast %113 : vector<1x8x8xbf16> to vector<8x8xbf16>
      %cst_59 = arith.constant dense<0.000000e+00> : vector<64x8xf32>
      %115 = tpu.matmul %112, %114, %cst_59 {dimension_numbers = #tpu.dot_dimension_numbers<[1], [0], [0], [1], [0, 0, 1, 1], [], []>} : vector<64x8xbf16>, vector<8x8xbf16>, vector<64x8xf32> -> vector<64x8xf32>
      %116 = arith.addf %109, %115 : vector<64x8xf32>
      %117 = vector.extract_strided_slice %5 {offsets = [1, 2, 1, 0], sizes = [1, 8, 8, 8], strides = [1, 1, 1, 1]} : vector<3x10x10x8xbf16> to vector<1x8x8x8xbf16>
      %118 = vector.shape_cast %117 : vector<1x8x8x8xbf16> to vector<8x8x8xbf16>
      %119 = vector.shape_cast %118 : vector<8x8x8xbf16> to vector<64x8xbf16>
      %c16 = arith.constant 16 : index
      %c0_60 = arith.constant 0 : index
      %c0_61 = arith.constant 0 : index
      %120 = vector.load %arg4[%c16, %c0_60, %c0_61] : memref<27x8x8xbf16, #tpu.memory_space<vmem>>, vector<1x8x8xbf16>
      %121 = vector.shape_cast %120 : vector<1x8x8xbf16> to vector<8x8xbf16>
      %cst_62 = arith.constant dense<0.000000e+00> : vector<64x8xf32>
      %122 = tpu.matmul %119, %121, %cst_62 {dimension_numbers = #tpu.dot_dimension_numbers<[1], [0], [0], [1], [0, 0, 1, 1], [], []>} : vector<64x8xbf16>, vector<8x8xbf16>, vector<64x8xf32> -> vector<64x8xf32>
      %123 = arith.addf %116, %122 : vector<64x8xf32>
      %124 = vector.extract_strided_slice %5 {offsets = [1, 2, 2, 0], sizes = [1, 8, 8, 8], strides = [1, 1, 1, 1]} : vector<3x10x10x8xbf16> to vector<1x8x8x8xbf16>
      %125 = vector.shape_cast %124 : vector<1x8x8x8xbf16> to vector<8x8x8xbf16>
      %126 = vector.shape_cast %125 : vector<8x8x8xbf16> to vector<64x8xbf16>
      %c17 = arith.constant 17 : index
      %c0_63 = arith.constant 0 : index
      %c0_64 = arith.constant 0 : index
      %127 = vector.load %arg4[%c17, %c0_63, %c0_64] : memref<27x8x8xbf16, #tpu.memory_space<vmem>>, vector<1x8x8xbf16>
      %128 = vector.shape_cast %127 : vector<1x8x8xbf16> to vector<8x8xbf16>
      %cst_65 = arith.constant dense<0.000000e+00> : vector<64x8xf32>
      %129 = tpu.matmul %126, %128, %cst_65 {dimension_numbers = #tpu.dot_dimension_numbers<[1], [0], [0], [1], [0, 0, 1, 1], [], []>} : vector<64x8xbf16>, vector<8x8xbf16>, vector<64x8xf32> -> vector<64x8xf32>
      %130 = arith.addf %123, %129 : vector<64x8xf32>
      %131 = vector.extract_strided_slice %5 {offsets = [2, 0, 0, 0], sizes = [1, 8, 8, 8], strides = [1, 1, 1, 1]} : vector<3x10x10x8xbf16> to vector<1x8x8x8xbf16>
      %132 = vector.shape_cast %131 : vector<1x8x8x8xbf16> to vector<8x8x8xbf16>
      %133 = vector.shape_cast %132 : vector<8x8x8xbf16> to vector<64x8xbf16>
      %c18 = arith.constant 18 : index
      %c0_66 = arith.constant 0 : index
      %c0_67 = arith.constant 0 : index
      %134 = vector.load %arg4[%c18, %c0_66, %c0_67] : memref<27x8x8xbf16, #tpu.memory_space<vmem>>, vector<1x8x8xbf16>
      %135 = vector.shape_cast %134 : vector<1x8x8xbf16> to vector<8x8xbf16>
      %cst_68 = arith.constant dense<0.000000e+00> : vector<64x8xf32>
      %136 = tpu.matmul %133, %135, %cst_68 {dimension_numbers = #tpu.dot_dimension_numbers<[1], [0], [0], [1], [0, 0, 1, 1], [], []>} : vector<64x8xbf16>, vector<8x8xbf16>, vector<64x8xf32> -> vector<64x8xf32>
      %137 = arith.addf %130, %136 : vector<64x8xf32>
      %138 = vector.extract_strided_slice %5 {offsets = [2, 0, 1, 0], sizes = [1, 8, 8, 8], strides = [1, 1, 1, 1]} : vector<3x10x10x8xbf16> to vector<1x8x8x8xbf16>
      %139 = vector.shape_cast %138 : vector<1x8x8x8xbf16> to vector<8x8x8xbf16>
      %140 = vector.shape_cast %139 : vector<8x8x8xbf16> to vector<64x8xbf16>
      %c19 = arith.constant 19 : index
      %c0_69 = arith.constant 0 : index
      %c0_70 = arith.constant 0 : index
      %141 = vector.load %arg4[%c19, %c0_69, %c0_70] : memref<27x8x8xbf16, #tpu.memory_space<vmem>>, vector<1x8x8xbf16>
      %142 = vector.shape_cast %141 : vector<1x8x8xbf16> to vector<8x8xbf16>
      %cst_71 = arith.constant dense<0.000000e+00> : vector<64x8xf32>
      %143 = tpu.matmul %140, %142, %cst_71 {dimension_numbers = #tpu.dot_dimension_numbers<[1], [0], [0], [1], [0, 0, 1, 1], [], []>} : vector<64x8xbf16>, vector<8x8xbf16>, vector<64x8xf32> -> vector<64x8xf32>
      %144 = arith.addf %137, %143 : vector<64x8xf32>
      %145 = vector.extract_strided_slice %5 {offsets = [2, 0, 2, 0], sizes = [1, 8, 8, 8], strides = [1, 1, 1, 1]} : vector<3x10x10x8xbf16> to vector<1x8x8x8xbf16>
      %146 = vector.shape_cast %145 : vector<1x8x8x8xbf16> to vector<8x8x8xbf16>
      %147 = vector.shape_cast %146 : vector<8x8x8xbf16> to vector<64x8xbf16>
      %c20 = arith.constant 20 : index
      %c0_72 = arith.constant 0 : index
      %c0_73 = arith.constant 0 : index
      %148 = vector.load %arg4[%c20, %c0_72, %c0_73] : memref<27x8x8xbf16, #tpu.memory_space<vmem>>, vector<1x8x8xbf16>
      %149 = vector.shape_cast %148 : vector<1x8x8xbf16> to vector<8x8xbf16>
      %cst_74 = arith.constant dense<0.000000e+00> : vector<64x8xf32>
      %150 = tpu.matmul %147, %149, %cst_74 {dimension_numbers = #tpu.dot_dimension_numbers<[1], [0], [0], [1], [0, 0, 1, 1], [], []>} : vector<64x8xbf16>, vector<8x8xbf16>, vector<64x8xf32> -> vector<64x8xf32>
      %151 = arith.addf %144, %150 : vector<64x8xf32>
      %152 = vector.extract_strided_slice %5 {offsets = [2, 1, 0, 0], sizes = [1, 8, 8, 8], strides = [1, 1, 1, 1]} : vector<3x10x10x8xbf16> to vector<1x8x8x8xbf16>
      %153 = vector.shape_cast %152 : vector<1x8x8x8xbf16> to vector<8x8x8xbf16>
      %154 = vector.shape_cast %153 : vector<8x8x8xbf16> to vector<64x8xbf16>
      %c21 = arith.constant 21 : index
      %c0_75 = arith.constant 0 : index
      %c0_76 = arith.constant 0 : index
      %155 = vector.load %arg4[%c21, %c0_75, %c0_76] : memref<27x8x8xbf16, #tpu.memory_space<vmem>>, vector<1x8x8xbf16>
      %156 = vector.shape_cast %155 : vector<1x8x8xbf16> to vector<8x8xbf16>
      %cst_77 = arith.constant dense<0.000000e+00> : vector<64x8xf32>
      %157 = tpu.matmul %154, %156, %cst_77 {dimension_numbers = #tpu.dot_dimension_numbers<[1], [0], [0], [1], [0, 0, 1, 1], [], []>} : vector<64x8xbf16>, vector<8x8xbf16>, vector<64x8xf32> -> vector<64x8xf32>
      %158 = arith.addf %151, %157 : vector<64x8xf32>
      %159 = vector.extract_strided_slice %5 {offsets = [2, 1, 1, 0], sizes = [1, 8, 8, 8], strides = [1, 1, 1, 1]} : vector<3x10x10x8xbf16> to vector<1x8x8x8xbf16>
      %160 = vector.shape_cast %159 : vector<1x8x8x8xbf16> to vector<8x8x8xbf16>
      %161 = vector.shape_cast %160 : vector<8x8x8xbf16> to vector<64x8xbf16>
      %c22 = arith.constant 22 : index
      %c0_78 = arith.constant 0 : index
      %c0_79 = arith.constant 0 : index
      %162 = vector.load %arg4[%c22, %c0_78, %c0_79] : memref<27x8x8xbf16, #tpu.memory_space<vmem>>, vector<1x8x8xbf16>
      %163 = vector.shape_cast %162 : vector<1x8x8xbf16> to vector<8x8xbf16>
      %cst_80 = arith.constant dense<0.000000e+00> : vector<64x8xf32>
      %164 = tpu.matmul %161, %163, %cst_80 {dimension_numbers = #tpu.dot_dimension_numbers<[1], [0], [0], [1], [0, 0, 1, 1], [], []>} : vector<64x8xbf16>, vector<8x8xbf16>, vector<64x8xf32> -> vector<64x8xf32>
      %165 = arith.addf %158, %164 : vector<64x8xf32>
      %166 = vector.extract_strided_slice %5 {offsets = [2, 1, 2, 0], sizes = [1, 8, 8, 8], strides = [1, 1, 1, 1]} : vector<3x10x10x8xbf16> to vector<1x8x8x8xbf16>
      %167 = vector.shape_cast %166 : vector<1x8x8x8xbf16> to vector<8x8x8xbf16>
      %168 = vector.shape_cast %167 : vector<8x8x8xbf16> to vector<64x8xbf16>
      %c23 = arith.constant 23 : index
      %c0_81 = arith.constant 0 : index
      %c0_82 = arith.constant 0 : index
      %169 = vector.load %arg4[%c23, %c0_81, %c0_82] : memref<27x8x8xbf16, #tpu.memory_space<vmem>>, vector<1x8x8xbf16>
      %170 = vector.shape_cast %169 : vector<1x8x8xbf16> to vector<8x8xbf16>
      %cst_83 = arith.constant dense<0.000000e+00> : vector<64x8xf32>
      %171 = tpu.matmul %168, %170, %cst_83 {dimension_numbers = #tpu.dot_dimension_numbers<[1], [0], [0], [1], [0, 0, 1, 1], [], []>} : vector<64x8xbf16>, vector<8x8xbf16>, vector<64x8xf32> -> vector<64x8xf32>
      %172 = arith.addf %165, %171 : vector<64x8xf32>
      %173 = vector.extract_strided_slice %5 {offsets = [2, 2, 0, 0], sizes = [1, 8, 8, 8], strides = [1, 1, 1, 1]} : vector<3x10x10x8xbf16> to vector<1x8x8x8xbf16>
      %174 = vector.shape_cast %173 : vector<1x8x8x8xbf16> to vector<8x8x8xbf16>
      %175 = vector.shape_cast %174 : vector<8x8x8xbf16> to vector<64x8xbf16>
      %c24 = arith.constant 24 : index
      %c0_84 = arith.constant 0 : index
      %c0_85 = arith.constant 0 : index
      %176 = vector.load %arg4[%c24, %c0_84, %c0_85] : memref<27x8x8xbf16, #tpu.memory_space<vmem>>, vector<1x8x8xbf16>
      %177 = vector.shape_cast %176 : vector<1x8x8xbf16> to vector<8x8xbf16>
      %cst_86 = arith.constant dense<0.000000e+00> : vector<64x8xf32>
      %178 = tpu.matmul %175, %177, %cst_86 {dimension_numbers = #tpu.dot_dimension_numbers<[1], [0], [0], [1], [0, 0, 1, 1], [], []>} : vector<64x8xbf16>, vector<8x8xbf16>, vector<64x8xf32> -> vector<64x8xf32>
      %179 = arith.addf %172, %178 : vector<64x8xf32>
      %180 = vector.extract_strided_slice %5 {offsets = [2, 2, 1, 0], sizes = [1, 8, 8, 8], strides = [1, 1, 1, 1]} : vector<3x10x10x8xbf16> to vector<1x8x8x8xbf16>
      %181 = vector.shape_cast %180 : vector<1x8x8x8xbf16> to vector<8x8x8xbf16>
      %182 = vector.shape_cast %181 : vector<8x8x8xbf16> to vector<64x8xbf16>
      %c25 = arith.constant 25 : index
      %c0_87 = arith.constant 0 : index
      %c0_88 = arith.constant 0 : index
      %183 = vector.load %arg4[%c25, %c0_87, %c0_88] : memref<27x8x8xbf16, #tpu.memory_space<vmem>>, vector<1x8x8xbf16>
      %184 = vector.shape_cast %183 : vector<1x8x8xbf16> to vector<8x8xbf16>
      %cst_89 = arith.constant dense<0.000000e+00> : vector<64x8xf32>
      %185 = tpu.matmul %182, %184, %cst_89 {dimension_numbers = #tpu.dot_dimension_numbers<[1], [0], [0], [1], [0, 0, 1, 1], [], []>} : vector<64x8xbf16>, vector<8x8xbf16>, vector<64x8xf32> -> vector<64x8xf32>
      %186 = arith.addf %179, %185 : vector<64x8xf32>
      %187 = vector.extract_strided_slice %5 {offsets = [2, 2, 2, 0], sizes = [1, 8, 8, 8], strides = [1, 1, 1, 1]} : vector<3x10x10x8xbf16> to vector<1x8x8x8xbf16>
      %188 = vector.shape_cast %187 : vector<1x8x8x8xbf16> to vector<8x8x8xbf16>
      %189 = vector.shape_cast %188 : vector<8x8x8xbf16> to vector<64x8xbf16>
      %c26 = arith.constant 26 : index
      %c0_90 = arith.constant 0 : index
      %c0_91 = arith.constant 0 : index
      %190 = vector.load %arg4[%c26, %c0_90, %c0_91] : memref<27x8x8xbf16, #tpu.memory_space<vmem>>, vector<1x8x8xbf16>
      %191 = vector.shape_cast %190 : vector<1x8x8xbf16> to vector<8x8xbf16>
      %cst_92 = arith.constant dense<0.000000e+00> : vector<64x8xf32>
      %192 = tpu.matmul %189, %191, %cst_92 {dimension_numbers = #tpu.dot_dimension_numbers<[1], [0], [0], [1], [0, 0, 1, 1], [], []>} : vector<64x8xbf16>, vector<8x8xbf16>, vector<64x8xf32> -> vector<64x8xf32>
      %193 = arith.addf %186, %192 : vector<64x8xf32>
      %c1_i32_93 = arith.constant 1 : i32
      %194 = arith.addi %arg8, %c1_i32_93 : i32
      %c0_94 = arith.constant 0 : index
      %195 = arith.index_cast %194 : i32 to index
      %c1_95 = arith.constant 1 : index
      %c1_96 = arith.constant 1 : index
      %c0_97 = arith.constant 0 : index
      %196 = vector.load %arg1[%c0_94, %195, %c1_95, %c1_96, %c0_97] : memref<1x10x10x10x8xbf16, #tpu.memory_space<vmem>>, vector<1x1x8x8x8xbf16>
      %197 = vector.shape_cast %196 : vector<1x1x8x8x8xbf16> to vector<1x8x8x8xbf16>
      %c0_98 = arith.constant 0 : index
      %c0_99 = arith.constant 0 : index
      %198 = vector.load %arg5[%c0_98, %c0_99] : memref<1x8xf32, #tpu.memory_space<vmem>>, vector<1x8xf32>
      %199 = vector.broadcast %198 : vector<1x8xf32> to vector<64x8xf32>
      %200 = arith.addf %193, %199 : vector<64x8xf32>
      %201 = vector.shape_cast %197 : vector<1x8x8x8xbf16> to vector<64x8xbf16>
      %202 = arith.extf %201 : vector<64x8xbf16> to vector<64x8xf32>
      %203 = arith.addf %200, %202 : vector<64x8xf32>
      %cst_100 = arith.constant 0.000000e+00 : f32
      %204 = vector.broadcast %cst_100 : f32 to vector<64x8xf32>
      %205 = arith.maximumf %203, %204 : vector<64x8xf32>
      %206 = vector.shape_cast %205 : vector<64x8xf32> to vector<1x64x8xf32>
      %c0_101 = arith.constant 0 : index
      %207 = arith.index_cast %arg8 : i32 to index
      %c0_102 = arith.constant 0 : index
      %c0_103 = arith.constant 0 : index
      %208 = vector.load %arg6[%c0_101, %207, %c0_102, %c0_103] : memref<1x8x64x8xf32, #tpu.memory_space<vmem>>, vector<1x1x64x8xf32>
      %209 = vector.shape_cast %208 : vector<1x1x64x8xf32> to vector<1x64x8xf32>
      %210 = vector.shape_cast %206 : vector<1x64x8xf32> to vector<1x1x64x8xf32>
      tpu.vector_store %arg6[%c0_101, %207, %c0_102, %c0_103], %210 {strides = array<i32>} : memref<1x8x64x8xf32, #tpu.memory_space<vmem>>, vector<1x1x64x8xf32>,
    }
    %c8_i32_7 = arith.constant 8 : i32
    return
  }
  func.func @transform_0(%arg0: i32) -> (i32, i32, i32, i32, i32) {
    %c0_i32 = arith.constant 0 : i32
    %c0_i32_0 = arith.constant 0 : i32
    %c0_i32_1 = arith.constant 0 : i32
    %c0_i32_2 = arith.constant 0 : i32
    %c0_i32_3 = arith.constant 0 : i32
    return %arg0, %c0_i32, %c0_i32_0, %c0_i32_1, %c0_i32_2 : i32, i32, i32, i32, i32
  }
  func.func @transform_1(%arg0: i32) -> (i32, i32, i32) {
    %c0_i32 = arith.constant 0 : i32
    %c0_i32_0 = arith.constant 0 : i32
    %c0_i32_1 = arith.constant 0 : i32
    %c0_i32_2 = arith.constant 0 : i32
    return %c0_i32, %c0_i32_0, %c0_i32_1 : i32, i32, i32
  }
  func.func @transform_2(%arg0: i32) -> (i32, i32) {
    %c0_i32 = arith.constant 0 : i32
    %c0_i32_0 = arith.constant 0 : i32
    %c0_i32_1 = arith.constant 0 : i32
    return %c0_i32, %c0_i32_0 : i32, i32
  }
  func.func @transform_3(%arg0: i32) -> (i32, i32, i32) {
    %c0_i32 = arith.constant 0 : i32
    %c0_i32_0 = arith.constant 0 : i32
    %c0_i32_1 = arith.constant 0 : i32
    %c0_i32_2 = arith.constant 0 : i32
    return %c0_i32, %c0_i32_0, %c0_i32_1 : i32, i32, i32
  }
  func.func @transform_4(%arg0: i32) -> (i32, i32) {
    %c0_i32 = arith.constant 0 : i32
    %c0_i32_0 = arith.constant 0 : i32
    %c0_i32_1 = arith.constant 0 : i32
    return %c0_i32, %c0_i32_0 : i32, i32
  }
  func.func @transform_5(%arg0: i32) -> (i32, i32, i32, i32) {
    %c0_i32 = arith.constant 0 : i32
    %c0_i32_0 = arith.constant 0 : i32
    %c0_i32_1 = arith.constant 0 : i32
    %c0_i32_2 = arith.constant 0 : i32
    return %arg0, %c0_i32, %c0_i32_0, %c0_i32_1 : i32, i32, i32, i32
  }
}

</mosaic_0001>

<bundles_post_ra>
// kernel: basic_block_pallas.1
= control target key start
LH: loop header
LB: loop body
LE: loop exit
PB: predicated region body
PF: predicated region fallthrough
CT: control target
= control target key end

     0   :  { %s9264_s18 = smov 0   ;;  %s12026_s0 = inlined_call_operand.vmem [shape: bf16[2,10,10,10,8], index: 0, kind: input, shape index: {}]   ;;  %s12027_s1 = inlined_call_operand.vmem [shape: bf16[27,8,8], index: 1, kind: input, shape index: {}]   ;;  %s12028_s2 = inlined_call_operand.vmem [shape: f32[1,8], index: 2, kind: input, shape index: {}]   ;;  %s12029_s3 = inlined_call_operand.vmem [shape: bf16[27,8,8], index: 3, kind: input, shape index: {}]   ;;  %s12030_s4 = inlined_call_operand.vmem [shape: f32[1,8], index: 4, kind: input, shape index: {}]   ;;  %s12031_s5 = inlined_call_operand.vmem [shape: f32[2,8,64,8], index: 5, kind: output, shape index: {}]  }
   0x1 LB: > { %s7251_s19 = sadd.s32 4294967295, %s9223_s18   ;;  %p7255_p0 = scmp.ge.s32.totalorder %s9223_s18, 1  ;;  %s9223_s18 = sphi %s9264_s18, %s15_s18  }
   0x2   : > { %p187_p1 = scmp.lt.s32.totalorder %s9223_s18, 3 }
   0x4   : > { %p188_p2 = pnand %p7255_p0, %p187_p1 }
   0x5   : > { %p9274_p3 = scmp.lt.s32.totalorder (!%p188_p2), %s7251_s19, 1  ;;  %vm226_vm0 = vcmask (!%p188_p2), 60416   ;;  %vm228_vm1 = vcmask (!%p188_p2), 57344   ;;  %v9233_v0 = vmov (!%p188_p2), 0   ;;  %s9692_s29 = smov (!%p188_p2), 0  }
   0x6   : > { %191 = sbr.rel (%p188_p2) target bundleno = 1059 (0x423), region = 40  ;;  %227 = vst.msk [vmem:[#allocation2] sm:$0xf] (!%p188_p2), %vm226_vm0, %v9233_v0  ;;  %230 = vst.msk [vmem:[#allocation2 + $0x8] sm:$0xf] (!%p188_p2), %vm226_vm0, %v9233_v0 }
   0x7   : > { %232 = vst.msk [vmem:[#allocation2 + $0x10] sm:$0xf] (!%p188_p2), %vm226_vm0, %v9233_v0  ;;  %234 = vst.msk [vmem:[#allocation2 + $0x18] sm:$0xf] (!%p188_p2), %vm226_vm0, %v9233_v0 }
   0x8   : > { %236 = vst.msk [vmem:[#allocation2 + $0x20] sm:$0xf] (!%p188_p2), %vm226_vm0, %v9233_v0  ;;  %238 = vst.msk [vmem:[#allocation2 + $0x28] sm:$0xf] (!%p188_p2), %vm226_vm0, %v9233_v0 }
   0x9   : > { %240 = vst.msk [vmem:[#allocation2 + $0x30] sm:$0xf] (!%p188_p2), %vm226_vm0, %v9233_v0  ;;  %242 = vst.msk [vmem:[#allocation2 + $0x38] sm:$0xf] (!%p188_p2), %vm226_vm0, %v9233_v0 }
   0xa   : > { %244 = vst.msk [vmem:[#allocation2 + $0x40] sm:$0xf] (!%p188_p2), %vm226_vm0, %v9233_v0  ;;  %246 = vst.msk [vmem:[#allocation2 + $0x48] sm:$0xf] (!%p188_p2), %vm226_vm0, %v9233_v0 }
   0xb   : > { %248 = vst.msk [vmem:[#allocation2 + $0x50] sm:$0xf] (!%p188_p2), %vm226_vm0, %v9233_v0  ;;  %250 = vst.msk [vmem:[#allocation2 + $0x58] sm:$0xf] (!%p188_p2), %vm226_vm0, %v9233_v0 }
   0xc   : > { %252 = vst.msk [vmem:[#allocation2 + $0x60] sm:$0xf] (!%p188_p2), %vm226_vm0, %v9233_v0  ;;  %254 = vst.msk [vmem:[#allocation2 + $0x68] sm:$0xf] (!%p188_p2), %vm226_vm0, %v9233_v0 }
   0xd   : > { %256 = vst.msk [vmem:[#allocation2 + $0x70] sm:$0xf] %vm226_vm0, %v9233_v0  ;;  %258 = vst.msk [vmem:[#allocation2 + $0x78] sm:$0xf] %vm226_vm0, %v9233_v0  ;;  %s12179_s19 = smov (!%p9274_p3, %s7251_s19), 1 }
   0xe   : > { %260 = vst.msk [vmem:[#allocation2 + $0x80] sm:$0xf] %vm226_vm0, %v9233_v0  ;;  %262 = vst.msk [vmem:[#allocation2 + $0x88] sm:$0xf] %vm226_vm0, %v9233_v0  ;;  %s9111_s21 = smul.u32 800, %s12179_s19  ;;  %s7814_s22 = sshll.u32 %s12179_s19, 9 }
   0xf   : > { %264 = vst.msk [vmem:[#allocation2 + $0x90] sm:$0xf] %vm226_vm0, %v9233_v0  ;;  %266 = vst.msk [vmem:[#allocation2 + $0x98] sm:$0xf] %vm226_vm0, %v9233_v0  ;;  %s9685_s25 = scalar_lea.vmem %s12031_s5, %s7814_s22 }
  0x10   : > { %268 = vst.msk [vmem:[#allocation2 + $0xa0] sm:$0xf] %vm226_vm0, %v9233_v0  ;;  %270 = vst.msk [vmem:[#allocation2 + $0xa8] sm:$0xf] %vm226_vm0, %v9233_v0  ;;  %s9690_s28 = scalar_lea.vmem %s12026_s0, %s9111_s21 }
  0x11   : > { %272 = vst.msk [vmem:[#allocation2 + $0xb0] sm:$0xf] %vm226_vm0, %v9233_v0  ;;  %274 = vst.msk [vmem:[#allocation2 + $0xb8] sm:$0xf] %vm226_vm0, %v9233_v0 }
  0x12   : > { %276 = vst.msk [vmem:[#allocation2 + $0xc0] sm:$0xf] %vm226_vm0, %v9233_v0  ;;  %278 = vst.msk [vmem:[#allocation2 + $0xc8] sm:$0xf] %vm226_vm0, %v9233_v0 }
  0x13   : > { %280 = vst.msk [vmem:[#allocation2 + $0xd0] sm:$0xf] %vm226_vm0, %v9233_v0  ;;  %282 = vst.msk [vmem:[#allocation2 + $0xd8] sm:$0xf] %vm226_vm0, %v9233_v0 }
  0x14   : > { %284 = vst.msk [vmem:[#allocation2 + $0xe0] sm:$0xf] %vm226_vm0, %v9233_v0  ;;  %286 = vst.msk [vmem:[#allocation2 + $0xe8] sm:$0xf] %vm226_vm0, %v9233_v0 }
  0x15   : > { %288 = vst.msk [vmem:[#allocation2 + $0xf0] sm:$0xf] %vm226_vm0, %v9233_v0  ;;  %290 = vst.msk [vmem:[#allocation2 + $0xf8] sm:$0xf] %vm226_vm0, %v9233_v0 }
  0x16   : > { %292 = vst.msk [vmem:[#allocation2 + $0x100] sm:$0xf] %vm226_vm0, %v9233_v0  ;;  %294 = vst.msk [vmem:[#allocation2 + $0x108] sm:$0xf] %vm226_vm0, %v9233_v0 }
  0x17   : > { %296 = vst.msk [vmem:[#allocation2 + $0x110] sm:$0xf] %vm226_vm0, %v9233_v0  ;;  %298 = vst.msk [vmem:[#allocation2 + $0x118] sm:$0xf] %vm226_vm0, %v9233_v0 }
  0x18   : > { %300 = vst.msk [vmem:[#allocation2 + $0x120] sm:$0xf] %vm226_vm0, %v9233_v0  ;;  %302 = vst.msk [vmem:[#allocation2 + $0x128] sm:$0xf] %vm226_vm0, %v9233_v0 }
  0x19   : > { %304 = vst.msk [vmem:[#allocation2 + $0x130] sm:$0xf] %vm226_vm0, %v9233_v0  ;;  %306 = vst.msk [vmem:[#allocation2 + $0x138] sm:$0xf] %vm226_vm0, %v9233_v0 }
  0x1a   : > { %308 = vst.msk [vmem:[#allocation2 + $0x140] sm:$0xf] %vm226_vm0, %v9233_v0  ;;  %310 = vst.msk [vmem:[#allocation2 + $0x148] sm:$0xf] %vm226_vm0, %v9233_v0 }
  0x1b   : > { %312 = vst.msk [vmem:[#allocation2 + $0x150] sm:$0xf] %vm226_vm0, %v9233_v0  ;;  %314 = vst.msk [vmem:[#allocation2 + $0x158] sm:$0xf] %vm226_vm0, %v9233_v0 }
  0x1c   : > { %316 = vst.msk [vmem:[#allocation2 + $0x160] sm:$0xf] %vm226_vm0, %v9233_v0  ;;  %318 = vst.msk [vmem:[#allocation2 + $0x168] sm:$0xf] %vm226_vm0, %v9233_v0 }
  0x1d   : > { %320 = vst.msk [vmem:[#allocation2 + $0x170] sm:$0xf] %vm226_vm0, %v9233_v0  ;;  %322 = vst.msk [vmem:[#allocation2 + $0x178] sm:$0xf] %vm226_vm0, %v9233_v0 }
  0x1e   : > { %324 = vst.msk [vmem:[#allocation2 + $0x180] sm:$0xf] %vm226_vm0, %v9233_v0  ;;  %326 = vst.msk [vmem:[#allocation2 + $0x188] sm:$0xf] %vm226_vm0, %v9233_v0 }
  0x1f   : > { %328 = vst.msk [vmem:[#allocation2 + $0x190] sm:$0xf] %vm226_vm0, %v9233_v0  ;;  %330 = vst.msk [vmem:[#allocation2 + $0x198] sm:$0xf] %vm226_vm0, %v9233_v0 }
  0x20   : > { %332 = vst.msk [vmem:[#allocation2 + $0x1a0] sm:$0xf] %vm226_vm0, %v9233_v0  ;;  %334 = vst.msk [vmem:[#allocation2 + $0x1a8] sm:$0xf] %vm226_vm0, %v9233_v0 }
  0x21   : > { %336 = vst.msk [vmem:[#allocation2 + $0x1b0] sm:$0xf] %vm226_vm0, %v9233_v0  ;;  %338 = vst.msk [vmem:[#allocation2 + $0x1b8] sm:$0xf] %vm226_vm0, %v9233_v0 }
  0x22   : > { %340 = vst.msk [vmem:[#allocation2 + $0x1c0] sm:$0xf] %vm226_vm0, %v9233_v0  ;;  %342 = vst.msk [vmem:[#allocation2 + $0x1c8] sm:$0xf] %vm226_vm0, %v9233_v0 }
  0x23   : > { %344 = vst.msk [vmem:[#allocation2 + $0x1d0] sm:$0xf] %vm226_vm0, %v9233_v0  ;;  %346 = vst.msk [vmem:[#allocation2 + $0x1d8] sm:$0xf] %vm226_vm0, %v9233_v0 }
  0x24   : > { %348 = vst.msk [vmem:[#allocation2 + $0x1e0] sm:$0xf] %vm226_vm0, %v9233_v0  ;;  %350 = vst.msk [vmem:[#allocation2 + $0x1e8] sm:$0xf] %vm226_vm0, %v9233_v0 }
  0x25   : > { %352 = vst.msk [vmem:[#allocation2 + $0x1f0] sm:$0xf] %vm226_vm0, %v9233_v0  ;;  %354 = vst.msk [vmem:[#allocation2 + $0x1f8] sm:$0xf] %vm226_vm0, %v9233_v0 }
  0x26   : > { %356 = vst.msk [vmem:[#allocation2 + $0x200] sm:$0xf] %vm226_vm0, %v9233_v0  ;;  %358 = vst.msk [vmem:[#allocation2 + $0x208] sm:$0xf] %vm226_vm0, %v9233_v0 }
  0x27   : > { %360 = vst.msk [vmem:[#allocation2 + $0x210] sm:$0xf] %vm226_vm0, %v9233_v0  ;;  %362 = vst.msk [vmem:[#allocation2 + $0x218] sm:$0xf] %vm226_vm0, %v9233_v0 }
  0x28   : > { %364 = vst.msk [vmem:[#allocation2 + $0x220] sm:$0xf] %vm226_vm0, %v9233_v0  ;;  %366 = vst.msk [vmem:[#allocation2 + $0x228] sm:$0xf] %vm226_vm0, %v9233_v0 }
  0x29   : > { %368 = vst.msk [vmem:[#allocation2 + $0x230] sm:$0xf] %vm226_vm0, %v9233_v0  ;;  %370 = vst.msk [vmem:[#allocation2 + $0x238] sm:$0xf] %vm226_vm0, %v9233_v0 }
  0x2a   : > { %372 = vst.msk [vmem:[#allocation2 + $0x240] sm:$0xf] %vm226_vm0, %v9233_v0  ;;  %374 = vst.msk [vmem:[#allocation2 + $0x248] sm:$0xf] %vm226_vm0, %v9233_v0 }
  0x2b   : > { %376 = vst.msk [vmem:[#allocation2 + $0x250] sm:$0xf] %vm226_vm0, %v9233_v0  ;;  %378 = vst.msk [vmem:[#allocation2 + $0x258] sm:$0xf] %vm226_vm0, %v9233_v0 }
  0x2c   : > { %380 = vst.msk [vmem:[#allocation2 + $0x260] sm:$0xf] %vm226_vm0, %v9233_v0  ;;  %382 = vst.msk [vmem:[#allocation2 + $0x268] sm:$0xf] %vm226_vm0, %v9233_v0 }
  0x2d   : > { %384 = vst.msk [vmem:[#allocation2 + $0x270] sm:$0xf] %vm226_vm0, %v9233_v0  ;;  %386 = vst.msk [vmem:[#allocation2 + $0x278] sm:$0xf] %vm226_vm0, %v9233_v0 }
  0x2e   : > { %388 = vst.msk [vmem:[#allocation2 + $0x280] sm:$0xf] %vm226_vm0, %v9233_v0  ;;  %390 = vst.msk [vmem:[#allocation2 + $0x288] sm:$0xf] %vm226_vm0, %v9233_v0 }
  0x2f   : > { %392 = vst.msk [vmem:[#allocation2 + $0x290] sm:$0xf] %vm226_vm0, %v9233_v0  ;;  %394 = vst.msk [vmem:[#allocation2 + $0x298] sm:$0xf] %vm226_vm0, %v9233_v0 }
  0x30   : > { %396 = vst.msk [vmem:[#allocation2 + $0x2a0] sm:$0xf] %vm226_vm0, %v9233_v0  ;;  %398 = vst.msk [vmem:[#allocation2 + $0x2a8] sm:$0xf] %vm226_vm0, %v9233_v0 }
  0x31   : > { %400 = vst.msk [vmem:[#allocation2 + $0x2b0] sm:$0xf] %vm226_vm0, %v9233_v0  ;;  %402 = vst.msk [vmem:[#allocation2 + $0x2b8] sm:$0xf] %vm226_vm0, %v9233_v0 }
  0x32   : > { %404 = vst.msk [vmem:[#allocation2 + $0x2c0] sm:$0xf] %vm226_vm0, %v9233_v0  ;;  %406 = vst.msk [vmem:[#allocation2 + $0x2c8] sm:$0xf] %vm226_vm0, %v9233_v0 }
  0x33   : > { %408 = vst.msk [vmem:[#allocation2 + $0x2d0] sm:$0xf] %vm226_vm0, %v9233_v0  ;;  %410 = vst.msk [vmem:[#allocation2 + $0x2d8] sm:$0xf] %vm226_vm0, %v9233_v0 }
  0x34   : > { %412 = vst.msk [vmem:[#allocation2 + $0x2e0] sm:$0xf] %vm226_vm0, %v9233_v0  ;;  %414 = vst.msk [vmem:[#allocation2 + $0x2e8] sm:$0xf] %vm226_vm0, %v9233_v0 }
  0x35   : > { %416 = vst.msk [vmem:[#allocation2 + $0x2f0] sm:$0xf] %vm226_vm0, %v9233_v0  ;;  %418 = vst.msk [vmem:[#allocation2 + $0x2f8] sm:$0xf] %vm226_vm0, %v9233_v0 }
  0x36   : > { %420 = vst.msk [vmem:[#allocation2 + $0x300] sm:$0xf] %vm226_vm0, %v9233_v0  ;;  %422 = vst.msk [vmem:[#allocation2 + $0x308] sm:$0xf] %vm226_vm0, %v9233_v0 }
  0x37   : > { %424 = vst.msk [vmem:[#allocation2 + $0x310] sm:$0xf] %vm226_vm0, %v9233_v0  ;;  %426 = vst.msk [vmem:[#allocation2 + $0x318] sm:$0xf] %vm226_vm0, %v9233_v0 }
  0x38   : > { %229 = vst.msk [vmem:[#allocation2 + $0x4] sm:$0x1] %vm228_vm1, %v9233_v0  ;;  %231 = vst.msk [vmem:[#allocation2 + $0xc] sm:$0x1] %vm228_vm1, %v9233_v0 }
  0x39   : > { %233 = vst.msk [vmem:[#allocation2 + $0x14] sm:$0x1] %vm228_vm1, %v9233_v0  ;;  %235 = vst.msk [vmem:[#allocation2 + $0x1c] sm:$0x1] %vm228_vm1, %v9233_v0 }
  0x3a   : > { %237 = vst.msk [vmem:[#allocation2 + $0x24] sm:$0x1] %vm228_vm1, %v9233_v0  ;;  %239 = vst.msk [vmem:[#allocation2 + $0x2c] sm:$0x1] %vm228_vm1, %v9233_v0 }
  0x3b   : > { %241 = vst.msk [vmem:[#allocation2 + $0x34] sm:$0x1] %vm228_vm1, %v9233_v0  ;;  %243 = vst.msk [vmem:[#allocation2 + $0x3c] sm:$0x1] %vm228_vm1, %v9233_v0 }
  0x3c   : > { %245 = vst.msk [vmem:[#allocation2 + $0x44] sm:$0x1] %vm228_vm1, %v9233_v0  ;;  %247 = vst.msk [vmem:[#allocation2 + $0x4c] sm:$0x1] %vm228_vm1, %v9233_v0 }
  0x3d   : > { %249 = vst.msk [vmem:[#allocation2 + $0x54] sm:$0x1] %vm228_vm1, %v9233_v0  ;;  %251 = vst.msk [vmem:[#allocation2 + $0x5c] sm:$0x1] %vm228_vm1, %v9233_v0 }
  0x3e   : > { %253 = vst.msk [vmem:[#allocation2 + $0x64] sm:$0x1] %vm228_vm1, %v9233_v0  ;;  %255 = vst.msk [vmem:[#allocation2 + $0x6c] sm:$0x1] %vm228_vm1, %v9233_v0 }
  0x3f   : > { %257 = vst.msk [vmem:[#allocation2 + $0x74] sm:$0x1] %vm228_vm1, %v9233_v0  ;;  %259 = vst.msk [vmem:[#allocation2 + $0x7c] sm:$0x1] %vm228_vm1, %v9233_v0 }
  0x40   : > { %261 = vst.msk [vmem:[#allocation2 + $0x84] sm:$0x1] %vm228_vm1, %v9233_v0  ;;  %263 = vst.msk [vmem:[#allocation2 + $0x8c] sm:$0x1] %vm228_vm1, %v9233_v0 }
  0x41   : > { %265 = vst.msk [vmem:[#allocation2 + $0x94] sm:$0x1] %vm228_vm1, %v9233_v0  ;;  %267 = vst.msk [vmem:[#allocation2 + $0x9c] sm:$0x1] %vm228_vm1, %v9233_v0 }
  0x42   : > { %269 = vst.msk [vmem:[#allocation2 + $0xa4] sm:$0x1] %vm228_vm1, %v9233_v0  ;;  %271 = vst.msk [vmem:[#allocation2 + $0xac] sm:$0x1] %vm228_vm1, %v9233_v0 }
  0x43   : > { %273 = vst.msk [vmem:[#allocation2 + $0xb4] sm:$0x1] %vm228_vm1, %v9233_v0  ;;  %275 = vst.msk [vmem:[#allocation2 + $0xbc] sm:$0x1] %vm228_vm1, %v9233_v0 }
  0x44   : > { %277 = vst.msk [vmem:[#allocation2 + $0xc4] sm:$0x1] %vm228_vm1, %v9233_v0  ;;  %279 = vst.msk [vmem:[#allocation2 + $0xcc] sm:$0x1] %vm228_vm1, %v9233_v0 }
  0x45   : > { %281 = vst.msk [vmem:[#allocation2 + $0xd4] sm:$0x1] %vm228_vm1, %v9233_v0  ;;  %283 = vst.msk [vmem:[#allocation2 + $0xdc] sm:$0x1] %vm228_vm1, %v9233_v0 }
  0x46   : > { %285 = vst.msk [vmem:[#allocation2 + $0xe4] sm:$0x1] %vm228_vm1, %v9233_v0  ;;  %287 = vst.msk [vmem:[#allocation2 + $0xec] sm:$0x1] %vm228_vm1, %v9233_v0 }
  0x47   : > { %289 = vst.msk [vmem:[#allocation2 + $0xf4] sm:$0x1] %vm228_vm1, %v9233_v0  ;;  %291 = vst.msk [vmem:[#allocation2 + $0xfc] sm:$0x1] %vm228_vm1, %v9233_v0 }
  0x48   : > { %293 = vst.msk [vmem:[#allocation2 + $0x104] sm:$0x1] %vm228_vm1, %v9233_v0  ;;  %295 = vst.msk [vmem:[#allocation2 + $0x10c] sm:$0x1] %vm228_vm1, %v9233_v0 }
  0x49   : > { %297 = vst.msk [vmem:[#allocation2 + $0x114] sm:$0x1] %vm228_vm1, %v9233_v0  ;;  %299 = vst.msk [vmem:[#allocation2 + $0x11c] sm:$0x1] %vm228_vm1, %v9233_v0 }
  0x4a   : > { %301 = vst.msk [vmem:[#allocation2 + $0x124] sm:$0x1] %vm228_vm1, %v9233_v0  ;;  %303 = vst.msk [vmem:[#allocation2 + $0x12c] sm:$0x1] %vm228_vm1, %v9233_v0 }
  0x4b   : > { %305 = vst.msk [vmem:[#allocation2 + $0x134] sm:$0x1] %vm228_vm1, %v9233_v0  ;;  %307 = vst.msk [vmem:[#allocation2 + $0x13c] sm:$0x1] %vm228_vm1, %v9233_v0 }
  0x4c   : > { %309 = vst.msk [vmem:[#allocation2 + $0x144] sm:$0x1] %vm228_vm1, %v9233_v0  ;;  %311 = vst.msk [vmem:[#allocation2 + $0x14c] sm:$0x1] %vm228_vm1, %v9233_v0 }
  0x4d   : > { %313 = vst.msk [vmem:[#allocation2 + $0x154] sm:$0x1] %vm228_vm1, %v9233_v0  ;;  %315 = vst.msk [vmem:[#allocation2 + $0x15c] sm:$0x1] %vm228_vm1, %v9233_v0 }
  0x4e   : > { %317 = vst.msk [vmem:[#allocation2 + $0x164] sm:$0x1] %vm228_vm1, %v9233_v0  ;;  %319 = vst.msk [vmem:[#allocation2 + $0x16c] sm:$0x1] %vm228_vm1, %v9233_v0 }
  0x4f   : > { %321 = vst.msk [vmem:[#allocation2 + $0x174] sm:$0x1] %vm228_vm1, %v9233_v0  ;;  %323 = vst.msk [vmem:[#allocation2 + $0x17c] sm:$0x1] %vm228_vm1, %v9233_v0 }
  0x50   : > { %325 = vst.msk [vmem:[#allocation2 + $0x184] sm:$0x1] %vm228_vm1, %v9233_v0  ;;  %327 = vst.msk [vmem:[#allocation2 + $0x18c] sm:$0x1] %vm228_vm1, %v9233_v0 }
  0x51   : > { %329 = vst.msk [vmem:[#allocation2 + $0x194] sm:$0x1] %vm228_vm1, %v9233_v0  ;;  %331 = vst.msk [vmem:[#allocation2 + $0x19c] sm:$0x1] %vm228_vm1, %v9233_v0 }
  0x52   : > { %333 = vst.msk [vmem:[#allocation2 + $0x1a4] sm:$0x1] %vm228_vm1, %v9233_v0  ;;  %335 = vst.msk [vmem:[#allocation2 + $0x1ac] sm:$0x1] %vm228_vm1, %v9233_v0 }
  0x53   : > { %337 = vst.msk [vmem:[#allocation2 + $0x1b4] sm:$0x1] %vm228_vm1, %v9233_v0  ;;  %339 = vst.msk [vmem:[#allocation2 + $0x1bc] sm:$0x1] %vm228_vm1, %v9233_v0 }
  0x54   : > { %341 = vst.msk [vmem:[#allocation2 + $0x1c4] sm:$0x1] %vm228_vm1, %v9233_v0  ;;  %343 = vst.msk [vmem:[#allocation2 + $0x1cc] sm:$0x1] %vm228_vm1, %v9233_v0 }
  0x55   : > { %345 = vst.msk [vmem:[#allocation2 + $0x1d4] sm:$0x1] %vm228_vm1, %v9233_v0  ;;  %347 = vst.msk [vmem:[#allocation2 + $0x1dc] sm:$0x1] %vm228_vm1, %v9233_v0 }
  0x56   : > { %349 = vst.msk [vmem:[#allocation2 + $0x1e4] sm:$0x1] %vm228_vm1, %v9233_v0  ;;  %351 = vst.msk [vmem:[#allocation2 + $0x1ec] sm:$0x1] %vm228_vm1, %v9233_v0 }
  0x57   : > { %353 = vst.msk [vmem:[#allocation2 + $0x1f4] sm:$0x1] %vm228_vm1, %v9233_v0  ;;  %355 = vst.msk [vmem:[#allocation2 + $0x1fc] sm:$0x1] %vm228_vm1, %v9233_v0 }
  0x58   : > { %357 = vst.msk [vmem:[#allocation2 + $0x204] sm:$0x1] %vm228_vm1, %v9233_v0  ;;  %359 = vst.msk [vmem:[#allocation2 + $0x20c] sm:$0x1] %vm228_vm1, %v9233_v0 }
  0x59   : > { %361 = vst.msk [vmem:[#allocation2 + $0x214] sm:$0x1] %vm228_vm1, %v9233_v0  ;;  %363 = vst.msk [vmem:[#allocation2 + $0x21c] sm:$0x1] %vm228_vm1, %v9233_v0 }
  0x5a   : > { %365 = vst.msk [vmem:[#allocation2 + $0x224] sm:$0x1] %vm228_vm1, %v9233_v0  ;;  %367 = vst.msk [vmem:[#allocation2 + $0x22c] sm:$0x1] %vm228_vm1, %v9233_v0 }
  0x5b   : > { %369 = vst.msk [vmem:[#allocation2 + $0x234] sm:$0x1] %vm228_vm1, %v9233_v0  ;;  %371 = vst.msk [vmem:[#allocation2 + $0x23c] sm:$0x1] %vm228_vm1, %v9233_v0 }
  0x5c   : > { %373 = vst.msk [vmem:[#allocation2 + $0x244] sm:$0x1] %vm228_vm1, %v9233_v0  ;;  %375 = vst.msk [vmem:[#allocation2 + $0x24c] sm:$0x1] %vm228_vm1, %v9233_v0 }
  0x5d   : > { %377 = vst.msk [vmem:[#allocation2 + $0x254] sm:$0x1] %vm228_vm1, %v9233_v0  ;;  %379 = vst.msk [vmem:[#allocation2 + $0x25c] sm:$0x1] %vm228_vm1, %v9233_v0 }
  0x5e   : > { %381 = vst.msk [vmem:[#allocation2 + $0x264] sm:$0x1] %vm228_vm1, %v9233_v0  ;;  %383 = vst.msk [vmem:[#allocation2 + $0x26c] sm:$0x1] %vm228_vm1, %v9233_v0 }
  0x5f   : > { %385 = vst.msk [vmem:[#allocation2 + $0x274] sm:$0x1] %vm228_vm1, %v9233_v0  ;;  %387 = vst.msk [vmem:[#allocation2 + $0x27c] sm:$0x1] %vm228_vm1, %v9233_v0 }
  0x60   : > { %389 = vst.msk [vmem:[#allocation2 + $0x284] sm:$0x1] %vm228_vm1, %v9233_v0  ;;  %391 = vst.msk [vmem:[#allocation2 + $0x28c] sm:$0x1] %vm228_vm1, %v9233_v0 }
  0x61   : > { %393 = vst.msk [vmem:[#allocation2 + $0x294] sm:$0x1] %vm228_vm1, %v9233_v0  ;;  %395 = vst.msk [vmem:[#allocation2 + $0x29c] sm:$0x1] %vm228_vm1, %v9233_v0 }
  0x62   : > { %397 = vst.msk [vmem:[#allocation2 + $0x2a4] sm:$0x1] %vm228_vm1, %v9233_v0  ;;  %399 = vst.msk [vmem:[#allocation2 + $0x2ac] sm:$0x1] %vm228_vm1, %v9233_v0 }
  0x63   : > { %401 = vst.msk [vmem:[#allocation2 + $0x2b4] sm:$0x1] %vm228_vm1, %v9233_v0  ;;  %403 = vst.msk [vmem:[#allocation2 + $0x2bc] sm:$0x1] %vm228_vm1, %v9233_v0 }
  0x64   : > { %405 = vst.msk [vmem:[#allocation2 + $0x2c4] sm:$0x1] %vm228_vm1, %v9233_v0  ;;  %407 = vst.msk [vmem:[#allocation2 + $0x2cc] sm:$0x1] %vm228_vm1, %v9233_v0 }
  0x65   : > { %409 = vst.msk [vmem:[#allocation2 + $0x2d4] sm:$0x1] %vm228_vm1, %v9233_v0  ;;  %411 = vst.msk [vmem:[#allocation2 + $0x2dc] sm:$0x1] %vm228_vm1, %v9233_v0 }
  0x66   : > { %413 = vst.msk [vmem:[#allocation2 + $0x2e4] sm:$0x1] %vm228_vm1, %v9233_v0  ;;  %415 = vst.msk [vmem:[#allocation2 + $0x2ec] sm:$0x1] %vm228_vm1, %v9233_v0 }
  0x67   : > { %417 = vst.msk [vmem:[#allocation2 + $0x2f4] sm:$0x1] %vm228_vm1, %v9233_v0  ;;  %419 = vst.msk [vmem:[#allocation2 + $0x2fc] sm:$0x1] %vm228_vm1, %v9233_v0 }
  0x68   : > { %421 = vst.msk [vmem:[#allocation2 + $0x304] sm:$0x1] %vm228_vm1, %v9233_v0  ;;  %423 = vst.msk [vmem:[#allocation2 + $0x30c] sm:$0x1] %vm228_vm1, %v9233_v0 }
  0x69   : > { %425 = vst.msk [vmem:[#allocation2 + $0x314] sm:$0x1] %vm228_vm1, %v9233_v0  ;;  %427 = vst.msk [vmem:[#allocation2 + $0x31c] sm:$0x1] %vm228_vm1, %v9233_v0 }
  0x6a LB: >> { %v7260_v1 = vld [vmem:[%s12027_s1 + $0x4] sm:$0xf]  ;;  %vm640_vm2 = vcmask 1043456   ;;  %v7385_v2 = vld [vmem:[%s12027_s1 + $0x34] sm:$0xf]  ;;  %s7815_s9 = smul.u32 80, %s9227_s29  ;;  %s9227_s29 = sphi %s9692_s29, %s433_s29  }
  0x6b   : >> { %9055 = vmatprep.subr.msk.bf16.mxu1 %vm640_vm2, %v7260_v1  ;;  %9068 = vmatprep.subr.msk.bf16.mxu0 %vm640_vm2, %v7385_v2  ;;  %v642_v3 = vsel %vm640_vm2, %v7260_v1, 0  ;;  %v9707_v4 = vsel %vm640_vm2, %v7385_v2, 0  ;;  %v9714_v5 = vld [vmem:[%s12027_s1] sm:$0xf]  ;;  %v9721_v6 = vld [vmem:[%s12027_s1 + $0x38] sm:$0xf] }
  0x6c   : >> { %12077 = vst [vmem:[#allocation3_spill] sm:$0xff] %v9707_v4  ;;  %8096 = vmatpush3.bf16.msra.mxu1 %v642_v3  ;;  %8226 = vmatpush3.bf16.msra.mxu0 %v9707_v4  ;;  %s9726_s14 = scalar_lea.vmem %s9690_s28, %s7815_s9  ;;  %vm498_vm3 = vsmask.f32 3328  ;;  %vm499_vm4 = vsmask.f32 7440  ;;  %vm627_vm6 = vcmask 64512  }
  0x6d   : >> { %9056 = vmatprep.subr.msk.bf16.mxu1 %vm640_vm2, %v9714_v5  ;;  %9070 = vmatprep.subr.msk.bf16.mxu0 %vm640_vm2, %v9721_v6  ;;  %v9731_v7 = vld [vmem:[%s9726_s14] sm:$0xf]  ;;  %v9734_v8 = vld [vmem:[%s9726_s14 + $0x4] sm:$0x1]  ;;  %v9737_v9 = vld [vmem:[%s9726_s14 + $0x8] sm:$0xf] }
  0x6e   : >> { %v9740_v10 = vld [vmem:[%s9726_s14 + $0xc] sm:$0x1]  ;;  %v9743_v11 = vld [vmem:[%s9726_s14 + $0x10] sm:$0xf]  ;;  %v9748_v13 = vld [vmem:[%s9726_s14 + $0x14] sm:$0x1] }
  0x6f   : >> { %v502_v14 = vshrl.u32 %v9731_v7, 16  ;;  %v505_v15 = vshll.u32 %v9731_v7, 16  ;;  %v511_v16 = vshll.u32 %v9734_v8, 16  ;;  %v516_v17 = vshrl.u32 %v9737_v9, 16  ;;  %v9755_v18 = vld [vmem:[%s9726_s14 + $0x18] sm:$0xf]  ;;  %vm9769_vm5 = vmor %vm498_vm3, %vm499_vm4 }
  0x70   : >> { %v519_v19 = vshll.u32 %v9737_v9, 16  ;;  %v525_v20 = vshll.u32 %v9740_v10, 16  ;;  %v530_v21 = vshrl.u32 %v9743_v11, 16  ;;  %v533_v22 = vshll.u32 %v9743_v11, 16  ;;  %v9762_v23 = vld [vmem:[%s9726_s14 + $0x1c] sm:$0x1] }
  0x71   : >> { %v504_v24 = vrot.slane %v502_v14, 4  ;;  %v507_v25 = vrot.slane %v505_v15, 5  ;;  %v518_v26 = vrot.slane %v516_v17, 4  ;;  %v513_v27 = vrot.slane %v511_v16, 5  ;;  %v9777_v49 = vld [vmem:[%s9726_s14 + $0x20] sm:$0xf] }
  0x72   : >> { %v521_v28 = vrot.slane %v519_v19, 5  ;;  %v532_v29 = vrot.slane %v530_v21, 4  ;;  %v535_v30 = vrot.slane %v533_v22, 5  ;;  %v539_v32 = vshll.u32 %v9748_v13, 16  ;;  %v9798_v58 = vld [vmem:[%s9726_s14 + $0x58] sm:$0xf] }
  0x73   : >> { %v508_v31 = vor.u32 %v507_v25, %v504_v24  ;;  %v544_v33 = vshrl.u32 %v9755_v18, 16  ;;  %v547_v34 = vshll.u32 %v9755_v18, 16  ;;  %v527_v37 = vrot.slane %v525_v20, 5  ;;  %v9805_v60 = vld [vmem:[%s9726_s14 + $0x60] sm:$0xf]  ;;  %s10787_s30 = scalar_lea.vmem [#allocation2], %s7815_s9 }
  0x74   : >> { %v522_v36 = vor.u32 %v521_v28, %v518_v26  ;;  %v536_v38 = vor.u32 %v535_v30, %v532_v29  ;;  %v553_v39 = vshll.u32 %v9762_v23, 16  ;;  %v541_v41 = vrot.slane %v539_v32, 5  ;;  %v9810_v62 = vld [vmem:[%s9726_s14 + $0x24] sm:$0x1]  ;;  %v9813_v63 = vld [vmem:[%s9726_s14 + $0x5c] sm:$0x1] }
  0x75   : >> { %v509_v40 = vrot.slane %v508_v31, 4  ;;  %v546_v42 = vrot.slane %v544_v33, 4  ;;  %v549_v43 = vrot.slane %v547_v34, 5  ;;  %v558_v55 = vshrl.u32 %v9777_v49, 16  ;;  %v9818_v0 = vld [vmem:[%s12027_s1 + $0x8] sm:$0xf] }
  0x76   : >> { %v523_v44 = vrot.slane %v522_v36, 4  ;;  %v537_v45 = vrot.slane %v536_v38, 4  ;;  %v555_v48 = vrot.slane %v553_v39, 5  ;;  %v561_v56 = vshll.u32 %v9777_v49, 16  ;;  %v9821_v1 = vld [vmem:[%s9726_s14 + $0x64] sm:$0x1] }
  0x77   : >> { %v514_v46 = vsel %vm9769_vm5, %v509_v40, %v513_v27  ;;  %v550_v47 = vor.u32 %v549_v43, %v546_v42  ;;  %v742_v61 = vsel %vm640_vm2, %v9714_v5, 0  ;;  %v9824_v2 = vld [vmem:[%s9726_s14 + $0x68] sm:$0xf]  ;;  %v1653_v3 = vshrl.u32 %v9798_v58, 16  ;;  %v9831_v16 = vld [vmem:[%s9726_s14 + $0x6c] sm:$0x1] }
  0x78   : >> { %v9781_v50 = vsel %vm9769_vm5, %v523_v44, %v527_v37  ;;  %v9785_v51 = vsel %vm9769_vm5, %v537_v45, %v541_v41  ;;  %v1656_v14 = vshll.u32 %v9798_v58, 16  ;;  %v560_v5 = vrot.slane %v558_v55, 4  ;;  %v9836_v20 = vld [vmem:[%s9726_s14 + $0x70] sm:$0xf]  ;;  %v9846_v33 = vld [vmem:[%s9726_s14 + $0x74] sm:$0x1] }
  0x79   : >> { %v551_v52 = vrot.slane %v550_v47, 4  ;;  %v7261_v53 = vcombine.low %v514_v46, %v9781_v50  ;;  %v563_v15 = vrot.slane %v561_v56, 5  ;;  %v1667_v17 = vshrl.u32 %v9805_v60, 16  ;;  %s433_s29 = sadd.s32 1, %s9227_s29  }
  0x7a   : >> { %v1670_v19 = vshll.u32 %v9805_v60, 16  ;;  %v1655_v21 = vrot.slane %v1653_v3, 4  ;;  %v1658_v22 = vrot.slane %v1656_v14, 5  ;;  %v1662_v24 = vshll.u32 %v9813_v63, 16  ;;  %p430_p4 = scmp.ge.s32.totalorder %s433_s29, 8  }
  0x7b   : >> { %v9790_v54 = vsel %vm9769_vm5, %v551_v52, %v555_v48  ;;  %8097 = vmatprep.mubr.msk.bf16.mxu1 %vm627_vm6, %v7261_v53  ;;  %v1669_v25 = vrot.slane %v1667_v17, 4  ;;  %v1676_v27 = vshll.u32 %v9821_v1, 16  ;;  %v567_v28 = vshll.u32 %v9810_v62, 16  ;;  %v9864_v17 = vld [vmem:[%s9726_s14 + $0x2c] sm:$0x1]  ;;  %s10872_s9 = smov (%p430_p4), 0  }
  0x7c   : >> { %v9802_v59 = vcombine.low %v9785_v51, %v9790_v54  ;;  %v1672_v26 = vrot.slane %v1670_v19, 5  ;;  %v1659_v29 = vor.u32 %v1658_v22, %v1655_v21  ;;  %v1681_v30 = vshrl.u32 %v9824_v2, 16  ;;  %v9869_v21 = vld [vmem:[%s9726_s14 + $0x30] sm:$0xf] }
  0x7d   : >> { %v1684_v31 = vshll.u32 %v9824_v2, 16  ;;  %v564_v32 = vor.u32 %v563_v15, %v560_v5  ;;  %v1690_v36 = vshll.u32 %v9831_v16, 16  ;;  %v1695_v37 = vshrl.u32 %v9836_v20, 16  ;;  %v9861_v15 = vld [vmem:[%s9726_s14 + $0x28] sm:$0xf] }
  0x7e   : >> { %12080 = vst [vmem:[#allocation4_spill] sm:$0xff] %v9802_v59  ;;  %8098 = vmatmul.mubr.msk.bf16.vlgmr.msra.gmra.mrb[0].mxu1 %vm627_vm6, %v9802_v59  ;;  %v1673_v34 = vor.u32 %v1672_v26, %v1669_v25  ;;  %v1664_v38 = vrot.slane %v1662_v24, 5  ;;  %v1678_v39 = vrot.slane %v1676_v27, 5  ;;  %v1683_v40 = vrot.slane %v1681_v30, 4  ;;  %v9886_v30 = vld [vmem:[%s9726_s14 + $0x34] sm:$0x1] }
  0x7f   : >> { %8106 = vmatpush3.bf16.msra.mxu1 %v742_v61  ;;  %v1686_v41 = vrot.slane %v1684_v31, 5  ;;  %v1660_v42 = vrot.slane %v1659_v29, 4  ;;  %v1697_v44 = vrot.slane %v1695_v37, 4  ;;  %v1698_v45 = vshll.u32 %v9836_v20, 16 }
  0x80   : >> { %9057 = vmatprep.subr.msk.bf16.mxu1 %vm640_vm2, %v9818_v0  ;;  %v1674_v43 = vrot.slane %v1673_v34, 4  ;;  %v1704_v47 = vshll.u32 %v9846_v33, 16  ;;  %v565_v48 = vrot.slane %v564_v32, 4  ;;  %v569_v52 = vrot.slane %v567_v28, 5  ;;  %v9894_v34 = vld [vmem:[%s9726_s14 + $0x38] sm:$0xf] }
  0x81   : >> { %v1687_v46 = vor.u32 %v1686_v41, %v1683_v40  ;;  %v1692_v53 = vrot.slane %v1690_v36, 5  ;;  %v1700_v55 = vrot.slane %v1698_v45, 5  ;;  %v9854_v61 = vsel %vm9769_vm5, %v1660_v42, %v1664_v38  ;;  %v9903_v41 = vld [vmem:[%s9726_s14 + $0x3c] sm:$0x1] }
  0x82   : >> { %12081 = vst [vmem:[#allocation5_spill] sm:$0xff] %v9854_v61  ;;  %v9858_v3 = vsel %vm9769_vm5, %v1674_v43, %v1678_v39  ;;  %v1706_v5 = vrot.slane %v1704_v47, 5  ;;  %vm817_vm7 = vcmask 1042432   ;;  %vm818_vm8 = vcmask 1046532   ;;  %v7404_v45 = vld [vmem:[%s12027_s1 + $0x3c] sm:$0xf] }
  0x83   : >> { %v1688_v56 = vrot.slane %v1687_v46, 4  ;;  %v1701_v14 = vor.u32 %v1700_v55, %v1697_v44  ;;  %v2224_v19 = vsel %vm640_vm2, %v9721_v6, 0  ;;  %v9873_v22 = vsel %vm9769_vm5, %v565_v48, %v569_v52  ;;  %vm9912_vm9 = vmor %vm817_vm7, %vm818_vm8 }
  0x84   : >> { %v1866_v26 = vrot.slane %v9813_v63, 5  ;;  %v7386_v27 = vcombine.low %v9854_v61, %v9858_v3  ;;  %v572_v28 = vshrl.u32 %v9861_v15, 16  ;;  %v575_v6 = vshll.u32 %v9861_v15, 16 }
  0x85   : >> { %v9877_v24 = vsel %vm9769_vm5, %v1688_v56, %v1692_v53  ;;  %v1702_v25 = vrot.slane %v1701_v14, 4  ;;  %v581_v29 = vshll.u32 %v9864_v17, 16  ;;  %v1870_v32 = vrot.slane %v9821_v1, 5 }
  0x86   : >> { %v586_v63 = vshrl.u32 %v9869_v21, 16  ;;  %v589_v36 = vshll.u32 %v9869_v21, 16  ;;  %v1874_v37 = vrot.slane %v9831_v16, 5  ;;  %8227 = vmatprep.mubr.msk.bf16.mxu0 %vm627_vm6, %v7386_v27  ;;  %v574_v39 = vrot.slane %v572_v28, 4  ;;  %v9924_v28 = vld [vmem:[%s9726_s14 + $0x78] sm:$0xf] }
  0x87   : >> { %v9890_v31 = vsel %vm9769_vm5, %v1702_v25, %v1706_v5  ;;  %v577_v40 = vrot.slane %v575_v6, 5  ;;  %v1878_v42 = vrot.slane %v9846_v33, 5  ;;  %v595_v44 = vshll.u32 %v9886_v30, 16 }
  0x88   : >> { %v7387_v38 = vcombine.low %v9877_v24, %v9890_v31  ;;  %v588_v1 = vrot.slane %v586_v63, 4  ;;  %v591_v43 = vrot.slane %v589_v36, 5  ;;  %v583_v47 = vrot.slane %v581_v29, 5  ;;  %v9932_v63 = vld [vmem:[%s9726_s14 + $0x7c] sm:$0x1] }
  0x89   : >> { %v578_v46 = vor.u32 %v577_v40, %v574_v39  ;;  %v600_v33 = vshrl.u32 %v9894_v34, 16  ;;  %v603_v48 = vshll.u32 %v9894_v34, 16  ;;  %v597_v53 = vrot.slane %v595_v44, 5 }
  0x8a   : >> { %8228 = vmatmul.mubr.msk.bf16.vlgmr.msra.gmra.mrb[0].mxu0 %vm627_vm6, %v7387_v38  ;;  %v592_v52 = vor.u32 %v591_v43, %v588_v1  ;;  %v609_v55 = vshll.u32 %v9903_v41, 16  ;;  %v7360_v56 = vrot.slane %v9798_v58, 9  ;;  %v7361_v27 = vrot.slane %v9805_v60, 9  ;;  %v9944_v1 = vld [vmem:[%s9726_s14 + $0x80] sm:$0xf] }
  0x8b   : >> { %8236 = vmatpush3.bf16.msra.mxu0 %v2224_v19  ;;  %v579_v14 = vrot.slane %v578_v46, 4  ;;  %v602_v5 = vrot.slane %v600_v33, 4  ;;  %v605_v25 = vrot.slane %v603_v48, 5  ;;  %v7362_v58 = vrot.slane %v9824_v2, 9  ;;  %v9957_v46 = vld [vmem:[%s9726_s14 + $0x84] sm:$0x1] }
  0x8c   : >> { %9071 = vmatprep.subr.msk.bf16.mxu0 %vm640_vm2, %v7404_v45  ;;  %v593_v19 = vrot.slane %v592_v52, 4  ;;  %v611_v6 = vrot.slane %v609_v55, 5  ;;  %v9928_v29 = vsel %vm9912_vm9, %v7360_v56, %v1866_v26  ;;  %v9940_v39 = vsel %vm9912_vm9, %v7361_v27, %v1870_v32  ;;  %v9963_v32 = vld [vmem:[%s9726_s14 + $0x8c] sm:$0x1]  ;;  %v9979_v56 = vld [vmem:[%s9726_s14 + $0x94] sm:$0x1] }
  0x8d   : >> { %12084 = vst [vmem:[#allocation6_spill] sm:$0xff] %v9928_v29  ;;  %v9936_v36 = vsel %vm9769_vm5, %v579_v14, %v583_v47  ;;  %v606_v38 = vor.u32 %v605_v25, %v602_v5  ;;  %v7363_v40 = vrot.slane %v9836_v20, 9  ;;  %v7396_v43 = vcombine.low %v9928_v29, %v9940_v39  ;;  %v9960_v47 = vld [vmem:[%s9726_s14 + $0x88] sm:$0xf] }
  0x8e   : >> { %12085 = vst [vmem:[#allocation7_spill] sm:$0xff] %v9936_v36  ;;  %v9948_v26 = vcombine.low %v9873_v22, %v9936_v36  ;;  %v9954_v44 = vsel %vm9912_vm9, %v7362_v58, %v1874_v37  ;;  %v9967_v33 = vsel %vm9769_vm5, %v593_v19, %v597_v53  ;;  %v7269_v55 = vcombine.low %v9731_v7, %v9737_v9  ;;  %v9976_v37 = vld [vmem:[%s9726_s14 + $0x90] sm:$0xf] }
  0x8f   : >> { %12087 = vst [vmem:[#allocation9_spill] sm:$0xff] %v9967_v33  ;;  %v607_v48 = vrot.slane %v606_v38, 4  ;;  %v9971_v52 = vsel %vm9912_vm9, %v7363_v40, %v1878_v42  ;;  %8237 = vmatprep.mubr.msk.bf16.mxu0 %vm627_vm6, %v7396_v43  ;;  %v7364_v14 = vrot.slane %v9924_v28, 9  ;;  %v1882_v42 = vrot.slane %v9932_v63, 5 }
  0x90   : >> { %12086 = vst [vmem:[#allocation8_spill] sm:$0xff] %v9948_v26  ;;  %8101 = vmatprep.mubr.msk.bf16.mxu1 %vm627_vm6, %v9948_v26  ;;  %v7397_v53 = vcombine.low %v9954_v44, %v9971_v52  ;;  %v7365_v5 = vrot.slane %v9944_v1, 9  ;;  %v1886_v27 = vrot.slane %v9957_v46, 5  ;;  %v7366_v19 = vrot.slane %v9960_v47, 9 }
  0x91   : >> { %v9991_v25 = vsel %vm9769_vm5, %v607_v48, %v611_v6  ;;  %v1890_v58 = vrot.slane %v9963_v32, 5  ;;  %v10002_v40 = vsel %vm9912_vm9, %v7364_v14, %v1882_v42  ;;  %v7394_v43 = vrot.slane %v9976_v37, 9  ;;  %v7410_v14 = vld [vmem:[%s12027_s1 + $0x40] sm:$0xf] }
  0x92   : >> { %12088 = vst [vmem:[#allocation10_spill] sm:$0xff] %v9991_v25  ;;  %v9998_v38 = vcombine.low %v9967_v33, %v9991_v25  ;;  %v2202_v57 = vrot.slane %v9979_v56, 5  ;;  %v2308_v6 = vsel %vm640_vm2, %v7404_v45, 0  ;;  %v10009_v48 = vsel %vm9912_vm9, %v7365_v5, %v1886_v27 }
  0x93   : >> { %v7398_v12 = vcombine.low %v10002_v40, %v10009_v48  ;;  %v10023_v45 = vsel %vm9912_vm9, %v7366_v19, %v1890_v58  ;;  %v7279_v5 = vrot.slane %v9743_v11, 9  ;;  %v830_v27 = vrot.slane %v9748_v13, 5 }
  0x94   : >> { %12089 = vst [vmem:[#allocation11_spill] sm:$0xff] %v9998_v38  ;;  %8102 = vmatmul.mubr.msk.bf16.gmra.mrb[4].mxu1 %vm627_vm6, %v9998_v38  ;;  %v10027_v42 = vsel %vm9912_vm9, %v7394_v43, %v2202_v57  ;;  %v7280_v4 = vrot.slane %v9755_v18, 9  ;;  %v10038_v19 = vcombine.low %v9743_v11, %v9755_v18  ;;  %v822_v57 = vrot.slane %v9734_v8, 5 }
  0x95   : >> { %8107 = vmatprep.mubr.msk.bf16.mxu1 %vm627_vm6, %v7269_v55  ;;  %v1712_v55 = vshll.u32 %v9924_v28, 16  ;;  %v826_v58 = vrot.slane %v9740_v10, 5  ;;  %v7399_v13 = vcombine.low %v10023_v45, %v10027_v42  ;;  %v7277_v43 = vrot.slane %v9731_v7, 9 }
  0x96   : >> { %8238 = vmatmul.mubr.msk.bf16.vlgmr.msra.gmra.mrb[0].mxu0 %vm627_vm6, %v7397_v53  ;;  %v834_v53 = vrot.slane %v9762_v23, 5  ;;  %12090 = vst [vmem:[#allocation12_spill] sm:$0xff] %v10038_v19  ;;  %v879_v23 = vsel %vm640_vm2, %v9818_v0, 0  ;;  %v10053_v29 = vcombine.low %v9805_v60, %v9824_v2  ;;  %v7278_v8 = vrot.slane %v9737_v9, 9 }
  0x97   : >> { %8246 = vmatpush3.bf16.msra.mxu0 %v2308_v6  ;;  %8241 = vmatprep.mubr.msk.bf16.mxu0 %vm627_vm6, %v7398_v12  ;;  %v1709_v12 = vshrl.u32 %v9924_v28, 16  ;;  %v10049_v6 = vcombine.low %v9777_v49, %v9861_v15  ;;  %v10058_v10 = vsel %vm9912_vm9, %v7279_v5, %v830_v27  ;;  %v1718_v0 = vshll.u32 %v9932_v63, 16 }
  0x98   : >> { %9072 = vmatprep.subr.msk.bf16.mxu0 %vm640_vm2, %v7410_v14  ;;  %12092 = vst [vmem:[#allocation14_spill] sm:$0xff] %v10053_v29  ;;  %v10062_v7 = vsel %vm9912_vm9, %v7280_v4, %v834_v53  ;;  %v1714_v38 = vrot.slane %v1712_v55, 5  ;;  %v10069_v60 = vcombine.low %v9869_v21, %v9894_v34  ;;  %v10073_v2 = vcombine.low %v9836_v20, %v9924_v28  ;;  %v7294_v4 = vld [vmem:[%s12027_s1 + $0xc] sm:$0xf] }
  0x99   : >> { %12091 = vst [vmem:[#allocation13_spill] sm:$0xff] %v10049_v6  ;;  %v1711_v61 = vrot.slane %v1709_v12, 4  ;;  %v2405_v63 = vsel %vm640_vm2, %v7410_v14, 0  ;;  %v823_v5 = vsel %vm9912_vm9, %v7277_v43, %v822_v57  ;;  %v1737_v27 = vshrl.u32 %v9960_v47, 16 }
  0x9a   : >> { %v1740_v53 = vshll.u32 %v9960_v47, 16  ;;  %v10090_v20 = vsel %vm9912_vm9, %v7278_v8, %v826_v58  ;;  %v1723_v28 = vshrl.u32 %v9944_v1, 16  ;;  %v1726_v14 = vshll.u32 %v9944_v1, 16 }
  0x9b   : >> { %v2091_v12 = vshrl.u32 %v9976_v37, 16  ;;  %v1739_v55 = vrot.slane %v1737_v27, 4  ;;  %v2094_v43 = vshll.u32 %v9976_v37, 16  ;;  %v7281_v58 = vrot.slane %v9777_v49, 9 }
  0x9c   : >> { %8108 = vmatmul.mubr.msk.bf16.vlgmr.msra.gmra.mrb[0].mxu1 %vm627_vm6, %v10038_v19  ;;  %v1742_v57 = vrot.slane %v1740_v53, 5  ;;  %v7286_v26 = vcombine.low %v823_v5, %v10090_v20  ;;  %v838_v59 = vrot.slane %v9810_v62, 5  ;;  %v842_v53 = vrot.slane %v9864_v17, 5  ;;  %v7417_v62 = vld [vmem:[%s12027_s1 + $0x44] sm:$0xf] }
  0x9d   : >> { %8116 = vmatpush3.bf16.msra.mxu1 %v879_v23  ;;  %8111 = vmatprep.mubr.msk.bf16.mxu1 %vm627_vm6, %v10049_v6  ;;  %v10100_v23 = vcombine.low %v9944_v1, %v9960_v47  ;;  %v2093_v8 = vrot.slane %v2091_v12, 4  ;;  %v2096_v27 = vrot.slane %v2094_v43, 5  ;;  %v1725_v19 = vrot.slane %v1723_v28, 4  ;;  %v10121_v17 = vld [vmem:[%s9726_s14 + $0x98] sm:$0xf] }
  0x9e   : >> { %8242 = vmatmul.mubr.msk.bf16.gmra.mrb[4].mxu0 %vm627_vm6, %v7399_v13  ;;  %9058 = vmatprep.subr.msk.bf16.mxu1 %vm640_vm2, %v7294_v4  ;;  %v1746_v13 = vshll.u32 %v9963_v32, 16  ;;  %v1743_v6 = vor.u32 %v1742_v57, %v1739_v55  ;;  %v7282_v32 = vrot.slane %v9861_v15, 9  ;;  %v1728_v25 = vrot.slane %v1726_v14, 5 }
  0x9f   : >> { %8247 = vmatprep.mubr.msk.bf16.mxu0 %vm627_vm6, %v10053_v29  ;;  %v2100_v29 = vshll.u32 %v9979_v56, 16  ;;  %v2097_v36 = vor.u32 %v2096_v27, %v2093_v8  ;;  %v1715_v12 = vor.u32 %v1714_v38, %v1711_v61  ;;  %v10115_v56 = vcombine.low %v10058_v10, %v10062_v7  ;;  %v10163_v8 = vld [vmem:[%s9726_s14 + $0x9c] sm:$0x1] }
  0xa0   : >> { %v1744_v1 = vrot.slane %v1743_v6, 4  ;;  %v1748_v47 = vrot.slane %v1746_v13, 5  ;;  %v1720_v5 = vrot.slane %v1718_v0, 5  ;;  %v2387_v38 = vshll.u32 %v10121_v17, 16 }
  0xa1   : >> { %v2102_v33 = vrot.slane %v2100_v29, 5  ;;  %v2098_v61 = vrot.slane %v2097_v36, 4  ;;  %v2384_v29 = vshrl.u32 %v10121_v17, 16  ;;  %v10129_v6 = vsel %vm9912_vm9, %v7281_v58, %v838_v59 }
  0xa2   : >> { %v10133_v0 = vsel %vm9912_vm9, %v7282_v32, %v842_v53  ;;  %v1732_v36 = vshll.u32 %v9957_v46, 16  ;;  %v1716_v59 = vrot.slane %v1715_v12, 4  ;;  %v10147_v14 = vcombine.low %v9858_v3, %v9877_v24 }
  0xa3   : >> { %v10143_v28 = vsel %vm9769_vm5, %v2098_v61, %v2102_v33  ;;  %v7405_v55 = vcombine.low %v9976_v37, %v10121_v17  ;;  %v7284_v57 = vrot.slane %v9894_v34, 9  ;;  %v850_v33 = vrot.slane %v9903_v41, 5 }
  0xa4   : >> { %8112 = vmatmul.mubr.msk.bf16.gmra.mrb[4].mxu1 %vm627_vm6, %v10069_v60  ;;  %12094 = vst [vmem:[#allocation16_spill] sm:$0xff] %v10143_v28  ;;  %v975_v13 = vsel %vm640_vm2, %v7294_v4, 0  ;;  %v10160_v3 = vcombine.low %v10129_v6, %v10133_v0  ;;  %v2386_v24 = vrot.slane %v2384_v29, 4  ;;  %v2389_v43 = vrot.slane %v2387_v38, 5 }
  0xa5   : >> { %8117 = vmatprep.mubr.msk.bf16.mxu1 %vm627_vm6, %v7286_v26  ;;  %v1729_v26 = vor.u32 %v1728_v25, %v1725_v19  ;;  %v7283_v25 = vrot.slane %v9869_v21, 9  ;;  %v846_v19 = vrot.slane %v9886_v30, 5  ;;  %v1734_v58 = vrot.slane %v1732_v36, 5  ;;  %v7303_v30 = vld [vmem:[%s12027_s1 + $0x10] sm:$0xf] }
  0xa6   : >> { %8248 = vmatmul.mubr.msk.bf16.vlgmr.msra.gmra.mrb[0].mxu0 %vm627_vm6, %v10073_v2  ;;  %v10177_v4 = vsel %vm9912_vm9, %v7284_v57, %v850_v33  ;;  %v10181_v27 = vsel %vm9769_vm5, %v1716_v59, %v1720_v5  ;;  %v2390_v32 = vor.u32 %v2389_v43, %v2386_v24  ;;  %v2393_v53 = vshll.u32 %v10163_v8, 16  ;;  %v10253_v57 = vld [vmem:[%s9726_s14 + $0x44] sm:$0x1] }
  0xa7   : >> { %8256 = vmatpush3.bf16.msra.mxu0 %v2405_v63  ;;  %8251 = vmatprep.mubr.msk.bf16.mxu0 %vm627_vm6, %v10100_v23  ;;  %v10139_v63 = vsel %vm9769_vm5, %v1744_v1, %v1748_v47  ;;  %v1730_v37 = vrot.slane %v1729_v26, 4  ;;  %v10173_v41 = vsel %vm9912_vm9, %v7283_v25, %v846_v19  ;;  %12095 = vst [vmem:[#allocation17_spill] sm:$0xff] %v10181_v27  ;;  %v2493_v38 = vsel %vm640_vm2, %v7417_v62, 0  ;;  %v7423_v26 = vld [vmem:[%s12027_s1 + $0x48] sm:$0xf] }
  0xa8   : >> { %9073 = vmatprep.subr.msk.bf16.mxu0 %vm640_vm2, %v7417_v62  ;;  %12093 = vst [vmem:[#allocation15_spill] sm:$0xff] %v10139_v63  ;;  %v10195_v47 = vcombine.low %v10173_v41, %v10177_v4  ;;  %v10199_v12 = vcombine.low %v9890_v31, %v10181_v27  ;;  %v2391_v61 = vrot.slane %v2390_v32, 4  ;;  %v2395_v29 = vrot.slane %v2393_v53, 5  ;;  %v10233_v25 = vld [vmem:[%s9726_s14 + $0x40] sm:$0xf] }
  0xa9   : >> { %v10191_v1 = vsel %vm9769_vm5, %v1730_v37, %v1734_v58  ;;  %v12098_v31 = vcombine.low %v9737_v9, %v9743_v11  ;;  %v7296_v36 = vcombine.low %v9755_v18, %v9777_v49  ;;  %v7297_v9 = vcombine.low %v9861_v15, %v9869_v21  ;;  %v7313_v18 = vld [vmem:[%s12027_s1 + $0x14] sm:$0xf]  ;;  %v10263_v37 = vld [vmem:[%s9726_s14 + $0xa0] sm:$0xf] }
  0xaa   : >> { %12096 = vst [vmem:[#allocation18_spill] sm:$0xff] %v10191_v1  ;;  %v10203_v5 = vcombine.low %v10191_v1, %v10139_v63  ;;  %v2396_v62 = vsel %vm9769_vm5, %v2391_v61, %v2395_v29  ;;  %v10230_v11 = vcombine.low %v9940_v39, %v9954_v44  ;;  %v1051_v49 = vshrl.u32 %v10233_v25, 16  ;;  %v10381_v63 = vld [vmem:[%s9726_s14 + $0xcc] sm:$0x1] }
  0xab   : >> { %v7411_v59 = vcombine.low %v10143_v28, %v2396_v62  ;;  %v1054_v19 = vshll.u32 %v10233_v25, 16  ;;  %v7298_v15 = vcombine.low %v9894_v34, %v10233_v25  ;;  %v10250_v44 = vcombine.low %v9971_v52, %v10002_v40  ;;  %v10266_v34 = vld [vmem:[%s9726_s14 + $0xa8] sm:$0xf]  ;;  %v10378_v28 = vld [vmem:[%s9726_s14 + $0xc4] sm:$0x1] }
  0xac   : >> { %8118 = vmatmul.mubr.msk.bf16.vlgmr.msra.gmra.mrb[0].mxu1 %vm627_vm6, %v10115_v56  ;;  %12097 = vst [vmem:[#allocation19_spill] sm:$0xff] %v10203_v5  ;;  %12099 = vst [vmem:[#allocation20_spill] sm:$0xff] %v10230_v11  ;;  %v1053_v21 = vrot.slane %v1051_v49, 4  ;;  %v10257_v33 = vcombine.low %v10009_v48, %v10023_v45  ;;  %v2483_v24 = vrot.slane %v10163_v8, 5  ;;  %v2603_v43 = vsel %vm640_vm2, %v7423_v26, 0 }
  0xad   : >> { %8126 = vmatpush3.bf16.msra.mxu1 %v975_v13  ;;  %8121 = vmatprep.mubr.msk.bf16.mxu1 %vm627_vm6, %v10160_v3  ;;  %v1056_v39 = vrot.slane %v1054_v19, 5  ;;  %12100 = vst [vmem:[#allocation21_spill] sm:$0xff] %v10250_v44  ;;  %v7416_v13 = vrot.slane %v10121_v17, 9  ;;  %v1060_v40 = vshll.u32 %v10253_v57, 16  ;;  %v2679_v58 = vshrl.u32 %v10263_v37, 16 }
  0xae   : >> { %8252 = vmatmul.mubr.msk.bf16.gmra.mrb[4].mxu0 %vm627_vm6, %v7405_v55  ;;  %9059 = vmatprep.subr.msk.bf16.mxu1 %vm640_vm2, %v7303_v30  ;;  %v1084_v55 = vsel %vm640_vm2, %v7303_v30, 0  ;;  %12101 = vst [vmem:[#allocation22_spill] sm:$0xff] %v10257_v33  ;;  %v2682_v48 = vshll.u32 %v10263_v37, 16  ;;  %v7432_v45 = vld [vmem:[%s12027_s1 + $0x4c] sm:$0xf]  ;;  %v12102_v17 = vcombine.low %v9781_v50, %v9785_v51  ;;  %v2693_v8 = vshrl.u32 %v10266_v34, 16 }
  0xaf   : >> { %8257 = vmatprep.mubr.msk.bf16.mxu0 %vm627_vm6, %v10147_v14  ;;  %v1057_v52 = vor.u32 %v1056_v39, %v1053_v21  ;;  %v2696_v30 = vshll.u32 %v10266_v34, 16  ;;  %v2484_v32 = vsel %vm9912_vm9, %v7416_v13, %v2483_v24  ;;  %v7305_v53 = vcombine.low %v9790_v54, %v9873_v22  ;;  %v10291_v50 = vld [vmem:[%s9726_s14 + $0xa4] sm:$0x1]  ;;  %v10304_v19 = vld [vmem:[%s9726_s14 + $0xb0] sm:$0xf] }
  0xb0   : >> { %v1062_v61 = vrot.slane %v1060_v40, 5  ;;  %v2681_v29 = vrot.slane %v2679_v58, 4  ;;  %v2695_v62 = vrot.slane %v2693_v8, 4  ;;  %v7424_v22 = vcombine.low %v10263_v37, %v10266_v34  ;;  %v10335_v8 = vld [vmem:[%s9726_s14 + $0xc8] sm:$0xf] }
  0xb1   : >> { %v1058_v51 = vrot.slane %v1057_v52, 4  ;;  %v2688_v49 = vshll.u32 %v10291_v50, 16  ;;  %v2707_v13 = vshrl.u32 %v10304_v19, 16  ;;  %v2817_v46 = vsel %vm640_vm2, %v7432_v45, 0 }
  0xb2   : >> { %vm3749_vm10 = vsmask.f32 7938  ;;  %vm3755_vm11 = vsmask.f32 256 }
  0xb3   : >> { %vm10793_vm12 = vmand %vm226_vm0, %vm3749_vm10 }
  0xb4   : >> { %8122 = vmatmul.mubr.msk.bf16.gmra.mrb[4].mxu1 %vm627_vm6, %v10195_v47  ;;  %vm10800_vm13 = vmand %vm228_vm1, %vm3755_vm11 }
  0xb5   : >> { %8127 = vmatprep.mubr.msk.bf16.mxu1 %vm627_vm6, %v12098_v31  ;;  %v10295_v31 = vld [vmem:[%s9726_s14 + $0xac] sm:$0x1] }
  0xb6   : >> { %8258 = vmatmul.mubr.msk.bf16.vlgmr.msra.gmra.mrb[0].mxu0 %vm627_vm6, %v10199_v12  ;;  %v2702_v39 = vshll.u32 %v10295_v31, 16 }
  0xb7   : >> { %8266 = vmatpush3.bf16.msra.mxu0 %v2493_v38  ;;  %8261 = vmatprep.mubr.msk.bf16.mxu0 %vm627_vm6, %v10203_v5  ;;  %v2684_v38 = vrot.slane %v2682_v48, 5  ;;  %v7314_v48 = vcombine.low %v10090_v20, %v10058_v10  ;;  %v12106_v10 = vld [vmem:[#allocation10_spill] sm:$0xff] }
  0xb8   : >> { %9074 = vmatprep.subr.msk.bf16.mxu0 %vm640_vm2, %v7423_v26  ;;  %v7418_v26 = vcombine.low %v10027_v42, %v2484_v32  ;;  %v10312_v42 = vsel %vm9769_vm5, %v1058_v51, %v1062_v61  ;;  %v10339_v32 = vld [vmem:[%s9726_s14 + $0xd0] sm:$0xf]  ;;  %v2749_v61 = vshrl.u32 %v10335_v8, 16 }
  0xb9   : >> { %v2685_v21 = vor.u32 %v2684_v38, %v2681_v29  ;;  %v2752_v29 = vshll.u32 %v10335_v8, 16  ;;  %v7307_v20 = vcombine.low %v12106_v10, %v10312_v42  ;;  %v10348_v38 = vld [vmem:[%s9726_s14 + $0xd8] sm:$0xf] }
  0xbc   : >> { %8128 = vmatmul.mubr.msk.bf16.vlgmr.msra.gmra.mrb[0].mxu1 %vm627_vm6, %v7296_v36  ;;  %v2698_v36 = vrot.slane %v2696_v30, 5  ;;  %v2690_v30 = vrot.slane %v2688_v49, 5  ;;  %v7315_v49 = vcombine.low %v10062_v7, %v10129_v6  ;;  %v10372_v6 = vcombine.low %v10339_v32, %v10348_v38 }
  0xbd   : >> { %8136 = vmatpush3.bf16.msra.mxu1 %v1084_v55  ;;  %8131 = vmatprep.mubr.msk.bf16.mxu1 %vm627_vm6, %v7297_v9  ;;  %v12103_v55 = vld [vmem:[#allocation9_spill] sm:$0xff]  ;;  %v12104_v9 = vld [vmem:[#allocation7_spill] sm:$0xff] }
  0xbe   : >> { %8262 = vmatmul.mubr.msk.bf16.gmra.mrb[4].mxu0 %vm627_vm6, %v7411_v59  ;;  %9060 = vmatprep.subr.msk.bf16.mxu1 %vm640_vm2, %v7313_v18  ;;  %v1184_v59 = vsel %vm640_vm2, %v7313_v18, 0  ;;  %v7306_v54 = vcombine.low %v12104_v9, %v12103_v55  ;;  %v7322_v18 = vld [vmem:[%s12027_s1 + $0x18] sm:$0xf]  ;;  %v2699_v24 = vor.u32 %v2698_v36, %v2695_v62  ;;  %v2704_v62 = vrot.slane %v2702_v39, 5  ;;  %v10351_v55 = vld [vmem:[%s9726_s14 + $0xb4] sm:$0x1] }
  0xbf   : >> { %8267 = vmatprep.mubr.msk.bf16.mxu0 %vm627_vm6, %v10230_v11  ;;  %v2709_v36 = vrot.slane %v2707_v13, 4  ;;  %v10366_v39 = vld [vmem:[%s12027_s1 + $0x50] sm:$0xf]  ;;  %v1268_v7 = vsel %vm640_vm2, %v7322_v18, 0 }
  0xc4   : >> { %8132 = vmatmul.mubr.msk.bf16.gmra.mrb[4].mxu1 %vm627_vm6, %v7298_v15  ;;  %v10307_v15 = vld [vmem:[%s9726_s14 + $0xb8] sm:$0xf] }
  0xc5   : >> { %8137 = vmatprep.mubr.msk.bf16.mxu1 %vm627_vm6, %v12102_v17  ;;  %v2721_v52 = vshrl.u32 %v10307_v15, 16  ;;  %v2724_v40 = vshll.u32 %v10307_v15, 16  ;;  %v10327_v58 = vcombine.low %v10304_v19, %v10307_v15  ;;  %v10332_v17 = vld [vmem:[%s9726_s14 + $0xc0] sm:$0xf] }
  0xc6   : >> { %8268 = vmatmul.mubr.msk.bf16.vlgmr.msra.gmra.mrb[0].mxu0 %vm627_vm6, %v10250_v44  ;;  %v2738_v51 = vshll.u32 %v10332_v17, 16  ;;  %v10358_v10 = vcombine.low %v10332_v17, %v10335_v8 }
  0xc7   : >> { %8276 = vmatpush3.bf16.msra.mxu0 %v2603_v43  ;;  %8271 = vmatprep.mubr.msk.bf16.mxu0 %vm627_vm6, %v10257_v33  ;;  %v2710_v43 = vshll.u32 %v10304_v19, 16  ;;  %12105 = vst [vmem:[#allocation9_spill] sm:$0xff] %v10327_v58 }
  0xc8   : >> { %9075 = vmatprep.subr.msk.bf16.mxu0 %vm640_vm2, %v7432_v45  ;;  %12107 = vst [vmem:[#allocation7_spill] sm:$0xff] %v10358_v10 }
  0xc9   : >> { %v2712_v9 = vrot.slane %v2710_v43, 5  ;;  %v2751_v43 = vrot.slane %v2749_v61, 4 }
  0xcc   : >> { %8138 = vmatmul.mubr.msk.bf16.vlgmr.msra.gmra.mrb[0].mxu1 %vm627_vm6, %v7305_v53  ;;  %v2735_v53 = vshrl.u32 %v10332_v17, 16 }
  0xcd   : >> { %8146 = vmatpush3.bf16.msra.mxu1 %v1184_v59  ;;  %8141 = vmatprep.mubr.msk.bf16.mxu1 %vm627_vm6, %v7306_v54  ;;  %v2700_v59 = vrot.slane %v2699_v24, 4  ;;  %v2723_v54 = vrot.slane %v2721_v52, 4  ;;  %v2740_v24 = vrot.slane %v2738_v51, 5  ;;  %v2754_v52 = vrot.slane %v2752_v29, 5 }
  0xce   : >> { %8272 = vmatmul.mubr.msk.bf16.gmra.mrb[4].mxu0 %vm627_vm6, %v7418_v26  ;;  %9061 = vmatprep.subr.msk.bf16.mxu1 %vm640_vm2, %v7322_v18  ;;  %v2686_v26 = vrot.slane %v2685_v21, 4  ;;  %v10361_v21 = vld [vmem:[%s9726_s14 + $0xbc] sm:$0x1]  ;;  %v2737_v13 = vrot.slane %v2735_v53, 4  ;;  %v2713_v53 = vor.u32 %v2712_v9, %v2709_v36  ;;  %v2766_v29 = vshll.u32 %v10339_v32, 16 }
  0xcf   : >> { %8277 = vmatprep.mubr.msk.bf16.mxu0 %vm627_vm6, %v7424_v22  ;;  %v2726_v22 = vrot.slane %v2724_v40, 5  ;;  %v2716_v40 = vshll.u32 %v10351_v55, 16  ;;  %v10388_v18 = vsel %vm9769_vm5, %v2700_v59, %v2704_v62  ;;  %v2730_v61 = vshll.u32 %v10361_v21, 16 }
  0xd0   : >> { %v2691_v45 = vsel %vm9769_vm5, %v2686_v26, %v2690_v30  ;;  %v2763_v30 = vshrl.u32 %v10339_v32, 16  ;;  %v2741_v26 = vor.u32 %v2740_v24, %v2737_v13  ;;  %v2744_v62 = vshll.u32 %v10378_v28, 16  ;;  %v10407_v13 = vld [vmem:[%s9726_s14 + $0xd4] sm:$0x1] }
  0xd1   : >> { %v2727_v51 = vor.u32 %v2726_v22, %v2723_v54  ;;  %v2755_v36 = vor.u32 %v2754_v52, %v2751_v43  ;;  %v7316_v59 = vcombine.low %v10133_v0, %v10173_v41  ;;  %v7312_v9 = vrot.slane %v10233_v25, 9 }
  0xd2   : >> { %v1162_v54 = vrot.slane %v10253_v57, 5  ;;  %v2718_v22 = vrot.slane %v2716_v40, 5  ;;  %v7433_v27 = vcombine.low %v2691_v45, %v10388_v18  ;;  %v2714_v1 = vrot.slane %v2713_v53, 4  ;;  %v7328_v57 = vld [vmem:[%s12027_s1 + $0x1c] sm:$0xf] }
  0xd3   : >> { %v2728_v33 = vrot.slane %v2727_v51, 4  ;;  %v2732_v44 = vrot.slane %v2730_v61, 5  ;;  %v2765_v24 = vrot.slane %v2763_v30, 4  ;;  %v2768_v43 = vrot.slane %v2766_v29, 5 }
  0xd4   : >> { %8142 = vmatmul.mubr.msk.bf16.gmra.mrb[4].mxu1 %vm627_vm6, %v7307_v20  ;;  %v2777_v20 = vshrl.u32 %v10348_v38, 16  ;;  %v2746_v5 = vrot.slane %v2744_v62, 5  ;;  %v2756_v0 = vrot.slane %v2755_v36, 4  ;;  %v10420_v45 = vsel %vm9912_vm9, %v7312_v9, %v1162_v54  ;;  %v12108_v36 = vld [vmem:[#allocation12_spill] sm:$0xff] }
  0xd5   : >> { %8147 = vmatprep.mubr.msk.bf16.mxu1 %vm627_vm6, %v7314_v48  ;;  %v2780_v48 = vshll.u32 %v10348_v38, 16  ;;  %v10424_v40 = vsel %vm9769_vm5, %v2714_v1, %v2718_v22  ;;  %v2772_v53 = vshll.u32 %v10407_v13, 16  ;;  %v2906_v62 = vrot.slane %v10295_v31, 5 }
  0xd6   : >> { %8278 = vmatmul.mubr.msk.bf16.vlgmr.msra.gmra.mrb[0].mxu0 %vm627_vm6, %v10327_v58  ;;  %v2779_v52 = vrot.slane %v2777_v20, 4  ;;  %v10410_v58 = vld [vmem:[%s9726_s14 + $0xdc] sm:$0x1]  ;;  %v7443_v54 = vrot.slane %v10304_v19, 9 }
  0xd7   : >> { %8286 = vmatpush3.bf16.msra.mxu0 %v2817_v46  ;;  %8281 = vmatprep.mubr.msk.bf16.mxu0 %vm627_vm6, %v10358_v10  ;;  %v2758_v46 = vshll.u32 %v10381_v63, 16  ;;  %v2782_v11 = vrot.slane %v2780_v48, 5  ;;  %v2742_v10 = vrot.slane %v2741_v26, 4  ;;  %v2786_v61 = vshll.u32 %v10410_v58, 16 }
  0xd8   : >> { %9076 = vmatprep.subr.msk.bf16.mxu0 %vm640_vm2, %v10366_v39  ;;  %v7441_v48 = vrot.slane %v10263_v37, 9  ;;  %v2902_v26 = vrot.slane %v10291_v50, 5 }
  0xd9   : >> { %v2760_v41 = vrot.slane %v2758_v46, 5  ;;  %v2783_v51 = vor.u32 %v2782_v11, %v2779_v52  ;;  %v10437_v1 = vsel %vm9769_vm5, %v2742_v10, %v2746_v5  ;;  %v2959_v11 = vsel %vm640_vm2, %v10366_v39, 0  ;;  %v7458_v39 = vld [vmem:[%s12027_s1 + $0x54] sm:$0xf] }
  0xda   : >> { %v2788_v20 = vrot.slane %v2786_v61, 5  ;;  %v2903_v31 = vsel %vm9912_vm9, %v7441_v48, %v2902_v26  ;;  %v2914_v52 = vrot.slane %v10361_v21, 5  ;;  %v2926_v26 = vrot.slane %v10407_v13, 5 }
  0xdb   : >> { %v10441_v30 = vsel %vm9769_vm5, %v2756_v0, %v2760_v41  ;;  %v2784_v10 = vrot.slane %v2783_v51, 4  ;;  %v7445_v0 = vrot.slane %v10332_v17, 9  ;;  %v2918_v41 = vrot.slane %v10378_v28, 5  ;;  %v10501_v51 = vld [vmem:[%s9726_s14 + $0x48] sm:$0xf] }
  0xdc   : >> { %8148 = vmatmul.mubr.msk.bf16.vlgmr.msra.gmra.mrb[0].mxu1 %vm627_vm6, %v7315_v49  ;;  %v10431_v49 = vsel %vm9769_vm5, %v2728_v33, %v2732_v44  ;;  %v2774_v33 = vrot.slane %v2772_v53, 5  ;;  %v10453_v29 = vcombine.low %v10437_v1, %v10441_v30  ;;  %v2922_v53 = vrot.slane %v10381_v63, 5 }
  0xdd   : >> { %8156 = vmatpush3.bf16.msra.mxu1 %v1268_v7  ;;  %8151 = vmatprep.mubr.msk.bf16.mxu1 %vm627_vm6, %v7316_v59  ;;  %v2769_v7 = vor.u32 %v2768_v43, %v2765_v24  ;;  %v10447_v44 = vcombine.low %v10424_v40, %v10431_v49  ;;  %v10475_v50 = vsel %vm9769_vm5, %v2784_v10, %v2788_v20  ;;  %v1365_v59 = vsel %vm640_vm2, %v7328_v57, 0 }
  0xde   : >> { %8282 = vmatmul.mubr.msk.bf16.gmra.mrb[4].mxu0 %vm627_vm6, %v10372_v6  ;;  %9062 = vmatprep.subr.msk.bf16.mxu1 %vm640_vm2, %v7328_v57  ;;  %v2910_v24 = vrot.slane %v10351_v55, 5  ;;  %v7444_v43 = vrot.slane %v10307_v15, 9  ;;  %v7446_v57 = vrot.slane %v10335_v8, 9  ;;  %v7335_v55 = vld [vmem:[%s12027_s1 + $0x20] sm:$0xf]  ;;  %v1344_v21 = vshrl.u32 %v10501_v51, 16 }
  0xdf   : >> { %8287 = vmatprep.mubr.msk.bf16.mxu0 %vm627_vm6, %v7433_v27  ;;  %v7317_v27 = vcombine.low %v10177_v4, %v10420_v45  ;;  %v2770_v5 = vrot.slane %v2769_v7, 4  ;;  %v7442_v4 = vrot.slane %v10266_v34, 9  ;;  %v12109_v7 = vld [vmem:[#allocation13_spill] sm:$0xff]  ;;  %v1347_v28 = vshll.u32 %v10501_v51, 16 }
  0xe0   : >> { %v10515_v63 = vsel %vm9912_vm9, %v7443_v54, %v2910_v24  ;;  %v10519_v61 = vsel %vm9912_vm9, %v7444_v43, %v2914_v52  ;;  %v1346_v10 = vrot.slane %v1344_v21, 4  ;;  %v1453_v52 = vsel %vm640_vm2, %v7335_v55, 0 }
  0xe1   : >> { %v10471_v37 = vsel %vm9769_vm5, %v2770_v5, %v2774_v33  ;;  %v10481_v46 = vsel %vm9912_vm9, %v7442_v4, %v2906_v62  ;;  %v10534_v33 = vcombine.low %v10515_v63, %v10519_v61  ;;  %v7447_v5 = vrot.slane %v10339_v32, 9 }
  0xe2   : >> { %v10487_v9 = vcombine.low %v10471_v37, %v10475_v50  ;;  %v7450_v22 = vcombine.low %v2903_v31, %v10481_v46  ;;  %v1349_v20 = vrot.slane %v1347_v28, 5  ;;  %v7448_v4 = vrot.slane %v10348_v38, 9  ;;  %v7467_v31 = vld [vmem:[%s12027_s1 + $0x58] sm:$0xf]  ;;  %v7477_v28 = vld [vmem:[%s12027_s1 + $0x5c] sm:$0xf] }
  0xe3   : >> { %v2930_v62 = vrot.slane %v10410_v58, 5  ;;  %v10558_v58 = vsel %vm9912_vm9, %v7447_v5, %v2926_v26  ;;  %v3164_v21 = vsel %vm640_vm2, %v7467_v31, 0  ;;  %v494_v26 = vld [vmem:[%s9726_s14 + $0xe4] sm:$0x1] }
  0xe4   : >> { %8152 = vmatmul.mubr.msk.bf16.gmra.mrb[4].mxu1 %vm627_vm6, %v7317_v27  ;;  %v10524_v27 = vsel %vm9912_vm9, %v7445_v0, %v2918_v41  ;;  %v1350_v13 = vor.u32 %v1349_v20, %v1346_v10  ;;  %v7459_v0 = vcombine.low %v10266_v34, %v10304_v19  ;;  %v12111_v41 = vld [vmem:[#allocation8_spill] sm:$0xff]  ;;  %v7460_v19 = vcombine.low %v10307_v15, %v10332_v17 }
  0xe5   : >> { %8157 = vmatprep.mubr.msk.bf16.mxu1 %vm627_vm6, %v12108_v36  ;;  %v456_v36 = vld [vmem:[%s9726_s14 + $0x4c] sm:$0x1] }
  0xe6   : >> { %8288 = vmatmul.mubr.msk.bf16.vlgmr.msra.gmra.mrb[0].mxu0 %vm627_vm6, %v10447_v44  ;;  %v1353_v54 = vshll.u32 %v456_v36, 16  ;;  %v1351_v24 = vrot.slane %v1350_v13, 4 }
  0xe7   : >> { %8296 = vmatpush3.bf16.msra.mxu0 %v2959_v11  ;;  %8291 = vmatprep.mubr.msk.bf16.mxu0 %vm627_vm6, %v10453_v29  ;;  %v7323_v11 = vcombine.low %v10233_v25, %v10501_v51  ;;  %v3055_v25 = vsel %vm640_vm2, %v7458_v39, 0 }
  0xe8   : >> { %9077 = vmatprep.subr.msk.bf16.mxu0 %vm640_vm2, %v7458_v39  ;;  %v10562_v39 = vsel %vm9912_vm9, %v7448_v4, %v2930_v62  ;;  %v1355_v43 = vrot.slane %v1353_v54, 5  ;;  %v10613_v4 = vld [vmem:[%s9726_s14 + $0x50] sm:$0xf]  ;;  %v3140_v62 = vshll.u32 %v494_v26, 16 }
  0xec   : >> { %8158 = vmatmul.mubr.msk.bf16.vlgmr.msra.gmra.mrb[0].mxu1 %vm627_vm6, %v12109_v7  ;;  %v12112_v7 = vld [vmem:[#allocation11_spill] sm:$0xff] }
  0xed   : >> { %8166 = vmatpush3.bf16.msra.mxu1 %v1365_v59  ;;  %8161 = vmatprep.mubr.msk.bf16.mxu1 %vm627_vm6, %v10069_v60  ;;  %v10528_v60 = vsel %vm9912_vm9, %v7446_v57, %v2922_v53  ;;  %v12110_v59 = vld [vmem:[#allocation4_spill] sm:$0xff]  ;;  %v7341_v57 = vld [vmem:[%s12027_s1 + $0x24] sm:$0xf]  ;;  %v1356_v53 = vsel %vm9769_vm5, %v1351_v24, %v1355_v43  ;;  %v3142_v43 = vrot.slane %v3140_v62, 5 }
  0xee   : >> { %8292 = vmatmul.mubr.msk.bf16.gmra.mrb[4].mxu0 %vm627_vm6, %v10487_v9  ;;  %9063 = vmatprep.subr.msk.bf16.mxu1 %vm640_vm2, %v7335_v55  ;;  %v10539_v48 = vcombine.low %v10524_v27, %v10528_v60  ;;  %v7329_v34 = vcombine.low %v10312_v42, %v1356_v53  ;;  %v7461_v55 = vcombine.low %v10335_v8, %v10339_v32  ;;  %v10599_v42 = vld [vmem:[%s9726_s14 + $0xe0] sm:$0xf]  ;;  %v7334_v32 = vrot.slane %v10501_v51, 9  ;;  %v12119_v62 = vld [vmem:[#allocation20_spill] sm:$0xff] }
  0xef   : >> { %8297 = vmatprep.mubr.msk.bf16.mxu0 %vm627_vm6, %v7450_v22  ;;  %v10567_v22 = vcombine.low %v10558_v58, %v10562_v39  ;;  %v3131_v15 = vshrl.u32 %v10599_v42, 16  ;;  %v3134_v17 = vshll.u32 %v10599_v42, 16  ;;  %v7462_v8 = vcombine.low %v10348_v38, %v10599_v42  ;;  %v7350_v38 = vld [vmem:[%s12027_s1 + $0x28] sm:$0xf] }
  0xf0   : >> { %v1563_v5 = vsel %vm640_vm2, %v7341_v57, 0  ;;  %v1639_v51 = vshrl.u32 %v10613_v4, 16  ;;  %v1777_v53 = vsel %vm640_vm2, %v7350_v38, 0 }
  0xf1   : >> { %v3133_v10 = vrot.slane %v3131_v15, 4  ;;  %v3136_v20 = vrot.slane %v3134_v17, 5  ;;  %v3242_v15 = vrot.slane %v494_v26, 5 }
  0xf4   : >> { %8162 = vmatmul.mubr.msk.bf16.gmra.mrb[4].mxu1 %vm627_vm6, %v7323_v11  ;;  %v1443_v11 = vrot.slane %v456_v36, 5 }
  0xf5   : >> { %8167 = vmatprep.mubr.msk.bf16.mxu1 %vm627_vm6, %v12110_v59  ;;  %v10633_v59 = vld [vmem:[%s9726_s14 + $0x58] sm:$0xf] }
  0xf6   : >> { %8298 = vmatmul.mubr.msk.bf16.vlgmr.msra.gmra.mrb[0].mxu0 %vm627_vm6, %v10534_v33  ;;  %v7342_v13 = vcombine.low %v10613_v4, %v10633_v59 }
  0xf7   : >> { %8306 = vmatpush3.bf16.msra.mxu0 %v3055_v25  ;;  %8301 = vmatprep.mubr.msk.bf16.mxu0 %vm627_vm6, %v10539_v48  ;;  %v1641_v25 = vrot.slane %v1639_v51, 4 }
  0xf8   : >> { %9078 = vmatprep.subr.msk.bf16.mxu0 %vm640_vm2, %v7467_v31  ;;  %v7469_v31 = vcombine.low %v10431_v49, %v10437_v1 }
  0xfc   : >> { %8168 = vmatmul.mubr.msk.bf16.vlgmr.msra.gmra.mrb[0].mxu1 %vm627_vm6, %v12111_v41 }
  0xfd   : >> { %8176 = vmatpush3.bf16.msra.mxu1 %v1453_v52  ;;  %8171 = vmatprep.mubr.msk.bf16.mxu1 %vm627_vm6, %v12112_v7  ;;  %v458_v52 = vld [vmem:[%s9726_s14 + $0x54] sm:$0x1]  ;;  %v7478_v7 = vcombine.low %v10481_v46, %v10515_v63 }
  0xfe   : >> { %8302 = vmatmul.mubr.msk.bf16.gmra.mrb[4].mxu0 %vm627_vm6, %v10567_v22  ;;  %9064 = vmatprep.subr.msk.bf16.mxu1 %vm640_vm2, %v7341_v57  ;;  %v1648_v1 = vshll.u32 %v458_v52, 16  ;;  %v12114_v46 = vld [vmem:[#allocation5_spill] sm:$0xff] }
  0xff   : >> { %8307 = vmatprep.mubr.msk.bf16.mxu0 %vm627_vm6, %v7459_v0  ;;  %v3264_v0 = vsel %vm640_vm2, %v7477_v28, 0 }
 0x100   : >> { %v1650_v57 = vrot.slane %v1648_v1, 5  ;;  %v9170_v1 = vld [vmem:[%s9726_s14 + $0x80] sm:$0xf] }
 0x104   : >> { %8172 = vmatmul.mubr.msk.bf16.gmra.mrb[4].mxu1 %vm627_vm6, %v7329_v34  ;;  %v12113_v34 = vld [vmem:[#allocation14_spill] sm:$0xff] }
 0x105   : >> { %8177 = vmatprep.mubr.msk.bf16.mxu1 %vm627_vm6, %v10115_v56  ;;  %v7468_v56 = vcombine.low %v10388_v18, %v10424_v40  ;;  %v1444_v18 = vsel %vm9912_vm9, %v7334_v32, %v1443_v11  ;;  %v1642_v40 = vshll.u32 %v10613_v4, 16  ;;  %v12116_v11 = vld [vmem:[#allocation6_spill] sm:$0xff] }
 0x106   : >> { %8308 = vmatmul.mubr.msk.bf16.vlgmr.msra.gmra.mrb[0].mxu0 %vm627_vm6, %v7460_v19  ;;  %v7336_v36 = vcombine.low %v10420_v45, %v1444_v18  ;;  %v7486_v45 = vld [vmem:[%s12027_s1 + $0x60] sm:$0xf]  ;;  %v7367_v19 = vld [vmem:[%s12027_s1 + $0x2c] sm:$0xf] }
 0x107   : >> { %8316 = vmatpush3.bf16.msra.mxu0 %v3164_v21  ;;  %8311 = vmatprep.mubr.msk.bf16.mxu0 %vm627_vm6, %v7461_v55  ;;  %v1644_v54 = vrot.slane %v1642_v40, 5  ;;  %v7479_v55 = vcombine.low %v10519_v61, %v10524_v27  ;;  %v7480_v21 = vcombine.low %v10528_v60, %v10558_v58  ;;  %v3348_v17 = vsel %vm640_vm2, %v7486_v45, 0 }
 0x108   : >> { %9079 = vmatprep.subr.msk.bf16.mxu0 %vm640_vm2, %v7477_v28  ;;  %v7476_v28 = vrot.slane %v10599_v42, 9  ;;  %v1862_v27 = vrot.slane %v458_v52, 5  ;;  %v1919_v60 = vsel %vm640_vm2, %v7367_v19, 0  ;;  %v7359_v58 = vrot.slane %v10613_v4, 9  ;;  %v9168_v52 = vld [vmem:[%s9726_s14 + $0x70] sm:$0xf] }
 0x109   : >> { %v1645_v49 = vor.u32 %v1644_v54, %v1641_v25  ;;  %v9165_v25 = vld [vmem:[%s12027_s1 + $0x34] sm:$0xf] }
 0x10a   : >> { %v10687_v61 = vsel %vm9912_vm9, %v7476_v28, %v3242_v15  ;;  %v1863_v32 = vsel %vm9912_vm9, %v7359_v58, %v1862_v27 }
 0x10b   : >> { %v1646_v41 = vrot.slane %v1645_v49, 4  ;;  %v9169_v49 = vld [vmem:[%s9726_s14 + $0x78] sm:$0xf] }
 0x10c   : >> { %8178 = vmatmul.mubr.msk.bf16.vlgmr.msra.gmra.mrb[0].mxu1 %vm627_vm6, %v10160_v3  ;;  %v3137_v3 = vor.u32 %v3136_v20, %v3133_v10  ;;  %v12118_v10 = vld [vmem:[#allocation7_spill] sm:$0xff]  ;;  %v495_v20 = vld [vmem:[%s9726_s14 + $0xe8] sm:$0xf] }
 0x10d   : >> { %8186 = vmatpush3.bf16.msra.mxu1 %v1563_v5  ;;  %8181 = vmatprep.mubr.msk.bf16.mxu1 %vm627_vm6, %v10195_v47  ;;  %v7470_v47 = vcombine.low %v10441_v30, %v10471_v37  ;;  %v3424_v26 = vshrl.u32 %v495_v20, 16  ;;  %v3427_v4 = vshll.u32 %v495_v20, 16 }
 0x10e   : >> { %8312 = vmatmul.mubr.msk.bf16.gmra.mrb[4].mxu0 %vm627_vm6, %v7462_v8  ;;  %9065 = vmatprep.subr.msk.bf16.mxu1 %vm640_vm2, %v7350_v38  ;;  %v3138_v24 = vrot.slane %v3137_v3, 4  ;;  %v7376_v8 = vld [vmem:[%s12027_s1 + $0x30] sm:$0xf]  ;;  %v7487_v38 = vcombine.low %v10599_v42, %v495_v20  ;;  %v496_v3 = vld [vmem:[%s9726_s14 + $0xec] sm:$0x1] }
 0x10f   : >> { %8317 = vmatprep.mubr.msk.bf16.mxu0 %vm627_vm6, %v7468_v56  ;;  %v12117_v56 = vld [vmem:[#allocation19_spill] sm:$0xff]  ;;  %v2015_v51 = vsel %vm640_vm2, %v7376_v8, 0  ;;  %v3426_v18 = vrot.slane %v3424_v26, 4  ;;  %v3429_v40 = vrot.slane %v3427_v4, 5  ;;  %v3433_v42 = vshll.u32 %v496_v3, 16 }
 0x110   : >> { %v10650_v30 = vsel %vm9769_vm5, %v3138_v24, %v3142_v43  ;;  %v9167_v43 = vld [vmem:[%s9726_s14 + $0x68] sm:$0xf] }
 0x111   : >> { %v7471_v37 = vcombine.low %v10475_v50, %v10650_v30  ;;  %v1651_v50 = vsel %vm9769_vm5, %v1646_v41, %v1650_v57  ;;  %v9172_v41 = vld [vmem:[%s9726_s14 + $0x90] sm:$0xf] }
 0x112   : >> { %v7351_v63 = vcombine.low %v1651_v50, %v12114_v46  ;;  %v12125_v46 = vld [vmem:[#allocation15_spill] sm:$0xff] }
 0x114   : >> { %8182 = vmatmul.mubr.msk.bf16.gmra.mrb[4].mxu1 %vm627_vm6, %v7336_v36  ;;  %v12120_v36 = vld [vmem:[#allocation21_spill] sm:$0xff] }
 0x115   : >> { %8187 = vmatprep.mubr.msk.bf16.mxu1 %vm627_vm6, %v7342_v13 }
 0x116   : >> { %8318 = vmatmul.mubr.msk.bf16.vlgmr.msra.gmra.mrb[0].mxu0 %vm627_vm6, %v7469_v31  ;;  %v9166_v31 = vld [vmem:[%s9726_s14 + $0x60] sm:$0xf] }
 0x117   : >> { %8326 = vmatpush3.bf16.msra.mxu0 %v3264_v0  ;;  %8321 = vmatprep.mubr.msk.bf16.mxu0 %vm627_vm6, %v7470_v47  ;;  %v7377_v13 = vcombine.low %v10633_v59, %v9166_v31  ;;  %v3435_v47 = vrot.slane %v3433_v42, 5  ;;  %v7378_v0 = vcombine.low %v9167_v43, %v9168_v52 }
 0x118   : >> { %9080 = vmatprep.subr.msk.bf16.mxu0 %vm640_vm2, %v7486_v45 }
 0x11c   : >> { %8188 = vmatmul.mubr.msk.bf16.vlgmr.msra.gmra.mrb[0].mxu1 %vm627_vm6, %v12113_v34  ;;  %v7498_v34 = vrot.slane %v495_v20, 9 }
 0x11d   : >> { %8196 = vmatpush3.bf16.msra.mxu1 %v1777_v53  ;;  %8191 = vmatprep.mubr.msk.bf16.mxu1 %vm627_vm6, %v10073_v2  ;;  %v7492_v2 = vld [vmem:[%s12027_s1 + $0x64] sm:$0xf]  ;;  %v12123_v53 = vld [vmem:[#allocation18_spill] sm:$0xff] }
 0x11e   : >> { %8322 = vmatmul.mubr.msk.bf16.gmra.mrb[4].mxu0 %vm627_vm6, %v7471_v37  ;;  %9066 = vmatprep.subr.msk.bf16.mxu1 %vm640_vm2, %v7367_v19  ;;  %v3445_v5 = vsel %vm640_vm2, %v7492_v2, 0  ;;  %v7379_v37 = vcombine.low %v9169_v49, %v9170_v1  ;;  %v3523_v19 = vrot.slane %v496_v3, 5  ;;  %v7523_v3 = vld [vmem:[%s10787_s30 + $0x68] sm:$0xf] }
 0x11f   : >> { %8327 = vmatprep.mubr.msk.bf16.mxu0 %vm627_vm6, %v7478_v7  ;;  %v12124_v7 = vld [vmem:[#allocation17_spill] sm:$0xff] }
 0x124   : >> { %8192 = vmatmul.mubr.msk.bf16.gmra.mrb[4].mxu1 %vm627_vm6, %v10100_v23  ;;  %v7481_v23 = vcombine.low %v10562_v39, %v10687_v61  ;;  %v12115_v39 = vld [vmem:[#allocation9_spill] sm:$0xff] }
 0x125   : >> { %8197 = vmatprep.mubr.msk.bf16.mxu1 %vm627_vm6, %v7351_v63  ;;  %v12126_v63 = vld [vmem:[#allocation16_spill] sm:$0xff] }
 0x126   : >> { %8328 = vmatmul.mubr.msk.bf16.vlgmr.msra.gmra.mrb[0].mxu0 %vm627_vm6, %v7479_v55  ;;  %v12127_v55 = vcombine.low %v12125_v46, %v12126_v63 }
 0x127   : >> { %8336 = vmatpush3.bf16.msra.mxu0 %v3348_v17  ;;  %8331 = vmatprep.mubr.msk.bf16.mxu0 %vm627_vm6, %v7480_v21 }
 0x128   : >> { %9081 = vmatprep.subr.msk.bf16.mxu0 %vm640_vm2, %v7492_v2 }
 0x12c   : >> { %8198 = vmatmul.mubr.msk.bf16.vlgmr.msra.gmra.mrb[0].mxu1 %vm627_vm6, %v10147_v14  ;;  %v7368_v14 = vcombine.low %v1863_v32, %v12116_v11 }
 0x12d   : >> { %8206 = vmatpush3.bf16.msra.mxu1 %v1919_v60  ;;  %8201 = vmatprep.mubr.msk.bf16.mxu1 %vm627_vm6, %v10199_v12  ;;  %v7499_v12 = vld [vmem:[%s12027_s1 + $0x68] sm:$0xf] }
 0x12e   : >> { %8332 = vmatmul.mubr.msk.bf16.gmra.mrb[4].mxu0 %vm627_vm6, %v7481_v23  ;;  %9067 = vmatprep.subr.msk.bf16.mxu1 %vm640_vm2, %v7376_v8  ;;  %v3533_v24 = vsel %vm640_vm2, %v7499_v12, 0 }
 0x12f   : >> { %8337 = vmatprep.mubr.msk.bf16.mxu0 %vm627_vm6, %v12115_v39 }
 0x134   : >> { %8202 = vmatmul.mubr.msk.bf16.gmra.mrb[4].mxu1 %vm627_vm6, %v12117_v56 }
 0x135   : >> { %8207 = vmatprep.mubr.msk.bf16.mxu1 %vm627_vm6, %v7368_v14 }
 0x136   : >> { %8338 = vmatmul.mubr.msk.bf16.vlgmr.msra.gmra.mrb[0].mxu0 %vm627_vm6, %v12118_v10 }
 0x137   : >> { %8346 = vmatpush3.bf16.msra.mxu0 %v3445_v5  ;;  %8341 = vmatprep.mubr.msk.bf16.mxu0 %vm627_vm6, %v10372_v6  ;;  %v3430_v6 = vor.u32 %v3429_v40, %v3426_v18 }
 0x138   : >> { %9082 = vmatprep.subr.msk.bf16.mxu0 %vm640_vm2, %v7499_v12 }
 0x139   : >> { %v3431_v54 = vrot.slane %v3430_v6, 4 }
 0x13b   : >> { %v3436_v59 = vsel %vm9769_vm5, %v3431_v54, %v3435_v47  ;;  %v7515_v54 = vld [vmem:[%s10787_s30 + $0x58] sm:$0xf] }
 0x13c   : >> { %8208 = vmatmul.mubr.msk.bf16.vlgmr.msra.gmra.mrb[0].mxu1 %vm627_vm6, %v12119_v62  ;;  %v7493_v45 = vcombine.low %v10650_v30, %v3436_v59  ;;  %v7388_v30 = vcombine.low %v12124_v7, %v12123_v53  ;;  %v7525_v62 = vld [vmem:[%s10787_s30 + $0x6c] sm:$0x1] }
 0x13d   : >> { %8216 = vmatpush3.bf16.msra.mxu1 %v2015_v51  ;;  %8211 = vmatprep.mubr.msk.bf16.mxu1 %vm627_vm6, %v12120_v36 }
 0x13e   : >> { %8342 = vmatmul.mubr.msk.bf16.gmra.mrb[4].mxu0 %vm627_vm6, %v7487_v38  ;;  %9069 = vmatprep.subr.msk.bf16.mxu1 %vm640_vm2, %v9165_v25 }
 0x13f   : >> { %8347 = vmatprep.mubr.msk.bf16.mxu0 %vm627_vm6, %v10447_v44  ;;  %v12121_v44 = vld [vmem:[#allocation22_spill] sm:$0xff] }
 0x144   : >> { %8212 = vmatmul.mubr.msk.bf16.gmra.mrb[4].mxu1 %vm627_vm6, %v12121_v44 }
 0x145   : >> { %8217 = vmatprep.mubr.msk.bf16.mxu1 %vm627_vm6, %v7377_v13 }
 0x146   : >> { %8348 = vmatmul.mubr.msk.bf16.vlgmr.msra.gmra.mrb[0].mxu0 %vm627_vm6, %v10453_v29  ;;  %v12122_v29 = vld [vmem:[#allocation3_spill] sm:$0xff] }
 0x147   : >> { %8356 = vmatpush3.bf16.msra.mxu0 %v3533_v24  ;;  %8351 = vmatprep.mubr.msk.bf16.mxu0 %vm627_vm6, %v10487_v9  ;;  %v9171_v9 = vld [vmem:[%s9726_s14 + $0x88] sm:$0xf] }
 0x148   : >> { %v7380_v57 = vcombine.low %v9171_v9, %v9172_v41 }
 0x14c   : >> { %8218 = vmatmul.mubr.msk.bf16.vlgmr.msra.gmra.mrb[0].mxu1 %vm627_vm6, %v7378_v0  ;;  %v7517_v0 = vld [vmem:[%s10787_s30 + $0x5c] sm:$0x1] }
 0x14d   : >> { %8636 = vmatpush3.bf16.msra.mxu1 %v12122_v29  ;;  %8221 = vmatprep.mubr.msk.bf16.mxu1 %vm627_vm6, %v7379_v37 }
 0x14e   : >> { %8352 = vmatmul.mubr.msk.bf16.gmra.mrb[4].mxu0 %vm627_vm6, %v7493_v45 }
 0x14f   : >> { %8357 = vmatprep.mubr.msk.bf16.mxu0 %vm627_vm6, %v10534_v33  ;;  %v3524_v33 = vsel %vm9912_vm9, %v7498_v34, %v3523_v19  ;;  %v7529_v19 = vld [vmem:[%s10787_s30 + $0x74] sm:$0x1] }
 0x150   : >> { %v7500_v50 = vcombine.low %v10687_v61, %v3524_v33 }
 0x154   : >> { %8222 = vmatmul.mubr.msk.bf16.gmra.mrb[4].mxu1 %vm627_vm6, %v7380_v57  ;;  %v7527_v57 = vld [vmem:[%s10787_s30 + $0x70] sm:$0xf] }
 0x155   : >> { %8231 = vmatprep.mubr.msk.bf16.mxu1 %vm627_vm6, %v7388_v30 }
 0x156   : >> { %8358 = vmatmul.mubr.msk.bf16.vlgmr.msra.gmra.mrb[0].mxu0 %vm627_vm6, %v10539_v48 }
 0x157   : >> { %8361 = vmatprep.mubr.msk.bf16.mxu0 %vm627_vm6, %v10567_v22  ;;  %v10779_v22 = vld [vmem:[%s12028_s2] ss:$0 sm:$0xff] }
 0x15e   : >> { %8362 = vmatmul.mubr.msk.bf16.gmra.mrb[4].mxu0 %vm627_vm6, %v7500_v50 }
 0x160   : >> { %8232 = vmatmul.mubr.msk.bf16.vlgmr.msra.gmra.mrb[4].mxu1 %vm627_vm6, %v12127_v55 }
 0x21f   : >> { %v8219_v21 = vpop.f32.mrb[0].mxu1 }
 0x220   : >> { %v2051_v28 = vpop.f32.mrb[1].mxu1 }
 0x221   : >> { %v8220_v48 = vpop.f32.mrb[2].mxu1 }
 0x222   : >> { %v2054_v15 = vpop.f32.mrb[3].mxu1 }
 0x229   : >> { %v8359_v17 = vpop.f32.mrb[0].mxu0 }
 0x22a   : >> { %v8637_v2 = vadd.f32 %v8359_v17, %v8219_v21  ;;  %v3569_v23 = vpop.f32.mrb[1].mxu0 }
 0x22b   : >> { %v8638_v61 = vadd.f32 %v3569_v23, %v2051_v28  ;;  %v8360_v27 = vpop.f32.mrb[2].mxu0 }
 0x22c   : >> { %v3617_v60 = vadd.f32 %v8637_v2, %v10779_v22  ;;  %v8639_v58 = vadd.f32 %v8360_v27, %v8220_v48  ;;  %v3572_v8 = vpop.f32.mrb[3].mxu0  ;;  %v7519_v48 = vld [vmem:[%s10787_s30 + $0x60] sm:$0xf] }
 0x22d   : >> { %v3615_v39 = vadd.f32 %v8638_v61, %v10779_v22  ;;  %v8640_v32 = vadd.f32 %v3572_v8, %v2054_v15  ;;  %v7521_v15 = vld [vmem:[%s10787_s30 + $0x64] sm:$0x1] }
 0x22e   : >> { %v3625_v11 = vmax.f32 %v3617_v60, 0.0  ;;  %v3618_v14 = vadd.f32 %v8639_v58, %v10779_v22 }
 0x22f   : >> { %v3623_v5 = vmax.f32 %v3615_v39, 0.0  ;;  %v3616_v56 = vadd.f32 %v8640_v32, %v10779_v22 }
 0x230   : >> { %v7818_v12 = vpack.c.bf16 %v3625_v11, %v3625_v11  ;;  %v3626_v10 = vmax.f32 %v3618_v14, 0.0 }
 0x231   : >> { %v7816_v20 = vpack.c.bf16 %v3623_v5, %v3623_v5  ;;  %v3624_v26 = vmax.f32 %v3616_v56, 0.0  ;;  %v8363_v4 = vpop.f32.mrb[4].mxu0 }
 0x232   : >> { %v3681_v38 = vshrl.u32 %v7818_v12, 16  ;;  %v7819_v51 = vpack.c.bf16 %v3626_v10, %v3626_v10  ;;  %v3585_v18 = vpop.f32.mrb[5].mxu0  ;;  %v3684_v40 = vshll.u32 %v7818_v12, 16 }
 0x233   : >> { %v3665_v36 = vshrl.u32 %v7816_v20, 16  ;;  %v7817_v6 = vpack.c.bf16 %v3624_v26, %v3624_v26  ;;  %v8364_v42 = vpop.f32.mrb[6].mxu0  ;;  %v3668_v13 = vshll.u32 %v7816_v20, 16  ;;  %v8233_v44 = vpop.f32.mrb[4].mxu1 }
 0x234   : >> { %v3683_v25 = vrot.slane %v3681_v38, 7  ;;  %v3689_v47 = vshrl.u32 %v7819_v51, 16  ;;  %v3692_v24 = vshll.u32 %v7819_v51, 16  ;;  %v3588_v59 = vpop.f32.mrb[7].mxu0  ;;  %v8641_v1 = vadd.f32 %v8363_v4, %v8233_v44  ;;  %v2176_v37 = vpop.f32.mrb[5].mxu1 }
 0x235   : >> { %v3667_v52 = vrot.slane %v3665_v36, 7  ;;  %v3673_v45 = vshrl.u32 %v7817_v6, 16  ;;  %v3676_v49 = vshll.u32 %v7817_v6, 16  ;;  %v8642_v53 = vadd.f32 %v3585_v18, %v2176_v37  ;;  %v8234_v7 = vpop.f32.mrb[6].mxu1  ;;  %v7543_v37 = vld [vmem:[%s10787_s30 + $0x90] sm:$0xf] }
 0x236   : >> { %v3686_v29 = vor.u32 %v3684_v40, %v3683_v25  ;;  %v3687_v9 = vrot.slane %v3683_v25, 4  ;;  %v3691_v41 = vrot.slane %v3689_v47, 7  ;;  %v3621_v50 = vadd.f32 %v8641_v1, %v10779_v22  ;;  %v2179_v46 = vpop.f32.mrb[7].mxu1  ;;  %v7533_v47 = vld [vmem:[%s10787_s30 + $0x7c] sm:$0x1] }
 0x237   : >> { %v3670_v30 = vor.u32 %v3668_v13, %v3667_v52  ;;  %v3671_v34 = vrot.slane %v3667_v52, 4  ;;  %v3675_v33 = vrot.slane %v3673_v45, 7  ;;  %v3619_v8 = vadd.f32 %v8642_v53, %v10779_v22  ;;  %v7545_v53 = vld [vmem:[%s10787_s30 + $0x94] sm:$0x1] }
 0x238   : >> { %v3767_v63 = vsel %vm10793_vm12, %v3686_v29, %v7523_v3  ;;  %v3770_v55 = vsel %vm10800_vm13, %v3687_v9, %v7525_v62  ;;  %v3694_v21 = vor.u32 %v3692_v24, %v3691_v41  ;;  %v3695_v28 = vrot.slane %v3691_v41, 4  ;;  %v7539_v3 = vld [vmem:[%s10787_s30 + $0x88] sm:$0xf]  ;;  %v7541_v62 = vld [vmem:[%s10787_s30 + $0x8c] sm:$0x1] }
 0x239   : >> { %7524 = vst [vmem:[%s10787_s30 + $0x68] sm:$0xf] %v3767_v63  ;;  %7526 = vst [vmem:[%s10787_s30 + $0x6c] sm:$0x1] %v3770_v55  ;;  %v3752_v17 = vsel %vm10793_vm12, %v3670_v30, %v7515_v54  ;;  %v3758_v2 = vsel %vm10800_vm13, %v3671_v34, %v7517_v0  ;;  %v3678_v23 = vor.u32 %v3676_v49, %v3675_v33  ;;  %v3679_v61 = vrot.slane %v3675_v33, 4 }
 0x23a   : >> { %7516 = vst [vmem:[%s10787_s30 + $0x58] sm:$0xf] %v3752_v17  ;;  %7518 = vst [vmem:[%s10787_s30 + $0x5c] sm:$0x1] %v3758_v2  ;;  %v3773_v27 = vsel %vm10793_vm12, %v3694_v21, %v7527_v57  ;;  %v3776_v60 = vsel %vm10800_vm13, %v3695_v28, %v7529_v19  ;;  %v3629_v58 = vmax.f32 %v3621_v50, 0.0  ;;  %v8643_v11 = vadd.f32 %v8364_v42, %v8234_v7 }
 0x23b   : >> { %7528 = vst [vmem:[%s10787_s30 + $0x70] sm:$0xf] %v3773_v27  ;;  %7530 = vst [vmem:[%s10787_s30 + $0x74] sm:$0x1] %v3776_v60  ;;  %v3761_v39 = vsel %vm10793_vm12, %v3678_v23, %v7519_v48  ;;  %v3764_v32 = vsel %vm10800_vm13, %v3679_v61, %v7521_v15  ;;  %v8644_v14 = vadd.f32 %v3588_v59, %v2179_v46  ;;  %v3627_v56 = vmax.f32 %v3619_v8, 0.0 }
 0x23c   : >> { %7520 = vst [vmem:[%s10787_s30 + $0x60] sm:$0xf] %v3761_v39  ;;  %7522 = vst [vmem:[%s10787_s30 + $0x64] sm:$0x1] %v3764_v32  ;;  %v7822_v5 = vpack.c.bf16 %v3629_v58, %v3629_v58  ;;  %v3622_v12 = vadd.f32 %v8643_v11, %v10779_v22  ;;  %v7531_v54 = vld [vmem:[%s10787_s30 + $0x78] sm:$0xf] }
 0x23d   : >> { %v3620_v10 = vadd.f32 %v8644_v14, %v10779_v22  ;;  %v7820_v26 = vpack.c.bf16 %v3627_v56, %v3627_v56  ;;  %v7535_v7 = vld [vmem:[%s10787_s30 + $0x80] sm:$0xf]  ;;  %v7537_v30 = vld [vmem:[%s10787_s30 + $0x84] sm:$0x1] }
 0x23e   : >> { %v3713_v20 = vshrl.u32 %v7822_v5, 16  ;;  %v3630_v4 = vmax.f32 %v3622_v12, 0.0  ;;  %v3716_v18 = vshll.u32 %v7822_v5, 16 }
 0x23f   : >> { %v3628_v38 = vmax.f32 %v3620_v10, 0.0  ;;  %v3697_v40 = vshrl.u32 %v7820_v26, 16  ;;  %v3700_v22 = vshll.u32 %v7820_v26, 16 }
 0x240   : >> { %v3715_v51 = vrot.slane %v3713_v20, 7  ;;  %v7823_v36 = vpack.c.bf16 %v3630_v4, %v3630_v4 }
 0x241   : >> { %v7821_v6 = vpack.c.bf16 %v3628_v38, %v3628_v38  ;;  %v3699_v13 = vrot.slane %v3697_v40, 7 }
 0x242   : >> { %v3718_v42 = vor.u32 %v3716_v18, %v3715_v51  ;;  %v3719_v25 = vrot.slane %v3715_v51, 4  ;;  %v3721_v24 = vshrl.u32 %v7823_v36, 16  ;;  %v3724_v1 = vshll.u32 %v7823_v36, 16 }
 0x243   : >> { %v3705_v44 = vshrl.u32 %v7821_v6, 16  ;;  %v3702_v0 = vor.u32 %v3700_v22, %v3699_v13  ;;  %v3703_v45 = vrot.slane %v3699_v13, 4  ;;  %v3708_v9 = vshll.u32 %v7821_v6, 16 }
 0x244   : >> { %v3791_v59 = vsel %vm10793_vm12, %v3718_v42, %v7539_v3  ;;  %v3794_v52 = vsel %vm10800_vm13, %v3719_v25, %v7541_v62  ;;  %v3723_v49 = vrot.slane %v3721_v24, 7  ;;  %432 = sbr.rel (!%p430_p4) target bundleno = 106 (0x6a), region = 141 }
 0x245   : >> { %7540 = vst [vmem:[%s10787_s30 + $0x88] sm:$0xf] %v3791_v59  ;;  %7542 = vst [vmem:[%s10787_s30 + $0x8c] sm:$0x1] %v3794_v52  ;;  %v3707_v29 = vrot.slane %v3705_v44, 7  ;;  %v3779_v41 = vsel %vm10793_vm12, %v3702_v0, %v7531_v54  ;;  %v3782_v57 = vsel %vm10800_vm13, %v3703_v45, %v7533_v47 }
 0x246   : >> { %7532 = vst [vmem:[%s10787_s30 + $0x78] sm:$0xf] %v3779_v41  ;;  %7534 = vst [vmem:[%s10787_s30 + $0x7c] sm:$0x1] %v3782_v57  ;;  %v3726_v34 = vor.u32 %v3724_v1, %v3723_v49  ;;  %v3727_v19 = vrot.slane %v3723_v49, 4 }
 0x247   : >> { %v3710_v33 = vor.u32 %v3708_v9, %v3707_v29  ;;  %v3711_v50 = vrot.slane %v3707_v29, 4 }
 0x248   : >> { %v3797_v46 = vsel %vm10793_vm12, %v3726_v34, %v7543_v37  ;;  %v3800_v63 = vsel %vm10800_vm13, %v3727_v19, %v7545_v53 }
 0x249   : >> { %v3785_v55 = vsel %vm10793_vm12, %v3710_v33, %v7535_v7  ;;  %v3788_v21 = vsel %vm10800_vm13, %v3711_v50, %v7537_v30  ;;  %7544 = vst [vmem:[%s10787_s30 + $0x90] sm:$0xf] %v3797_v46  ;;  %7546 = vst [vmem:[%s10787_s30 + $0x94] sm:$0x1] %v3800_v63 }
 0x24a   : >> { %7536 = vst [vmem:[%s10787_s30 + $0x80] sm:$0xf] %v3785_v55  ;;  %7538 = vst [vmem:[%s10787_s30 + $0x84] sm:$0x1] %v3788_v21 }
 0x24b LB: >> { %v7548_v31 = vld [vmem:[%s12029_s3 + $0x4] sm:$0xf]  ;;  %v7673_v43 = vld [vmem:[%s12029_s3 + $0x34] sm:$0xf]  ;;  %v10886_v28 = vld [vmem:[%s12029_s3] sm:$0xf]  ;;  %s9231_s9 = sphi %s10872_s9, %s3807_s9  }
 0x24c   : >> { %9083 = vmatprep.subr.msk.bf16.mxu1 %vm640_vm2, %v7548_v31  ;;  %9096 = vmatprep.subr.msk.bf16.mxu0 %vm640_vm2, %v7673_v43  ;;  %v4016_v48 = vsel %vm640_vm2, %v7548_v31, 0  ;;  %v10892_v15 = vsel %vm640_vm2, %v7673_v43, 0  ;;  %v10897_v17 = vld [vmem:[%s12029_s3 + $0x38] sm:$0xf]  ;;  %s7824_s15 = smul.u32 80, %s9231_s9  ;;  %s7811_s6 = sshll.u32 %s9231_s9, 6 }
 0x24d   : >> { %12132 = vst [vmem:[#allocation23_spill] sm:$0xff] %v10892_v15  ;;  %8366 = vmatpush3.bf16.msra.mxu1 %v4016_v48  ;;  %8496 = vmatpush3.bf16.msra.mxu0 %v10892_v15  ;;  %s11989_s7 = scalar_lea.vmem %s9685_s25, %s7811_s6  ;;  %s3807_s9 = sadd.s32 1, %s9231_s9  }
 0x24e   : >> { %9084 = vmatprep.subr.msk.bf16.mxu1 %vm640_vm2, %v10886_v28  ;;  %9098 = vmatprep.subr.msk.bf16.mxu0 %vm640_vm2, %v10897_v17  ;;  %s10907_s16 = scalar_lea.vmem [#allocation2], %s7824_s15  ;;  %p3804_p5 = scmp.ge.s32.totalorder %s3807_s9, 8  }
 0x251   : >> { %v10910_v2 = vld [vmem:[%s10907_s16] sm:$0xf]  ;;  %v10913_v23 = vld [vmem:[%s10907_s16 + $0x4] sm:$0x1]  ;;  %v10916_v61 = vld [vmem:[%s10907_s16 + $0x8] sm:$0xf] }
 0x252   : >> { %v10919_v27 = vld [vmem:[%s10907_s16 + $0xc] sm:$0x1]  ;;  %v10922_v60 = vld [vmem:[%s10907_s16 + $0x10] sm:$0xf]  ;;  %v3876_v58 = vshrl.u32 %v10910_v2, 16  ;;  %v3879_v8 = vshll.u32 %v10910_v2, 16 }
 0x253   : >> { %v3885_v39 = vshll.u32 %v10913_v23, 16  ;;  %v3890_v32 = vshrl.u32 %v10916_v61, 16  ;;  %v10929_v11 = vld [vmem:[%s10907_s16 + $0x14] sm:$0x1]  ;;  %v3893_v14 = vshll.u32 %v10916_v61, 16  ;;  %v3899_v5 = vshll.u32 %v10919_v27, 16 }
 0x254   : >> { %v3904_v56 = vshrl.u32 %v10922_v60, 16  ;;  %v3907_v12 = vshll.u32 %v10922_v60, 16  ;;  %v3878_v10 = vrot.slane %v3876_v58, 4  ;;  %v3881_v20 = vrot.slane %v3879_v8, 5  ;;  %v10937_v42 = vld [vmem:[%s10907_s16 + $0x58] sm:$0xf] }
 0x255   : >> { %v3892_v26 = vrot.slane %v3890_v32, 4  ;;  %v3895_v4 = vrot.slane %v3893_v14, 5  ;;  %v3887_v40 = vrot.slane %v3885_v39, 5  ;;  %v3913_v3 = vshll.u32 %v10929_v11, 16  ;;  %v10942_v24 = vld [vmem:[%s10907_s16 + $0x5c] sm:$0x1] }
 0x256   : >> { %v3906_v38 = vrot.slane %v3904_v56, 4  ;;  %v3909_v51 = vrot.slane %v3907_v12, 5  ;;  %v3882_v18 = vor.u32 %v3881_v20, %v3878_v10  ;;  %v3901_v36 = vrot.slane %v3899_v5, 5  ;;  %v10945_v44 = vld [vmem:[%s10907_s16 + $0x60] sm:$0xf] }
 0x257   : >> { %v3896_v62 = vor.u32 %v3895_v4, %v3892_v26  ;;  %v3915_v13 = vrot.slane %v3913_v3, 5  ;;  %v5027_v59 = vshrl.u32 %v10937_v42, 16  ;;  %v10957_v45 = vld [vmem:[%s10907_s16 + $0x64] sm:$0x1]  ;;  %v10960_v49 = vld [vmem:[%s10907_s16 + $0x68] sm:$0xf] }
 0x258   : >> { %v3910_v6 = vor.u32 %v3909_v51, %v3906_v38  ;;  %v3883_v25 = vrot.slane %v3882_v18, 4  ;;  %v5030_v1 = vshll.u32 %v10937_v42, 16  ;;  %v5036_v57 = vshll.u32 %v10942_v24, 16  ;;  %v10974_v55 = vld [vmem:[%s10907_s16 + $0x18] sm:$0xf] }
 0x259   : >> { %v3897_v22 = vrot.slane %v3896_v62, 4  ;;  %v5029_v9 = vrot.slane %v5027_v59, 4  ;;  %v5041_v53 = vshrl.u32 %v10945_v44, 16  ;;  %v5044_v7 = vshll.u32 %v10945_v44, 16  ;;  %v10977_v43 = vld [vmem:[%s10907_s16 + $0x6c] sm:$0x1] }
 0x25a   : >> { %v3911_v54 = vrot.slane %v3910_v6, 4  ;;  %v3888_v47 = vsel %vm9769_vm5, %v3883_v25, %v3887_v40  ;;  %v5032_v41 = vrot.slane %v5030_v1, 5  ;;  %v5050_v30 = vshll.u32 %v10957_v45, 16  ;;  %v10980_v39 = vld [vmem:[%s10907_s16 + $0x1c] sm:$0x1] }
 0x25b   : >> { %v10950_v52 = vsel %vm9769_vm5, %v3897_v22, %v3901_v36  ;;  %v5055_v34 = vshrl.u32 %v10960_v49, 16  ;;  %v5058_v19 = vshll.u32 %v10960_v49, 16  ;;  %v5038_v50 = vrot.slane %v5036_v57, 5  ;;  %v10989_v12 = vld [vmem:[%s10907_s16 + $0x70] sm:$0xf] }
 0x25c   : >> { %v10954_v0 = vsel %vm9769_vm5, %v3911_v54, %v3915_v13  ;;  %v7549_v37 = vcombine.low %v3888_v47, %v10950_v52  ;;  %v5033_v33 = vor.u32 %v5032_v41, %v5029_v9  ;;  %v5043_v46 = vrot.slane %v5041_v53, 4  ;;  %v10998_v18 = vld [vmem:[%s10907_s16 + $0x74] sm:$0x1]  ;;  %v11005_v25 = vld [vmem:[%s10907_s16 + $0x20] sm:$0xf] }
 0x25d   : >> { %v5046_v63 = vrot.slane %v5044_v7, 5  ;;  %v5057_v21 = vrot.slane %v5055_v34, 4  ;;  %v5060_v31 = vrot.slane %v5058_v19, 5  ;;  %v5052_v8 = vrot.slane %v5050_v30, 5  ;;  %v11017_v57 = vld [vmem:[%s10907_s16 + $0x28] sm:$0xf] }
 0x25e   : >> { %8367 = vmatprep.mubr.msk.bf16.mxu1 %vm627_vm6, %v7549_v37  ;;  %v5034_v48 = vrot.slane %v5033_v33, 4  ;;  %v3918_v32 = vshrl.u32 %v10974_v55, 16  ;;  %v3921_v56 = vshll.u32 %v10974_v55, 16  ;;  %v5064_v20 = vshll.u32 %v10977_v43, 16  ;;  %v11010_v37 = vld [vmem:[%s10907_s16 + $0x24] sm:$0x1] }
 0x25f   : >> { %v5047_v58 = vor.u32 %v5046_v63, %v5043_v46  ;;  %v5061_v10 = vor.u32 %v5060_v31, %v5057_v21  ;;  %v3927_v4 = vshll.u32 %v10980_v39, 16  ;;  %v5069_v3 = vshrl.u32 %v10989_v12, 16  ;;  %v11025_v19 = vld [vmem:[%s10907_s16 + $0x2c] sm:$0x1] }
 0x260   : >> { %v10985_v14 = vsel %vm9769_vm5, %v5034_v48, %v5038_v50  ;;  %v3920_v26 = vrot.slane %v3918_v32, 4  ;;  %v3923_v51 = vrot.slane %v3921_v56, 5  ;;  %v5072_v6 = vshll.u32 %v10989_v12, 16  ;;  %v11029_v50 = vld [vmem:[%s10907_s16 + $0x30] sm:$0xf] }
 0x261   : >> { %12133 = vst [vmem:[#allocation24_spill] sm:$0xff] %v10985_v14  ;;  %v5048_v5 = vrot.slane %v5047_v58, 4  ;;  %v3929_v36 = vrot.slane %v3927_v4, 5  ;;  %v5062_v13 = vrot.slane %v5061_v10, 4  ;;  %v5066_v22 = vrot.slane %v5064_v20, 5 }
 0x262   : >> { %v3924_v62 = vor.u32 %v3923_v51, %v3920_v26  ;;  %v5071_v54 = vrot.slane %v5069_v3, 4  ;;  %v5078_v47 = vshll.u32 %v10998_v18, 16  ;;  %v5074_v1 = vrot.slane %v5072_v6, 5  ;;  %v11052_v10 = vld [vmem:[%s10907_s16 + $0x34] sm:$0x1] }
 0x263   : >> { %v10995_v38 = vsel %vm9769_vm5, %v5048_v5, %v5052_v8  ;;  %v4116_v9 = vsel %vm640_vm2, %v10886_v28, 0  ;;  %v5598_v41 = vsel %vm640_vm2, %v10897_v17, 0  ;;  %v3932_v53 = vshrl.u32 %v11005_v25, 16  ;;  %v11045_v8 = vld [vmem:[%s12029_s3 + $0x8] sm:$0xf] }
 0x264   : >> { %v7674_v40 = vcombine.low %v10985_v14, %v10995_v38  ;;  %v3925_v59 = vrot.slane %v3924_v62, 4  ;;  %v5075_v30 = vor.u32 %v5074_v1, %v5071_v54  ;;  %v5080_v34 = vrot.slane %v5078_v47, 5  ;;  %v11060_v3 = vld [vmem:[%s10907_s16 + $0x38] sm:$0xf]  ;;  %v7692_v1 = vld [vmem:[%s12029_s3 + $0x3c] sm:$0xf] }
 0x265   : >> { %v3935_v33 = vshll.u32 %v11005_v25, 16  ;;  %v11033_v28 = vsel %vm9769_vm5, %v5062_v13, %v5066_v22  ;;  %v3934_v46 = vrot.slane %v3932_v53, 4  ;;  %v3941_v63 = vshll.u32 %v11010_v37, 16 }
 0x266   : >> { %8497 = vmatprep.mubr.msk.bf16.mxu0 %vm627_vm6, %v7674_v40  ;;  %v11022_v7 = vsel %vm9769_vm5, %v3925_v59, %v3929_v36  ;;  %v5076_v21 = vrot.slane %v5075_v30, 4  ;;  %v3946_v48 = vshrl.u32 %v11017_v57, 16  ;;  %v3949_v58 = vshll.u32 %v11017_v57, 16 }
 0x267   : >> { %v11037_v17 = vcombine.low %v10954_v0, %v11022_v7  ;;  %v3937_v31 = vrot.slane %v3935_v33, 5  ;;  %v5240_v32 = vrot.slane %v10942_v24, 5  ;;  %v3943_v5 = vrot.slane %v3941_v63, 5  ;;  %v11063_v24 = vld [vmem:[%s10907_s16 + $0x3c] sm:$0x1] }
 0x268   : >> { %v3955_v56 = vshll.u32 %v11025_v19, 16  ;;  %v3960_v20 = vshrl.u32 %v11029_v50, 16  ;;  %v11057_v26 = vsel %vm9769_vm5, %v5076_v21, %v5080_v34  ;;  %v3948_v51 = vrot.slane %v3946_v48, 4  ;;  %v11086_v63 = vld [vmem:[%s10907_s16 + $0x78] sm:$0xf] }
 0x269   : >> { %12134 = vst [vmem:[#allocation25_spill] sm:$0xff] %v11037_v17  ;;  %8368 = vmatmul.mubr.msk.bf16.vlgmr.msra.gmra.mrb[0].mxu1 %vm627_vm6, %v11037_v17  ;;  %v3938_v4 = vor.u32 %v3937_v31, %v3934_v46  ;;  %v3951_v40 = vrot.slane %v3949_v58, 5  ;;  %v5244_v62 = vrot.slane %v10957_v45, 5  ;;  %v5248_v36 = vrot.slane %v10977_v43, 5 }
 0x26a   : >> { %8376 = vmatpush3.bf16.msra.mxu1 %v4116_v9  ;;  %v7675_v6 = vcombine.low %v11033_v28, %v11057_v26  ;;  %v3957_v13 = vrot.slane %v3955_v56, 5  ;;  %v3962_v47 = vrot.slane %v3960_v20, 4  ;;  %v3963_v59 = vshll.u32 %v11029_v50, 16 }
 0x26b   : >> { %9085 = vmatprep.subr.msk.bf16.mxu1 %vm640_vm2, %v11045_v8  ;;  %v3939_v22 = vrot.slane %v3938_v4, 4  ;;  %v3952_v54 = vor.u32 %v3951_v40, %v3948_v51  ;;  %v3969_v45 = vshll.u32 %v11052_v10, 16  ;;  %v3974_v43 = vshrl.u32 %v11060_v3, 16 }
 0x26c   : >> { %8498 = vmatmul.mubr.msk.bf16.vlgmr.msra.gmra.mrb[0].mxu0 %vm627_vm6, %v7675_v6  ;;  %v3977_v9 = vshll.u32 %v11060_v3, 16  ;;  %v3983_v53 = vshll.u32 %v11063_v24, 16  ;;  %v3965_v33 = vrot.slane %v3963_v59, 5  ;;  %v7648_v46 = vrot.slane %v10937_v42, 9  ;;  %v11108_v6 = vld [vmem:[%s10907_s16 + $0x80] sm:$0xf] }
 0x26d   : >> { %8506 = vmatpush3.bf16.msra.mxu0 %v5598_v41  ;;  %v11082_v30 = vsel %vm9769_vm5, %v3939_v22, %v3943_v5  ;;  %v3953_v34 = vrot.slane %v3952_v54, 4  ;;  %v5252_v21 = vrot.slane %v10998_v18, 5  ;;  %v3971_v31 = vrot.slane %v3969_v45, 5  ;;  %v11091_v41 = vld [vmem:[%s10907_s16 + $0x7c] sm:$0x1] }
 0x26e   : >> { %v3976_v48 = vrot.slane %v3974_v43, 4  ;;  %v3979_v58 = vrot.slane %v3977_v9, 5  ;;  %9099 = vmatprep.subr.msk.bf16.mxu0 %vm640_vm2, %v7692_v1  ;;  %v3966_v56 = vor.u32 %v3965_v33, %v3962_v47  ;;  %v3985_v20 = vrot.slane %v3983_v53, 5  ;;  %v11114_v54 = vld [vmem:[%s10907_s16 + $0x84] sm:$0x1] }
 0x26f   : >> { %v11095_v5 = vsel %vm9769_vm5, %v3953_v34, %v3957_v13  ;;  %v11099_v42 = vsel %vm9912_vm9, %v7648_v46, %v5240_v32  ;;  %v7649_v51 = vrot.slane %v10945_v44, 9  ;;  %v7650_v40 = vrot.slane %v10960_v49, 9  ;;  %v11129_v53 = vld [vmem:[%s10907_s16 + $0x88] sm:$0xf]  ;;  %v11132_v34 = vld [vmem:[%s10907_s16 + $0x8c] sm:$0x1] }
 0x270   : >> { %12135 = vst [vmem:[#allocation26_spill] sm:$0xff] %v11095_v5  ;;  %12136 = vst [vmem:[#allocation27_spill] sm:$0xff] %v11099_v42  ;;  %v11103_v18 = vcombine.low %v11082_v30, %v11095_v5  ;;  %v3980_v4 = vor.u32 %v3979_v58, %v3976_v48  ;;  %v3967_v13 = vrot.slane %v3966_v56, 4  ;;  %v7651_v22 = vrot.slane %v10989_v12, 9  ;;  %v11146_v48 = vld [vmem:[%s10907_s16 + $0x90] sm:$0xf] }
 0x271   : >> { %v7557_v32 = vcombine.low %v10910_v2, %v10916_v61  ;;  %v7652_v47 = vrot.slane %v11086_v63, 9  ;;  %v11121_v45 = vsel %vm9912_vm9, %v7649_v51, %v5244_v62  ;;  %v11125_v43 = vsel %vm9912_vm9, %v7650_v40, %v5248_v36  ;;  %v11149_v58 = vld [vmem:[%s10907_s16 + $0x94] sm:$0x1] }
 0x272   : >> { %12137 = vst [vmem:[#allocation28_spill] sm:$0xff] %v11103_v18  ;;  %8371 = vmatprep.mubr.msk.bf16.mxu1 %vm627_vm6, %v11103_v18  ;;  %v3981_v59 = vrot.slane %v3980_v4, 4  ;;  %v5256_v9 = vrot.slane %v11091_v41, 5  ;;  %v11136_v33 = vsel %vm9769_vm5, %v3967_v13, %v3971_v31  ;;  %v7684_v46 = vcombine.low %v11099_v42, %v11121_v45 }
 0x273   : >> { %12138 = vst [vmem:[#allocation29_spill] sm:$0xff] %v11136_v33  ;;  %v11142_v62 = vsel %vm9912_vm9, %v7651_v22, %v5252_v21  ;;  %v7653_v36 = vrot.slane %v11108_v6, 9  ;;  %v5260_v21 = vrot.slane %v11114_v54, 5  ;;  %v7654_v40 = vrot.slane %v11129_v53, 9 }
 0x274   : >> { %v11153_v56 = vsel %vm9769_vm5, %v3981_v59, %v3985_v20  ;;  %v7685_v31 = vcombine.low %v11125_v43, %v11142_v62  ;;  %v11159_v4 = vsel %vm9912_vm9, %v7652_v47, %v5256_v9  ;;  %8507 = vmatprep.mubr.msk.bf16.mxu0 %vm627_vm6, %v7684_v46  ;;  %v5264_v20 = vrot.slane %v11132_v34, 5  ;;  %v7698_v46 = vld [vmem:[%s12029_s3 + $0x40] sm:$0xf] }
 0x275   : >> { %12139 = vst [vmem:[#allocation30_spill] sm:$0xff] %v11153_v56  ;;  %v11164_v51 = vcombine.low %v11136_v33, %v11153_v56  ;;  %v5682_v13 = vsel %vm640_vm2, %v7692_v1, 0  ;;  %v11172_v22 = vsel %vm9912_vm9, %v7653_v36, %v5260_v21  ;;  %v7682_v47 = vrot.slane %v11146_v48, 9 }
 0x276   : >> { %v5576_v59 = vrot.slane %v11149_v58, 5  ;;  %v7686_v9 = vcombine.low %v11159_v4, %v11172_v22  ;;  %v11188_v1 = vsel %vm9912_vm9, %v7654_v40, %v5264_v20  ;;  %v5083_v21 = vshrl.u32 %v11086_v63, 16 }
 0x277   : >> { %12140 = vst [vmem:[#allocation31_spill] sm:$0xff] %v11164_v51  ;;  %8372 = vmatmul.mubr.msk.bf16.gmra.mrb[4].mxu1 %vm627_vm6, %v11164_v51  ;;  %v5086_v29 = vshll.u32 %v11086_v63, 16  ;;  %v4253_v40 = vsel %vm640_vm2, %v11045_v8, 0  ;;  %v7567_v15 = vrot.slane %v10922_v60, 9  ;;  %v4204_v8 = vrot.slane %v10929_v11, 5 }
 0x278   : >> { %8508 = vmatmul.mubr.msk.bf16.vlgmr.msra.gmra.mrb[0].mxu0 %vm627_vm6, %v7685_v31  ;;  %8377 = vmatprep.mubr.msk.bf16.mxu1 %vm627_vm6, %v7557_v32  ;;  %v11192_v36 = vsel %vm9912_vm9, %v7682_v47, %v5576_v59  ;;  %v11199_v32 = vcombine.low %v10922_v60, %v10974_v55  ;;  %v4196_v31 = vrot.slane %v10913_v23, 5  ;;  %v4200_v47 = vrot.slane %v10919_v27, 5  ;;  %v7582_v11 = vld [vmem:[%s12029_s3 + $0xc] sm:$0xf] }
 0x279   : >> { %8516 = vmatpush3.bf16.msra.mxu0 %v5682_v13  ;;  %8511 = vmatprep.mubr.msk.bf16.mxu0 %vm627_vm6, %v7686_v9  ;;  %v7687_v20 = vcombine.low %v11188_v1, %v11192_v36  ;;  %v7565_v13 = vrot.slane %v10910_v2, 9  ;;  %v11210_v59 = vcombine.low %v11005_v25, %v11017_v57  ;;  %v11214_v9 = vcombine.low %v10945_v44, %v10960_v49 }
 0x27a   : >> { %9100 = vmatprep.subr.msk.bf16.mxu0 %vm640_vm2, %v7698_v46  ;;  %12141 = vst [vmem:[#allocation32_spill] sm:$0xff] %v11199_v32  ;;  %v7566_v23 = vrot.slane %v10916_v61, 9  ;;  %v7568_v42 = vrot.slane %v10974_v55, 9  ;;  %v5779_v2 = vsel %vm640_vm2, %v7698_v46, 0  ;;  %v4208_v27 = vrot.slane %v10980_v39, 5 }
 0x27b   : >> { %12142 = vst [vmem:[#allocation33_spill] sm:$0xff] %v11210_v59  ;;  %12143 = vst [vmem:[#allocation34_spill] sm:$0xff] %v11214_v9  ;;  %v11222_v14 = vrot.slane %v5083_v21, 4  ;;  %v11224_v51 = vrot.slane %v5086_v29, 5  ;;  %v11230_v44 = vcombine.low %v11029_v50, %v11060_v3  ;;  %v11238_v49 = vcombine.low %v10989_v12, %v11086_v63 }
 0x27c   : >> { %v4197_v29 = vsel %vm9912_vm9, %v7565_v13, %v4196_v31  ;;  %v5111_v39 = vshrl.u32 %v11129_v53, 16  ;;  %v5114_v46 = vshll.u32 %v11129_v53, 16  ;;  %v11250_v21 = vsel %vm9912_vm9, %v7566_v23, %v4200_v47 }
 0x27d   : >> { %v5120_v12 = vshll.u32 %v11132_v34, 16  ;;  %v5465_v63 = vshrl.u32 %v11146_v48, 16  ;;  %v5468_v31 = vshll.u32 %v11146_v48, 16  ;;  %v5474_v34 = vshll.u32 %v11149_v58, 16 }
 0x27e   : >> { %v5113_v13 = vrot.slane %v5111_v39, 4  ;;  %v5116_v18 = vrot.slane %v5114_v46, 5  ;;  %v7574_v17 = vcombine.low %v4197_v29, %v11250_v21  ;;  %v7570_v5 = vrot.slane %v11017_v57, 9 }
 0x27f   : >> { %8378 = vmatmul.mubr.msk.bf16.vlgmr.msra.gmra.mrb[0].mxu1 %vm627_vm6, %v11199_v32  ;;  %v5467_v47 = vrot.slane %v5465_v63, 4  ;;  %v5470_v23 = vrot.slane %v5468_v31, 5  ;;  %v4212_v32 = vrot.slane %v11010_v37, 5  ;;  %v5122_v33 = vrot.slane %v5120_v12, 5  ;;  %v7705_v37 = vld [vmem:[%s12029_s3 + $0x44] sm:$0xf] }
 0x280   : >> { %8386 = vmatpush3.bf16.msra.mxu1 %v4253_v40  ;;  %8512 = vmatmul.mubr.msk.bf16.gmra.mrb[4].mxu0 %vm627_vm6, %v7687_v20  ;;  %v5097_v40 = vshrl.u32 %v11108_v6, 16  ;;  %v5100_v20 = vshll.u32 %v11108_v6, 16  ;;  %v5117_v56 = vor.u32 %v5116_v18, %v5113_v13  ;;  %v5476_v46 = vrot.slane %v5474_v34, 5 }
 0x281   : >> { %8381 = vmatprep.mubr.msk.bf16.mxu1 %vm627_vm6, %v11210_v59  ;;  %8517 = vmatprep.mubr.msk.bf16.mxu0 %vm627_vm6, %v11214_v9  ;;  %v11260_v9 = vcombine.low %v11108_v6, %v11129_v53  ;;  %v7569_v59 = vrot.slane %v11005_v25, 9  ;;  %v5471_v39 = vor.u32 %v5470_v23, %v5467_v47  ;;  %v4216_v6 = vrot.slane %v11025_v19, 5 }
 0x282   : >> { %9086 = vmatprep.subr.msk.bf16.mxu1 %vm640_vm2, %v7582_v11  ;;  %v5099_v53 = vrot.slane %v5097_v40, 4  ;;  %v5102_v63 = vrot.slane %v5100_v20, 5  ;;  %v5118_v31 = vrot.slane %v5117_v56, 4  ;;  %v11270_v58 = vsel %vm9912_vm9, %v7567_v15, %v4204_v8 }
 0x283   : >> { %v5092_v29 = vshll.u32 %v11091_v41, 16  ;;  %v5472_v18 = vrot.slane %v5471_v39, 4  ;;  %v11280_v19 = vsel %vm9912_vm9, %v7568_v42, %v4208_v27  ;;  %v5089_v56 = vor.u32 %v11224_v51, %v11222_v14  ;;  %v11289_v41 = vld [vmem:[%s10907_s16 + $0x98] sm:$0xf] }
 0x284   : >> { %v4349_v15 = vsel %vm640_vm2, %v7582_v11, 0  ;;  %v11293_v8 = vsel %vm9912_vm9, %v7569_v59, %v4212_v32  ;;  %v11299_v14 = vsel %vm9769_vm5, %v5118_v31, %v5122_v33  ;;  %v5761_v51 = vshll.u32 %v11289_v41, 16 }
 0x285   : >> { %12144 = vst [vmem:[#allocation35_spill] sm:$0xff] %v11299_v14  ;;  %v11303_v42 = vsel %vm9769_vm5, %v5472_v18, %v5476_v46  ;;  %v11309_v32 = vsel %vm9912_vm9, %v7570_v5, %v4216_v6  ;;  %v5103_v59 = vor.u32 %v5102_v63, %v5099_v53  ;;  %v11317_v27 = vcombine.low %v10995_v38, %v11033_v28  ;;  %v11334_v46 = vld [vmem:[%s10907_s16 + $0x9c] sm:$0x1] }
 0x286   : >> { %12145 = vst [vmem:[#allocation36_spill] sm:$0xff] %v11303_v42  ;;  %v5094_v11 = vrot.slane %v5092_v29, 5  ;;  %v11321_v12 = vcombine.low %v11270_v58, %v11280_v19  ;;  %v7693_v5 = vcombine.low %v11146_v48, %v11289_v41  ;;  %v7571_v40 = vrot.slane %v11029_v50, 9 }
 0x287   : >> { %8382 = vmatmul.mubr.msk.bf16.gmra.mrb[4].mxu1 %vm627_vm6, %v11230_v44  ;;  %v7572_v20 = vrot.slane %v11060_v3, 9  ;;  %v4224_v13 = vrot.slane %v11063_v24, 5  ;;  %v5090_v47 = vrot.slane %v5089_v56, 4  ;;  %v11331_v38 = vcombine.low %v11293_v8, %v11309_v32 }
 0x288   : >> { %8518 = vmatmul.mubr.msk.bf16.vlgmr.msra.gmra.mrb[0].mxu0 %vm627_vm6, %v11238_v49  ;;  %8387 = vmatprep.mubr.msk.bf16.mxu1 %vm627_vm6, %v7574_v17  ;;  %v5758_v17 = vshrl.u32 %v11289_v41, 16  ;;  %v5763_v23 = vrot.slane %v5761_v51, 5  ;;  %v5104_v34 = vrot.slane %v5103_v59, 4  ;;  %v5767_v63 = vshll.u32 %v11334_v46, 16 }
 0x289   : >> { %8526 = vmatpush3.bf16.msra.mxu0 %v5779_v2  ;;  %8521 = vmatprep.mubr.msk.bf16.mxu0 %vm627_vm6, %v11260_v9  ;;  %v5106_v2 = vshll.u32 %v11114_v54, 16  ;;  %v4220_v54 = vrot.slane %v11052_v10, 5  ;;  %v7591_v10 = vld [vmem:[%s12029_s3 + $0x10] sm:$0xf]  ;;  %v11348_v48 = vsel %vm9912_vm9, %v7572_v20, %v4224_v13  ;;  %v11352_v6 = vsel %vm9769_vm5, %v5090_v47, %v5094_v11 }
 0x28a   : >> { %9101 = vmatprep.subr.msk.bf16.mxu0 %vm640_vm2, %v7705_v37  ;;  %v5760_v28 = vrot.slane %v5758_v17, 4  ;;  %12146 = vst [vmem:[#allocation37_spill] sm:$0xff] %v11352_v6  ;;  %v11370_v18 = vcombine.low %v11057_v26, %v11352_v6  ;;  %v7583_v56 = vcombine.low %v10916_v61, %v10922_v60  ;;  %v5769_v51 = vrot.slane %v5767_v63, 5  ;;  %v7711_v26 = vld [vmem:[%s12029_s3 + $0x48] sm:$0xf] }
 0x28b   : >> { %v5108_v39 = vrot.slane %v5106_v2, 5  ;;  %v11344_v24 = vsel %vm9912_vm9, %v7571_v40, %v4220_v54  ;;  %v5867_v59 = vsel %vm640_vm2, %v7705_v37, 0  ;;  %v7584_v60 = vcombine.low %v10974_v55, %v11005_v25  ;;  %v7601_v55 = vld [vmem:[%s12029_s3 + $0x14] sm:$0xf] }
 0x28c   : >> { %v5764_v53 = vor.u32 %v5763_v23, %v5760_v28  ;;  %v11366_v29 = vcombine.low %v11344_v24, %v11348_v48  ;;  %v4458_v2 = vsel %vm640_vm2, %v7591_v10, 0  ;;  %v7585_v11 = vcombine.low %v11017_v57, %v11029_v50 }
 0x28d   : >> { %v11362_v31 = vsel %vm9769_vm5, %v5104_v34, %v5108_v39  ;;  %v11403_v40 = vcombine.low %v11121_v45, %v11125_v43  ;;  %v11419_v45 = vld [vmem:[%s10907_s16 + $0x44] sm:$0x1]  ;;  %v11423_v43 = vcombine.low %v11142_v62, %v11159_v4  ;;  %v11427_v13 = vcombine.low %v11172_v22, %v11188_v1  ;;  %v11443_v62 = vld [vmem:[%s12029_s3 + $0x4c] sm:$0xf] }
 0x28e   : >> { %12147 = vst [vmem:[#allocation38_spill] sm:$0xff] %v11362_v31  ;;  %v5765_v17 = vrot.slane %v5764_v53, 4  ;;  %v7704_v47 = vrot.slane %v11289_v41, 9  ;;  %v5857_v28 = vrot.slane %v11334_v46, 5  ;;  %v5977_v23 = vsel %vm640_vm2, %v7711_v26, 0 }
 0x28f   : >> { %8388 = vmatmul.mubr.msk.bf16.vlgmr.msra.gmra.mrb[0].mxu1 %vm627_vm6, %v11321_v12  ;;  %12149 = vst [vmem:[#allocation40_spill] sm:$0xff] %v11403_v40  ;;  %12150 = vst [vmem:[#allocation41_spill] sm:$0xff] %v11423_v43  ;;  %v4434_v39 = vshll.u32 %v11419_v45, 16  ;;  %v12152_v46 = vcombine.low %v10950_v52, %v10954_v0  ;;  %v7593_v63 = vcombine.low %v11022_v7, %v11082_v30  ;;  %v11464_v52 = vld [vmem:[%s10907_s16 + $0xa4] sm:$0x1]  ;;  %v12154_v7 = vld [vmem:[#allocation26_spill] sm:$0xff] }
 0x290   : >> { %8396 = vmatpush3.bf16.msra.mxu1 %v4349_v15  ;;  %8522 = vmatmul.mubr.msk.bf16.gmra.mrb[4].mxu0 %vm627_vm6, %v7693_v5  ;;  %v11376_v15 = vcombine.low %v11362_v31, %v11299_v14  ;;  %v5770_v61 = vsel %vm9769_vm5, %v5765_v17, %v5769_v51  ;;  %v11399_v5 = vld [vmem:[%s10907_s16 + $0x40] sm:$0xf]  ;;  %12151 = vst [vmem:[#allocation42_spill] sm:$0xff] %v11427_v13  ;;  %v6191_v33 = vsel %vm640_vm2, %v11443_v62, 0  ;;  %v11555_v14 = vld [vmem:[%s10907_s16 + $0xcc] sm:$0x1] }
 0x291   : >> { %8391 = vmatprep.mubr.msk.bf16.mxu1 %vm627_vm6, %v11331_v38  ;;  %8527 = vmatprep.mubr.msk.bf16.mxu0 %vm627_vm6, %v11317_v27  ;;  %v7699_v37 = vcombine.low %v11303_v42, %v5770_v61  ;;  %v4425_v54 = vshrl.u32 %v11399_v5, 16  ;;  %v4428_v20 = vshll.u32 %v11399_v5, 16  ;;  %v7586_v50 = vcombine.low %v11060_v3, %v11399_v5  ;;  %v11434_v3 = vld [vmem:[%s10907_s16 + $0xa0] sm:$0xf]  ;;  %v11552_v42 = vld [vmem:[%s10907_s16 + $0xc4] sm:$0x1] }
 0x292   : >> { %9087 = vmatprep.subr.msk.bf16.mxu1 %vm640_vm2, %v7591_v10  ;;  %12148 = vst [vmem:[#allocation39_spill] sm:$0xff] %v11376_v15  ;;  %v11437_v10 = vld [vmem:[%s10907_s16 + $0xa8] sm:$0xf]  ;;  %v6053_v4 = vshrl.u32 %v11434_v3, 16  ;;  %v6056_v22 = vshll.u32 %v11434_v3, 16  ;;  %v5858_v53 = vsel %vm9912_vm9, %v7704_v47, %v5857_v28  ;;  %v4436_v17 = vrot.slane %v4434_v39, 5 }
 0x293   : >> { %v4427_v25 = vrot.slane %v4425_v54, 4  ;;  %v4430_v57 = vrot.slane %v4428_v20, 5  ;;  %v6067_v1 = vshrl.u32 %v11437_v10, 16  ;;  %v6070_v41 = vshll.u32 %v11437_v10, 16  ;;  %v11477_v20 = vld [vmem:[%s10907_s16 + $0xb0] sm:$0xf] }
 0x294   : >> { %v6055_v0 = vrot.slane %v6053_v4, 4  ;;  %v6058_v51 = vrot.slane %v6056_v22, 5  ;;  %v7706_v61 = vcombine.low %v11192_v36, %v5858_v53  ;;  %v6062_v54 = vshll.u32 %v11464_v52, 16  ;;  %v11512_v53 = vld [vmem:[%s10907_s16 + $0xd0] sm:$0xf] }
 0x295   : >> { %v4431_v34 = vor.u32 %v4430_v57, %v4427_v25  ;;  %v11480_v25 = vld [vmem:[%s10907_s16 + $0xb8] sm:$0xf]  ;;  %v6081_v28 = vshrl.u32 %v11477_v20, 16  ;;  %v7602_v22 = vcombine.low %v11250_v21, %v11270_v58 }
 0x296   : >> { %v6059_v57 = vor.u32 %v6058_v51, %v6055_v0  ;;  %v6098_v39 = vshll.u32 %v11480_v25, 16  ;;  %v11500_v4 = vcombine.low %v11477_v20, %v11480_v25  ;;  %v12156_v21 = vld [vmem:[#allocation30_spill] sm:$0xff] }
 0x297   : >> { %8392 = vmatmul.mubr.msk.bf16.gmra.mrb[4].mxu1 %vm627_vm6, %v11366_v29  ;;  %v11521_v51 = vld [vmem:[%s10907_s16 + $0xd8] sm:$0xf] }
 0x298   : >> { %8528 = vmatmul.mubr.msk.bf16.vlgmr.msra.gmra.mrb[0].mxu0 %vm627_vm6, %v11370_v18  ;;  %8397 = vmatprep.mubr.msk.bf16.mxu1 %vm627_vm6, %v7583_v56  ;;  %v4432_v56 = vrot.slane %v4431_v34, 4  ;;  %v6095_v34 = vshrl.u32 %v11480_v25, 16 }
 0x299   : >> { %8536 = vmatpush3.bf16.msra.mxu0 %v5867_v59  ;;  %8531 = vmatprep.mubr.msk.bf16.mxu0 %vm627_vm6, %v11376_v15  ;;  %v6069_v59 = vrot.slane %v6067_v1, 4  ;;  %v11505_v1 = vld [vmem:[%s10907_s16 + $0xc0] sm:$0xf] }
 0x29a   : >> { %9102 = vmatprep.subr.msk.bf16.mxu0 %vm640_vm2, %v7711_v26  ;;  %v6072_v26 = vrot.slane %v6070_v41, 5  ;;  %v11485_v36 = vsel %vm9769_vm5, %v4432_v56, %v4436_v17  ;;  %v11508_v41 = vld [vmem:[%s10907_s16 + $0xc8] sm:$0xf]  ;;  %v6112_v56 = vshll.u32 %v11505_v1, 16 }
 0x29b   : >> { %v6123_v17 = vshrl.u32 %v11508_v41, 16  ;;  %v6126_v0 = vshll.u32 %v11508_v41, 16  ;;  %v7595_v58 = vcombine.low %v12156_v21, %v11485_v36  ;;  %v11532_v21 = vcombine.low %v11505_v1, %v11508_v41 }
 0x29d   : >> { %12157 = vst [vmem:[#allocation26_spill] sm:$0xff] %v11532_v21 }
 0x29f   : >> { %8398 = vmatmul.mubr.msk.bf16.vlgmr.msra.gmra.mrb[0].mxu1 %vm627_vm6, %v7584_v60  ;;  %v11468_v60 = vld [vmem:[%s10907_s16 + $0xac] sm:$0x1] }
 0x2a0   : >> { %8406 = vmatpush3.bf16.msra.mxu1 %v4458_v2  ;;  %8532 = vmatmul.mubr.msk.bf16.gmra.mrb[4].mxu0 %vm627_vm6, %v7699_v37  ;;  %v4558_v37 = vsel %vm640_vm2, %v7601_v55, 0  ;;  %v12153_v2 = vld [vmem:[#allocation29_spill] sm:$0xff]  ;;  %v6076_v47 = vshll.u32 %v11468_v60, 16 }
 0x2a1   : >> { %8401 = vmatprep.mubr.msk.bf16.mxu1 %vm627_vm6, %v7585_v11  ;;  %8537 = vmatprep.mubr.msk.bf16.mxu0 %vm627_vm6, %v11403_v40  ;;  %v7594_v30 = vcombine.low %v12154_v7, %v12153_v2  ;;  %v7712_v11 = vcombine.low %v11434_v3, %v11437_v10  ;;  %12155 = vst [vmem:[#allocation29_spill] sm:$0xff] %v11500_v4  ;;  %v6083_v2 = vrot.slane %v6081_v28, 4  ;;  %v6114_v28 = vrot.slane %v6112_v56, 5 }
 0x2a2   : >> { %9088 = vmatprep.subr.msk.bf16.mxu1 %vm640_vm2, %v7601_v55  ;;  %v7610_v55 = vld [vmem:[%s12029_s3 + $0x18] sm:$0xf] }
 0x2a7   : >> { %8402 = vmatmul.mubr.msk.bf16.gmra.mrb[4].mxu1 %vm627_vm6, %v7586_v50  ;;  %v6073_v50 = vor.u32 %v6072_v26, %v6069_v59  ;;  %v6060_v59 = vrot.slane %v6059_v57, 4  ;;  %v11535_v57 = vld [vmem:[%s10907_s16 + $0xbc] sm:$0x1] }
 0x2a8   : >> { %8538 = vmatmul.mubr.msk.bf16.vlgmr.msra.gmra.mrb[0].mxu0 %vm627_vm6, %v11423_v43  ;;  %8407 = vmatprep.mubr.msk.bf16.mxu1 %vm627_vm6, %v12152_v46  ;;  %v6064_v46 = vrot.slane %v6062_v54, 5  ;;  %v7603_v54 = vcombine.low %v11280_v19, %v11293_v8  ;;  %v4642_v19 = vsel %vm640_vm2, %v7610_v55, 0  ;;  %v11546_v8 = vcombine.low %v11512_v53, %v11521_v51 }
 0x2a9   : >> { %8546 = vmatpush3.bf16.msra.mxu0 %v5977_v23  ;;  %8541 = vmatprep.mubr.msk.bf16.mxu0 %vm627_vm6, %v11427_v13  ;;  %v6084_v23 = vshll.u32 %v11477_v20, 16  ;;  %v6074_v26 = vrot.slane %v6073_v50, 4  ;;  %v11540_v50 = vld [vmem:[%s12029_s3 + $0x50] sm:$0xf] }
 0x2aa   : >> { %9103 = vmatprep.subr.msk.bf16.mxu0 %vm640_vm2, %v11443_v62  ;;  %v6065_v62 = vsel %vm9769_vm5, %v6060_v59, %v6064_v46  ;;  %v6137_v46 = vshrl.u32 %v11512_v53, 16 }
 0x2ab   : >> { %v6086_v7 = vrot.slane %v6084_v23, 5  ;;  %v6125_v23 = vrot.slane %v6123_v17, 4  ;;  %v6104_v17 = vshll.u32 %v11535_v57, 16 }
 0x2ad   : >> { %v6106_v43 = vrot.slane %v6104_v17, 5 }
 0x2af   : >> { %8408 = vmatmul.mubr.msk.bf16.vlgmr.msra.gmra.mrb[0].mxu1 %vm627_vm6, %v7593_v63  ;;  %v6109_v63 = vshrl.u32 %v11505_v1, 16 }
 0x2b0   : >> { %8416 = vmatpush3.bf16.msra.mxu1 %v4558_v37  ;;  %8542 = vmatmul.mubr.msk.bf16.gmra.mrb[4].mxu0 %vm627_vm6, %v7706_v61  ;;  %v6078_v61 = vrot.slane %v6076_v47, 5  ;;  %v11524_v37 = vld [vmem:[%s10907_s16 + $0xb4] sm:$0x1] }
 0x2b1   : >> { %8411 = vmatprep.mubr.msk.bf16.mxu1 %vm627_vm6, %v7594_v30  ;;  %8547 = vmatprep.mubr.msk.bf16.mxu0 %vm627_vm6, %v7712_v11  ;;  %v6097_v30 = vrot.slane %v6095_v34, 4  ;;  %v6100_v11 = vrot.slane %v6098_v39, 5  ;;  %v6111_v47 = vrot.slane %v6109_v63, 4  ;;  %v6128_v34 = vrot.slane %v6126_v0, 5 }
 0x2b2   : >> { %9089 = vmatprep.subr.msk.bf16.mxu1 %vm640_vm2, %v7610_v55  ;;  %v6090_v39 = vshll.u32 %v11524_v37, 16  ;;  %v11562_v55 = vsel %vm9769_vm5, %v6074_v26, %v6078_v61  ;;  %v6087_v63 = vor.u32 %v6086_v7, %v6083_v2  ;;  %v6140_v0 = vshll.u32 %v11512_v53, 16 }
 0x2b3   : >> { %v6101_v56 = vor.u32 %v6100_v11, %v6097_v30  ;;  %v6115_v59 = vor.u32 %v6114_v28, %v6111_v47  ;;  %v6118_v26 = vshll.u32 %v11552_v42, 16  ;;  %v6129_v61 = vor.u32 %v6128_v34, %v6125_v23  ;;  %v11581_v47 = vld [vmem:[%s10907_s16 + $0xd4] sm:$0x1] }
 0x2b4   : >> { %v7604_v2 = vcombine.low %v11309_v32, %v11344_v24  ;;  %v7600_v7 = vrot.slane %v11399_v5, 9  ;;  %v4536_v30 = vrot.slane %v11419_v45, 5  ;;  %v6092_v11 = vrot.slane %v6090_v39, 5  ;;  %v7616_v45 = vld [vmem:[%s12029_s3 + $0x1c] sm:$0xf] }
 0x2b5   : >> { %v7721_v6 = vcombine.low %v6065_v62, %v11562_v55  ;;  %v6088_v31 = vrot.slane %v6087_v63, 4  ;;  %v6102_v13 = vrot.slane %v6101_v56, 4  ;;  %v6139_v28 = vrot.slane %v6137_v46, 4 }
 0x2b6   : >> { %v6142_v23 = vrot.slane %v6140_v0, 5  ;;  %v6120_v15 = vrot.slane %v6118_v26, 5  ;;  %v6130_v32 = vrot.slane %v6129_v61, 4  ;;  %v11594_v62 = vsel %vm9912_vm9, %v7600_v7, %v4536_v30  ;;  %v7746_v26 = vld [vmem:[%s12029_s3 + $0x54] sm:$0xf]  ;;  %v12158_v61 = vld [vmem:[#allocation32_spill] sm:$0xff] }
 0x2b7   : >> { %8412 = vmatmul.mubr.msk.bf16.gmra.mrb[4].mxu1 %vm627_vm6, %v7595_v58  ;;  %v6151_v58 = vshrl.u32 %v11521_v51, 16  ;;  %v11598_v39 = vsel %vm9769_vm5, %v6088_v31, %v6092_v11  ;;  %v6146_v63 = vshll.u32 %v11581_v47, 16  ;;  %v7731_v30 = vrot.slane %v11477_v20, 9 }
 0x2b8   : >> { %8548 = vmatmul.mubr.msk.bf16.vlgmr.msra.gmra.mrb[0].mxu0 %vm627_vm6, %v11500_v4  ;;  %8417 = vmatprep.mubr.msk.bf16.mxu1 %vm627_vm6, %v7602_v22  ;;  %v6154_v22 = vshll.u32 %v11521_v51, 16  ;;  %v11584_v4 = vld [vmem:[%s10907_s16 + $0xdc] sm:$0x1] }
 0x2b9   : >> { %8556 = vmatpush3.bf16.msra.mxu0 %v6191_v33  ;;  %8551 = vmatprep.mubr.msk.bf16.mxu0 %vm627_vm6, %v11532_v21  ;;  %v6132_v33 = vshll.u32 %v11555_v14, 16  ;;  %v6153_v34 = vrot.slane %v6151_v58, 4  ;;  %v6116_v21 = vrot.slane %v6115_v59, 4  ;;  %v6160_v17 = vshll.u32 %v11584_v4, 16 }
 0x2ba   : >> { %9104 = vmatprep.subr.msk.bf16.mxu0 %vm640_vm2, %v11540_v50  ;;  %v6156_v40 = vrot.slane %v6154_v22, 5  ;;  %v7729_v22 = vrot.slane %v11434_v3, 9  ;;  %v6276_v59 = vrot.slane %v11464_v52, 5 }
 0x2bb   : >> { %v6134_v24 = vrot.slane %v6132_v33, 5  ;;  %v11611_v31 = vsel %vm9769_vm5, %v6116_v21, %v6120_v15  ;;  %v6162_v58 = vrot.slane %v6160_v17, 5 }
 0x2bc   : >> { %v6157_v56 = vor.u32 %v6156_v40, %v6153_v34  ;;  %v6288_v34 = vrot.slane %v11535_v57, 5 }
 0x2bd   : >> { %v11615_v46 = vsel %vm9769_vm5, %v6130_v32, %v6134_v24  ;;  %v7733_v32 = vrot.slane %v11505_v1, 9  ;;  %v6292_v24 = vrot.slane %v11552_v42, 5 }
 0x2be   : >> { %v11627_v0 = vcombine.low %v11611_v31, %v11615_v46  ;;  %v6158_v21 = vrot.slane %v6157_v56, 4  ;;  %v11675_v56 = vld [vmem:[%s10907_s16 + $0x48] sm:$0xf] }
 0x2bf   : >> { %8418 = vmatmul.mubr.msk.bf16.vlgmr.msra.gmra.mrb[0].mxu1 %vm627_vm6, %v7603_v54  ;;  %v11605_v54 = vsel %vm9769_vm5, %v6102_v13, %v6106_v43  ;;  %v6333_v43 = vsel %vm640_vm2, %v11540_v50, 0  ;;  %v6148_v13 = vrot.slane %v6146_v63, 5  ;;  %v6280_v50 = vrot.slane %v11468_v60, 5 }
 0x2c0   : >> { %8426 = vmatpush3.bf16.msra.mxu1 %v4642_v19  ;;  %8552 = vmatmul.mubr.msk.bf16.gmra.mrb[4].mxu0 %vm627_vm6, %v11546_v8  ;;  %v6143_v19 = vor.u32 %v6142_v23, %v6139_v28  ;;  %v11623_v40 = vcombine.low %v11598_v39, %v11605_v54  ;;  %v11649_v52 = vsel %vm9769_vm5, %v6158_v21, %v6162_v58  ;;  %v6284_v28 = vrot.slane %v11524_v37, 5  ;;  %v7623_v37 = vld [vmem:[%s12029_s3 + $0x20] sm:$0xf] }
 0x2c1   : >> { %8421 = vmatprep.mubr.msk.bf16.mxu1 %vm627_vm6, %v7604_v2  ;;  %8557 = vmatprep.mubr.msk.bf16.mxu0 %vm627_vm6, %v7721_v6  ;;  %v7605_v6 = vcombine.low %v11348_v48, %v11594_v62  ;;  %v7730_v48 = vrot.slane %v11437_v10, 9  ;;  %v6277_v60 = vsel %vm9912_vm9, %v7729_v22, %v6276_v59  ;;  %v4739_v2 = vsel %vm640_vm2, %v7616_v45, 0 }
 0x2c2   : >> { %9090 = vmatprep.subr.msk.bf16.mxu1 %vm640_vm2, %v7616_v45  ;;  %v6144_v15 = vrot.slane %v6143_v19, 4  ;;  %v7732_v23 = vrot.slane %v11480_v25, 9  ;;  %v7734_v45 = vrot.slane %v11508_v41, 9  ;;  %v6296_v63 = vrot.slane %v11555_v14, 5  ;;  %v12159_v19 = vld [vmem:[#allocation33_spill] sm:$0xff] }
 0x2c3   : >> { %v11655_v33 = vsel %vm9912_vm9, %v7730_v48, %v6280_v50  ;;  %v4718_v57 = vshrl.u32 %v11675_v56, 16  ;;  %v4721_v42 = vshll.u32 %v11675_v56, 16  ;;  %v11689_v14 = vsel %vm9912_vm9, %v7731_v30, %v6284_v28 }
 0x2c4   : >> { %v11645_v3 = vsel %vm9769_vm5, %v6144_v15, %v6148_v13  ;;  %v7738_v11 = vcombine.low %v6277_v60, %v11655_v33  ;;  %v11693_v17 = vsel %vm9912_vm9, %v7732_v23, %v6288_v34  ;;  %v7735_v15 = vrot.slane %v11512_v53, 9  ;;  %v7755_v60 = vld [vmem:[%s12029_s3 + $0x58] sm:$0xf] }
 0x2c5   : >> { %v11661_v7 = vcombine.low %v11645_v3, %v11649_v52  ;;  %v11708_v13 = vcombine.low %v11689_v14, %v11693_v17  ;;  %v4720_v21 = vrot.slane %v4718_v57, 4  ;;  %v4723_v58 = vrot.slane %v4721_v42, 5  ;;  %v7765_v42 = vld [vmem:[%s12029_s3 + $0x5c] sm:$0xf] }
 0x2c6   : >> { %v6300_v59 = vrot.slane %v11581_v47, 5  ;;  %v7736_v48 = vrot.slane %v11521_v51, 9  ;;  %v6304_v50 = vrot.slane %v11584_v4, 5  ;;  %v4827_v34 = vsel %vm640_vm2, %v7623_v37, 0 }
 0x2c7   : >> { %8422 = vmatmul.mubr.msk.bf16.gmra.mrb[4].mxu1 %vm627_vm6, %v7605_v6  ;;  %v11698_v6 = vsel %vm9912_vm9, %v7733_v32, %v6292_v24  ;;  %v4724_v47 = vor.u32 %v4723_v58, %v4720_v21  ;;  %v7747_v32 = vcombine.low %v11437_v10, %v11477_v20  ;;  %v12161_v24 = vld [vmem:[#allocation28_spill] sm:$0xff]  ;;  %v7748_v20 = vcombine.low %v11480_v25, %v11505_v1 }
 0x2c8   : >> { %8558 = vmatmul.mubr.msk.bf16.vlgmr.msra.gmra.mrb[0].mxu0 %vm627_vm6, %v11623_v40  ;;  %8427 = vmatprep.mubr.msk.bf16.mxu1 %vm627_vm6, %v12158_v61  ;;  %v3830_v61 = vld [vmem:[%s10907_s16 + $0x4c] sm:$0x1]  ;;  %v11732_v4 = vsel %vm9912_vm9, %v7735_v15, %v6300_v59  ;;  %v6538_v57 = vsel %vm640_vm2, %v7755_v60, 0  ;;  %v3868_v59 = vld [vmem:[%s10907_s16 + $0xe4] sm:$0x1] }
 0x2c9   : >> { %8566 = vmatpush3.bf16.msra.mxu0 %v6333_v43  ;;  %8561 = vmatprep.mubr.msk.bf16.mxu0 %vm627_vm6, %v11627_v0  ;;  %v7611_v43 = vcombine.low %v11399_v5, %v11675_v56  ;;  %v6429_v5 = vsel %vm640_vm2, %v7746_v26, 0  ;;  %v4727_v30 = vshll.u32 %v3830_v61, 16  ;;  %v4725_v28 = vrot.slane %v4724_v47, 4 }
 0x2ca   : >> { %9105 = vmatprep.subr.msk.bf16.mxu0 %vm640_vm2, %v7746_v26  ;;  %v11736_v26 = vsel %vm9912_vm9, %v7736_v48, %v6304_v50  ;;  %v11787_v48 = vld [vmem:[%s10907_s16 + $0x50] sm:$0xf]  ;;  %v6514_v50 = vshll.u32 %v3868_v59, 16 }
 0x2cb   : >> { %v4729_v23 = vrot.slane %v4727_v30, 5 }
 0x2cf   : >> { %8428 = vmatmul.mubr.msk.bf16.vlgmr.msra.gmra.mrb[0].mxu1 %vm627_vm6, %v12159_v19  ;;  %v12162_v19 = vld [vmem:[#allocation31_spill] sm:$0xff] }
 0x2d0   : >> { %8436 = vmatpush3.bf16.msra.mxu1 %v4739_v2  ;;  %8562 = vmatmul.mubr.msk.bf16.gmra.mrb[4].mxu0 %vm627_vm6, %v11661_v7  ;;  %v12160_v2 = vld [vmem:[#allocation25_spill] sm:$0xff] }
 0x2d1   : >> { %8431 = vmatprep.mubr.msk.bf16.mxu1 %vm627_vm6, %v11230_v44  ;;  %8567 = vmatprep.mubr.msk.bf16.mxu0 %vm627_vm6, %v7738_v11  ;;  %v11702_v44 = vsel %vm9912_vm9, %v7734_v45, %v6296_v63  ;;  %v11741_v11 = vcombine.low %v11732_v4, %v11736_v26  ;;  %v7629_v45 = vld [vmem:[%s12029_s3 + $0x24] sm:$0xf]  ;;  %v4730_v63 = vsel %vm9769_vm5, %v4725_v28, %v4729_v23  ;;  %v6516_v23 = vrot.slane %v6514_v50, 5  ;;  %v12169_v50 = vld [vmem:[#allocation40_spill] sm:$0xff] }
 0x2d2   : >> { %9091 = vmatprep.subr.msk.bf16.mxu1 %vm640_vm2, %v7623_v37  ;;  %v11713_v22 = vcombine.low %v11698_v6, %v11702_v44  ;;  %v7617_v10 = vcombine.low %v11485_v36, %v4730_v63  ;;  %v7749_v37 = vcombine.low %v11508_v41, %v11512_v53  ;;  %v11773_v36 = vld [vmem:[%s10907_s16 + $0xe0] sm:$0xf]  ;;  %v7622_v53 = vrot.slane %v11675_v56, 9 }
 0x2d3   : >> { %v6505_v25 = vshrl.u32 %v11773_v36, 16  ;;  %v6508_v1 = vshll.u32 %v11773_v36, 16  ;;  %v7750_v41 = vcombine.low %v11521_v51, %v11773_v36  ;;  %v4937_v15 = vsel %vm640_vm2, %v7629_v45, 0  ;;  %v7638_v51 = vld [vmem:[%s12029_s3 + $0x28] sm:$0xf] }
 0x2d4   : >> { %v5013_v56 = vshrl.u32 %v11787_v48, 16  ;;  %v5151_v63 = vsel %vm640_vm2, %v7638_v51, 0 }
 0x2d5   : >> { %v6507_v21 = vrot.slane %v6505_v25, 4  ;;  %v6510_v58 = vrot.slane %v6508_v1, 5  ;;  %v6616_v25 = vrot.slane %v3868_v59, 5 }
 0x2d7   : >> { %8432 = vmatmul.mubr.msk.bf16.gmra.mrb[4].mxu1 %vm627_vm6, %v7611_v43  ;;  %v4817_v43 = vrot.slane %v3830_v61, 5 }
 0x2d8   : >> { %8568 = vmatmul.mubr.msk.bf16.vlgmr.msra.gmra.mrb[0].mxu0 %vm627_vm6, %v11708_v13  ;;  %8437 = vmatprep.mubr.msk.bf16.mxu1 %vm627_vm6, %v12160_v2  ;;  %v11807_v2 = vld [vmem:[%s10907_s16 + $0x58] sm:$0xf] }
 0x2d9   : >> { %8576 = vmatpush3.bf16.msra.mxu0 %v6429_v5  ;;  %8571 = vmatprep.mubr.msk.bf16.mxu0 %vm627_vm6, %v11713_v22  ;;  %v5015_v5 = vrot.slane %v5013_v56, 4  ;;  %v7630_v47 = vcombine.low %v11787_v48, %v11807_v2 }
 0x2da   : >> { %9106 = vmatprep.subr.msk.bf16.mxu0 %vm640_vm2, %v7755_v60  ;;  %v7757_v60 = vcombine.low %v11605_v54, %v11611_v31 }
 0x2df   : >> { %8438 = vmatmul.mubr.msk.bf16.vlgmr.msra.gmra.mrb[0].mxu1 %vm627_vm6, %v12161_v24 }
 0x2e0   : >> { %8446 = vmatpush3.bf16.msra.mxu1 %v4827_v34  ;;  %8572 = vmatmul.mubr.msk.bf16.gmra.mrb[4].mxu0 %vm627_vm6, %v11741_v11  ;;  %v3832_v34 = vld [vmem:[%s10907_s16 + $0x54] sm:$0x1] }
 0x2e1   : >> { %8441 = vmatprep.mubr.msk.bf16.mxu1 %vm627_vm6, %v12162_v19  ;;  %8577 = vmatprep.mubr.msk.bf16.mxu0 %vm627_vm6, %v7747_v32  ;;  %v6638_v32 = vsel %vm640_vm2, %v7765_v42, 0  ;;  %v5022_v31 = vshll.u32 %v3832_v34, 16  ;;  %v7766_v19 = vcombine.low %v11655_v33, %v11689_v14  ;;  %v12164_v33 = vld [vmem:[#allocation24_spill] sm:$0xff] }
 0x2e2   : >> { %9092 = vmatprep.subr.msk.bf16.mxu1 %vm640_vm2, %v7629_v45 }
 0x2e3   : >> { %v5024_v45 = vrot.slane %v5022_v31, 5  ;;  %v9206_v31 = vld [vmem:[%s10907_s16 + $0x80] sm:$0xf] }
 0x2e7   : >> { %8442 = vmatmul.mubr.msk.bf16.gmra.mrb[4].mxu1 %vm627_vm6, %v7617_v10  ;;  %v12163_v10 = vld [vmem:[#allocation34_spill] sm:$0xff] }
 0x2e8   : >> { %8578 = vmatmul.mubr.msk.bf16.vlgmr.msra.gmra.mrb[0].mxu0 %vm627_vm6, %v7748_v20  ;;  %8447 = vmatprep.mubr.msk.bf16.mxu1 %vm627_vm6, %v11321_v12  ;;  %v7756_v12 = vcombine.low %v11562_v55, %v11598_v39  ;;  %v4818_v55 = vsel %vm9912_vm9, %v7622_v53, %v4817_v43  ;;  %v5016_v39 = vshll.u32 %v11787_v48, 16  ;;  %v7655_v20 = vld [vmem:[%s12029_s3 + $0x2c] sm:$0xf]  ;;  %v12166_v43 = vld [vmem:[#allocation27_spill] sm:$0xff] }
 0x2e9   : >> { %8586 = vmatpush3.bf16.msra.mxu0 %v6538_v57  ;;  %8581 = vmatprep.mubr.msk.bf16.mxu0 %vm627_vm6, %v7749_v37  ;;  %v7624_v61 = vcombine.low %v11594_v62, %v4818_v55  ;;  %v7774_v62 = vld [vmem:[%s12029_s3 + $0x60] sm:$0xf]  ;;  %v7767_v37 = vcombine.low %v11693_v17, %v11698_v6  ;;  %v7768_v57 = vcombine.low %v11702_v44, %v11732_v4  ;;  %v5293_v6 = vsel %vm640_vm2, %v7655_v20, 0 }
 0x2ea   : >> { %9107 = vmatprep.subr.msk.bf16.mxu0 %vm640_vm2, %v7765_v42  ;;  %v5018_v30 = vrot.slane %v5016_v39, 5  ;;  %v7764_v42 = vrot.slane %v11773_v36, 9  ;;  %v6722_v1 = vsel %vm640_vm2, %v7774_v62, 0  ;;  %v7647_v44 = vrot.slane %v11787_v48, 9 }
 0x2eb   : >> { %v5236_v4 = vrot.slane %v3832_v34, 5  ;;  %v9204_v34 = vld [vmem:[%s10907_s16 + $0x70] sm:$0xf] }
 0x2ec   : >> { %v5019_v54 = vor.u32 %v5018_v30, %v5015_v5  ;;  %v11861_v17 = vsel %vm9912_vm9, %v7764_v42, %v6616_v25  ;;  %v9201_v5 = vld [vmem:[%s12029_s3 + $0x34] sm:$0xf] }
 0x2ed   : >> { %v5237_v53 = vsel %vm9912_vm9, %v7647_v44, %v5236_v4 }
 0x2ee   : >> { %v5020_v24 = vrot.slane %v5019_v54, 4  ;;  %v9205_v54 = vld [vmem:[%s10907_s16 + $0x78] sm:$0xf] }
 0x2ef   : >> { %8448 = vmatmul.mubr.msk.bf16.vlgmr.msra.gmra.mrb[0].mxu1 %vm627_vm6, %v11331_v38  ;;  %v6511_v38 = vor.u32 %v6510_v58, %v6507_v21  ;;  %v12168_v21 = vld [vmem:[#allocation26_spill] sm:$0xff]  ;;  %v3869_v58 = vld [vmem:[%s10907_s16 + $0xe8] sm:$0xf] }
 0x2f0   : >> { %8456 = vmatpush3.bf16.msra.mxu1 %v4937_v15  ;;  %8582 = vmatmul.mubr.msk.bf16.gmra.mrb[4].mxu0 %vm627_vm6, %v7750_v41  ;;  %v7664_v41 = vld [vmem:[%s12029_s3 + $0x30] sm:$0xf]  ;;  %v6798_v59 = vshrl.u32 %v3869_v58, 16  ;;  %v6801_v48 = vshll.u32 %v3869_v58, 16 }
 0x2f1   : >> { %8451 = vmatprep.mubr.msk.bf16.mxu1 %vm627_vm6, %v11366_v29  ;;  %8587 = vmatprep.mubr.msk.bf16.mxu0 %vm627_vm6, %v7756_v12  ;;  %v7758_v29 = vcombine.low %v11615_v46, %v11645_v3  ;;  %v6512_v28 = vrot.slane %v6511_v38, 4  ;;  %v12167_v12 = vld [vmem:[#allocation39_spill] sm:$0xff]  ;;  %v5389_v56 = vsel %vm640_vm2, %v7664_v41, 0  ;;  %v3870_v38 = vld [vmem:[%s10907_s16 + $0xec] sm:$0x1] }
 0x2f2   : >> { %9093 = vmatprep.subr.msk.bf16.mxu1 %vm640_vm2, %v7638_v51  ;;  %v7775_v51 = vcombine.low %v11773_v36, %v3869_v58  ;;  %v6800_v55 = vrot.slane %v6798_v59, 4  ;;  %v6803_v39 = vrot.slane %v6801_v48, 5  ;;  %v6807_v36 = vshll.u32 %v3870_v38, 16 }
 0x2f3   : >> { %v11824_v46 = vsel %vm9769_vm5, %v6512_v28, %v6516_v23  ;;  %v9203_v23 = vld [vmem:[%s10907_s16 + $0x68] sm:$0xf] }
 0x2f4   : >> { %v7759_v3 = vcombine.low %v11649_v52, %v11824_v46  ;;  %v5025_v52 = vsel %vm9769_vm5, %v5020_v24, %v5024_v45  ;;  %v9208_v24 = vld [vmem:[%s10907_s16 + $0x90] sm:$0xf] }
 0x2f5   : >> { %v7639_v14 = vcombine.low %v5025_v52, %v12164_v33  ;;  %v12175_v33 = vld [vmem:[#allocation35_spill] sm:$0xff] }
 0x2f7   : >> { %8452 = vmatmul.mubr.msk.bf16.gmra.mrb[4].mxu1 %vm627_vm6, %v7624_v61  ;;  %v12170_v61 = vld [vmem:[#allocation41_spill] sm:$0xff] }
 0x2f8   : >> { %8588 = vmatmul.mubr.msk.bf16.vlgmr.msra.gmra.mrb[0].mxu0 %vm627_vm6, %v7757_v60  ;;  %8457 = vmatprep.mubr.msk.bf16.mxu1 %vm627_vm6, %v7630_v47  ;;  %v9202_v60 = vld [vmem:[%s10907_s16 + $0x60] sm:$0xf] }
 0x2f9   : >> { %8596 = vmatpush3.bf16.msra.mxu0 %v6638_v32  ;;  %8591 = vmatprep.mubr.msk.bf16.mxu0 %vm627_vm6, %v7758_v29  ;;  %v7665_v47 = vcombine.low %v11807_v2, %v9202_v60  ;;  %v6809_v29 = vrot.slane %v6807_v36, 5  ;;  %v7666_v32 = vcombine.low %v9203_v23, %v9204_v34 }
 0x2fa   : >> { %9108 = vmatprep.subr.msk.bf16.mxu0 %vm640_vm2, %v7774_v62 }
 0x2ff   : >> { %8458 = vmatmul.mubr.msk.bf16.vlgmr.msra.gmra.mrb[0].mxu1 %vm627_vm6, %v12163_v10  ;;  %v7786_v10 = vrot.slane %v3869_v58, 9 }
 0x300   : >> { %8466 = vmatpush3.bf16.msra.mxu1 %v5151_v63  ;;  %8592 = vmatmul.mubr.msk.bf16.gmra.mrb[4].mxu0 %vm627_vm6, %v7759_v3  ;;  %v7667_v3 = vcombine.low %v9205_v54, %v9206_v31  ;;  %v12174_v63 = vld [vmem:[#allocation37_spill] sm:$0xff] }
 0x301   : >> { %8461 = vmatprep.mubr.msk.bf16.mxu1 %vm627_vm6, %v11238_v49  ;;  %8597 = vmatprep.mubr.msk.bf16.mxu0 %vm627_vm6, %v7766_v19  ;;  %v7780_v49 = vld [vmem:[%s12029_s3 + $0x64] sm:$0xf] }
 0x302   : >> { %9094 = vmatprep.subr.msk.bf16.mxu1 %vm640_vm2, %v7655_v20  ;;  %v6819_v15 = vsel %vm640_vm2, %v7780_v49, 0  ;;  %v6897_v20 = vrot.slane %v3870_v38, 5 }
 0x307   : >> { %8462 = vmatmul.mubr.msk.bf16.gmra.mrb[4].mxu1 %vm627_vm6, %v11260_v9  ;;  %v7769_v9 = vcombine.low %v11736_v26, %v11861_v17  ;;  %v12165_v26 = vld [vmem:[#allocation29_spill] sm:$0xff] }
 0x308   : >> { %8598 = vmatmul.mubr.msk.bf16.vlgmr.msra.gmra.mrb[0].mxu0 %vm627_vm6, %v7767_v37  ;;  %8467 = vmatprep.mubr.msk.bf16.mxu1 %vm627_vm6, %v7639_v14  ;;  %v12176_v14 = vld [vmem:[#allocation36_spill] sm:$0xff] }
 0x309   : >> { %8606 = vmatpush3.bf16.msra.mxu0 %v6722_v1  ;;  %8601 = vmatprep.mubr.msk.bf16.mxu0 %vm627_vm6, %v7768_v57  ;;  %v12177_v37 = vcombine.low %v12175_v33, %v12176_v14 }
 0x30a   : >> { %9109 = vmatprep.subr.msk.bf16.mxu0 %vm640_vm2, %v7780_v49 }
 0x30f   : >> { %8468 = vmatmul.mubr.msk.bf16.vlgmr.msra.gmra.mrb[0].mxu1 %vm627_vm6, %v11317_v27  ;;  %v7656_v27 = vcombine.low %v5237_v53, %v12166_v43 }
 0x310   : >> { %8476 = vmatpush3.bf16.msra.mxu1 %v5293_v6  ;;  %8602 = vmatmul.mubr.msk.bf16.gmra.mrb[4].mxu0 %vm627_vm6, %v7769_v9 }
 0x311   : >> { %8471 = vmatprep.mubr.msk.bf16.mxu1 %vm627_vm6, %v11370_v18  ;;  %8607 = vmatprep.mubr.msk.bf16.mxu0 %vm627_vm6, %v12165_v26  ;;  %v7787_v18 = vld [vmem:[%s12029_s3 + $0x68] sm:$0xf] }
 0x312   : >> { %9095 = vmatprep.subr.msk.bf16.mxu1 %vm640_vm2, %v7664_v41  ;;  %v6907_v28 = vsel %vm640_vm2, %v7787_v18, 0 }
 0x317   : >> { %8472 = vmatmul.mubr.msk.bf16.gmra.mrb[4].mxu1 %vm627_vm6, %v12167_v12 }
 0x318   : >> { %8608 = vmatmul.mubr.msk.bf16.vlgmr.msra.gmra.mrb[0].mxu0 %vm627_vm6, %v12168_v21  ;;  %8477 = vmatprep.mubr.msk.bf16.mxu1 %vm627_vm6, %v7656_v27 }
 0x319   : >> { %8616 = vmatpush3.bf16.msra.mxu0 %v6819_v15  ;;  %8611 = vmatprep.mubr.msk.bf16.mxu0 %vm627_vm6, %v11546_v8  ;;  %v6804_v8 = vor.u32 %v6803_v39, %v6800_v55 }
 0x31a   : >> { %9110 = vmatprep.subr.msk.bf16.mxu0 %vm640_vm2, %v7787_v18 }
 0x31b   : >> { %v6805_v30 = vrot.slane %v6804_v8, 4 }
 0x31d   : >> { %v6810_v2 = vsel %vm9769_vm5, %v6805_v30, %v6809_v29 }
 0x31e   : >> { %v7781_v62 = vcombine.low %v11824_v46, %v6810_v2  ;;  %v12173_v46 = vld [vmem:[#allocation38_spill] sm:$0xff] }
 0x31f   : >> { %8478 = vmatmul.mubr.msk.bf16.vlgmr.msra.gmra.mrb[0].mxu1 %vm627_vm6, %v12169_v50  ;;  %v7676_v19 = vcombine.low %v12174_v63, %v12173_v46 }
 0x320   : >> { %8486 = vmatpush3.bf16.msra.mxu1 %v5389_v56  ;;  %8612 = vmatmul.mubr.msk.bf16.gmra.mrb[4].mxu0 %vm627_vm6, %v7775_v51 }
 0x321   : >> { %8481 = vmatprep.mubr.msk.bf16.mxu1 %vm627_vm6, %v12170_v61  ;;  %8617 = vmatprep.mubr.msk.bf16.mxu0 %vm627_vm6, %v11623_v40  ;;  %v12171_v40 = vld [vmem:[#allocation42_spill] sm:$0xff] }
 0x322   : >> { %9097 = vmatprep.subr.msk.bf16.mxu1 %vm640_vm2, %v9201_v5 }
 0x327   : >> { %8482 = vmatmul.mubr.msk.bf16.gmra.mrb[4].mxu1 %vm627_vm6, %v12171_v40 }
 0x328   : >> { %8618 = vmatmul.mubr.msk.bf16.vlgmr.msra.gmra.mrb[0].mxu0 %vm627_vm6, %v11627_v0  ;;  %8487 = vmatprep.mubr.msk.bf16.mxu1 %vm627_vm6, %v7665_v47  ;;  %v12172_v0 = vld [vmem:[#allocation23_spill] sm:$0xff] }
 0x329   : >> { %8626 = vmatpush3.bf16.msra.mxu0 %v6907_v28  ;;  %8621 = vmatprep.mubr.msk.bf16.mxu0 %vm627_vm6, %v11661_v7  ;;  %v9207_v7 = vld [vmem:[%s10907_s16 + $0x88] sm:$0xf]  ;;  %s11953_s16 = scalar_lea.vmem %s9690_s28, %s7824_s15 }
 0x32a   : >> { %v7668_v45 = vcombine.low %v9207_v7, %v9208_v24  ;;  %v7800_v57 = vld [vmem:[%s11953_s16 + $0x70] sm:$0xf]  ;;  %v7799_v27 = vld [vmem:[%s11953_s16 + $0x6c] sm:$0x1]  ;;  %v7795_v15 = vld [vmem:[%s11953_s16 + $0x5c] sm:$0x1] }
 0x32b   : >> { %v7061_v9 = vshrl.u32 %v7800_v57, 16  ;;  %v7064_v6 = vshll.u32 %v7800_v57, 16  ;;  %v7801_v21 = vld [vmem:[%s11953_s16 + $0x74] sm:$0x1]  ;;  %v7056_v51 = vshll.u32 %v7799_v27, 16  ;;  %v7028_v39 = vshll.u32 %v7795_v15, 16 }
 0x32c   : >> { %v7797_v55 = vld [vmem:[%s11953_s16 + $0x64] sm:$0x1]  ;;  %v7070_v50 = vshll.u32 %v7801_v21, 16  ;;  %v7806_v61 = vld [vmem:[%s11953_s16 + $0x88] sm:$0xf] }
 0x32d   : >> { %v7063_v12 = vrot.slane %v7061_v9, 4  ;;  %v7066_v18 = vrot.slane %v7064_v6, 5  ;;  %v7042_v5 = vshll.u32 %v7797_v55, 16  ;;  %v7802_v60 = vld [vmem:[%s11953_s16 + $0x78] sm:$0xf]  ;;  %v7058_v29 = vrot.slane %v7056_v51, 5 }
 0x32e   : >> { %v7808_v40 = vld [vmem:[%s11953_s16 + $0x90] sm:$0xf]  ;;  %v7030_v23 = vrot.slane %v7028_v39, 5  ;;  %v7103_v34 = vshrl.u32 %v7806_v61, 16  ;;  %v7078_v7 = vshll.u32 %v7802_v60, 16 }
 0x32f   : >> { %8488 = vmatmul.mubr.msk.bf16.vlgmr.msra.gmra.mrb[0].mxu1 %vm627_vm6, %v7666_v32  ;;  %v7067_v38 = vor.u32 %v7066_v18, %v7063_v12  ;;  %v7106_v32 = vshll.u32 %v7806_v61, 16  ;;  %v7117_v46 = vshrl.u32 %v7808_v40, 16  ;;  %v7120_v63 = vshll.u32 %v7808_v40, 16  ;;  %v11977_v57 = vld [vmem:[%s12030_s4] ss:$0 sm:$0xff] }
 0x330   : >> { %8846 = vmatpush3.bf16.msra.mxu1 %v12172_v0  ;;  %8622 = vmatmul.mubr.msk.bf16.gmra.mrb[4].mxu0 %vm627_vm6, %v7781_v62  ;;  %v7804_v62 = vld [vmem:[%s11953_s16 + $0x80] sm:$0xf]  ;;  %v7075_v0 = vshrl.u32 %v7802_v60, 16  ;;  %v7805_v12 = vld [vmem:[%s11953_s16 + $0x84] sm:$0x1] }
 0x331   : >> { %8491 = vmatprep.mubr.msk.bf16.mxu1 %vm627_vm6, %v7667_v3  ;;  %8627 = vmatprep.mubr.msk.bf16.mxu0 %vm627_vm6, %v11708_v13  ;;  %v6898_v13 = vsel %vm9912_vm9, %v7786_v10, %v6897_v20  ;;  %v7068_v31 = vrot.slane %v7067_v38, 4  ;;  %v7072_v3 = vrot.slane %v7070_v50, 5  ;;  %v7092_v10 = vshll.u32 %v7804_v62, 16 }
 0x332   : >> { %v7788_v52 = vcombine.low %v11861_v17, %v6898_v13  ;;  %v7796_v17 = vld [vmem:[%s11953_s16 + $0x60] sm:$0xf]  ;;  %v7108_v33 = vrot.slane %v7106_v32, 5 }
 0x333   : >> { %v7033_v44 = vshrl.u32 %v7796_v17, 16  ;;  %v7036_v4 = vshll.u32 %v7796_v17, 16  ;;  %v7073_v14 = vsel %vm9769_vm5, %v7068_v31, %v7072_v3 }
 0x335   : >> { %v7035_v58 = vrot.slane %v7033_v44, 4  ;;  %v7038_v59 = vrot.slane %v7036_v4, 5  ;;  %v7809_v44 = vld [vmem:[%s11953_s16 + $0x94] sm:$0x1] }
 0x336   : >> { %v7126_v38 = vshll.u32 %v7809_v44, 16 }
 0x337   : >> { %8492 = vmatmul.mubr.msk.bf16.gmra.mrb[4].mxu1 %vm627_vm6, %v7668_v45  ;;  %v7039_v36 = vor.u32 %v7038_v59, %v7035_v58  ;;  %v7044_v45 = vrot.slane %v7042_v5, 5 }
 0x338   : >> { %8628 = vmatmul.mubr.msk.bf16.vlgmr.msra.gmra.mrb[0].mxu0 %vm627_vm6, %v11713_v22  ;;  %8501 = vmatprep.mubr.msk.bf16.mxu1 %vm627_vm6, %v7676_v19  ;;  %v7798_v22 = vld [vmem:[%s11953_s16 + $0x68] sm:$0xf]  ;;  %v7089_v19 = vshrl.u32 %v7804_v62, 16  ;;  %v7128_v62 = vrot.slane %v7126_v38, 5 }
 0x339   : >> { %8631 = vmatprep.mubr.msk.bf16.mxu0 %vm627_vm6, %v11741_v11  ;;  %v7794_v11 = vld [vmem:[%s11953_s16 + $0x58] sm:$0xf]  ;;  %v7047_v42 = vshrl.u32 %v7798_v22, 16  ;;  %v7050_v25 = vshll.u32 %v7798_v22, 16  ;;  %v7040_v24 = vrot.slane %v7039_v36, 4  ;;  %v7077_v22 = vrot.slane %v7075_v0, 4 }
 0x33a   : >> { %v7019_v1 = vshrl.u32 %v7794_v11, 16  ;;  %v7022_v49 = vshll.u32 %v7794_v11, 16  ;;  %v7080_v11 = vrot.slane %v7078_v7, 5  ;;  %v7091_v4 = vrot.slane %v7089_v19, 4 }
 0x33b   : >> { %v7049_v41 = vrot.slane %v7047_v42, 4  ;;  %v7052_v26 = vrot.slane %v7050_v25, 5  ;;  %v7045_v42 = vsel %vm9769_vm5, %v7040_v24, %v7044_v45  ;;  %v7803_v25 = vld [vmem:[%s11953_s16 + $0x7c] sm:$0x1]  ;;  %v7098_v36 = vshll.u32 %v7805_v12, 16 }
 0x33c   : >> { %v7021_v53 = vrot.slane %v7019_v1, 4  ;;  %v7024_v43 = vrot.slane %v7022_v49, 5  ;;  %v7119_v1 = vrot.slane %v7117_v46, 4  ;;  %v7122_v49 = vrot.slane %v7120_v63, 5 }
 0x33d   : >> { %v7053_v48 = vor.u32 %v7052_v26, %v7049_v41  ;;  %v7094_v41 = vrot.slane %v7092_v10, 5  ;;  %v7139_v58 = vunpack.c.l.bf16 %v7045_v42  ;;  %v7081_v59 = vor.u32 %v7080_v11, %v7077_v22 }
 0x33e   : >> { %v7025_v56 = vor.u32 %v7024_v43, %v7021_v53  ;;  %v7141_v43 = vunpack.c.l.bf16 %v7073_v14  ;;  %v7123_v39 = vor.u32 %v7122_v49, %v7119_v1  ;;  %v7100_v7 = vrot.slane %v7098_v36, 5 }
 0x33f   : >> { %v7054_v30 = vrot.slane %v7053_v48, 4  ;;  %v7084_v48 = vshll.u32 %v7803_v25, 16  ;;  %v7082_v40 = vrot.slane %v7081_v59, 4 }
 0x340   : >> { %8632 = vmatmul.mubr.msk.bf16.gmra.mrb[4].mxu0 %vm627_vm6, %v7788_v52  ;;  %v7026_v28 = vrot.slane %v7025_v56, 4  ;;  %v7105_v52 = vrot.slane %v7103_v34, 4  ;;  %v7124_v32 = vrot.slane %v7123_v39, 4 }
 0x341   : >> { %v7059_v20 = vsel %vm9769_vm5, %v7054_v30, %v7058_v29 }
 0x342   : >> { %v7031_v13 = vsel %vm9769_vm5, %v7026_v28, %v7030_v23  ;;  %v7140_v9 = vunpack.c.l.bf16 %v7059_v20  ;;  %v7109_v27 = vor.u32 %v7108_v33, %v7105_v52 }
 0x343   : >> { %8502 = vmatmul.mubr.msk.bf16.vlgmr.msra.gmra.mrb[4].mxu1 %vm627_vm6, %v12177_v37  ;;  %v7807_v37 = vld [vmem:[%s11953_s16 + $0x8c] sm:$0x1]  ;;  %v7138_v6 = vunpack.c.l.bf16 %v7031_v13  ;;  %v7129_v13 = vsel %vm9769_vm5, %v7124_v32, %v7128_v62 }
 0x344   : >> { %v7112_v15 = vshll.u32 %v7807_v37, 16 }
 0x346   : >> { %v7114_v30 = vrot.slane %v7112_v15, 5 }
 0x402   : >> { %v8489_v8 = vpop.f32.mrb[0].mxu1 }
 0x403   : >> { %v5425_v47 = vpop.f32.mrb[1].mxu1 }
 0x404   : >> { %v8490_v2 = vpop.f32.mrb[2].mxu1 }
 0x405   : >> { %v5428_v54 = vpop.f32.mrb[3].mxu1 }
 0x40b   : >> { %v8629_v17 = vpop.f32.mrb[0].mxu0 }
 0x40c   : >> { %v8847_v26 = vadd.f32 %v8629_v17, %v8489_v8  ;;  %v6943_v53 = vpop.f32.mrb[1].mxu0  ;;  %v7095_v8 = vor.u32 %v7094_v41, %v7091_v4  ;;  %v7145_v17 = vunpack.c.l.bf16 %v7129_v13 }
 0x40d   : >> { %v8848_v18 = vadd.f32 %v6943_v53, %v5425_v47  ;;  %v8630_v21 = vpop.f32.mrb[2].mxu0  ;;  %v7110_v47 = vrot.slane %v7109_v27, 4 }
 0x40e   : >> { %v7012_v51 = vadd.f32 %v8847_v26, %v11977_v57  ;;  %v8849_v56 = vadd.f32 %v8630_v21, %v8490_v2  ;;  %v6946_v55 = vpop.f32.mrb[3].mxu0  ;;  %v7086_v2 = vrot.slane %v7084_v48, 5  ;;  %v7096_v0 = vrot.slane %v7095_v8, 4 }
 0x40f   : >> { %v7010_v50 = vadd.f32 %v8848_v18, %v11977_v57  ;;  %v8850_v61 = vadd.f32 %v6946_v55, %v5428_v54  ;;  %v7115_v45 = vsel %vm9769_vm5, %v7110_v47, %v7114_v30 }
 0x410   : >> { %v7148_v5 = vadd.f32 %v7140_v9, %v7012_v51  ;;  %v7013_v60 = vadd.f32 %v8849_v56, %v11977_v57  ;;  %v7087_v19 = vsel %vm9769_vm5, %v7082_v40, %v7086_v2  ;;  %v7144_v14 = vunpack.c.l.bf16 %v7115_v45 }
 0x411   : >> { %v7146_v29 = vadd.f32 %v7138_v6, %v7010_v50  ;;  %v7011_v28 = vadd.f32 %v8850_v61, %v11977_v57  ;;  %v7101_v22 = vsel %vm9769_vm5, %v7096_v0, %v7100_v7  ;;  %v7142_v42 = vunpack.c.l.bf16 %v7087_v19 }
 0x412   : >> { %v7156_v23 = vmax.f32 %v7148_v5, 0.0  ;;  %v7149_v34 = vadd.f32 %v7141_v43, %v7013_v60  ;;  %v7143_v4 = vunpack.c.l.bf16 %v7101_v22 }
 0x413   : >> { %v7154_v54 = vmax.f32 %v7146_v29, 0.0  ;;  %v7147_v31 = vadd.f32 %v7139_v58, %v7011_v28  ;;  %v8633_v3 = vpop.f32.mrb[4].mxu0 }
 0x414   : >> { %7166 = vst.msk [vmem:[%s11989_s7 + $0x10] sm:$0xff] %vm627_vm6, %v7156_v23  ;;  %v7157_v24 = vmax.f32 %v7149_v34, 0.0  ;;  %v6959_v46 = vpop.f32.mrb[5].mxu0 }
 0x415   : >> { %7164 = vst.msk [vmem:[%s11989_s7] sm:$0xff] %vm627_vm6, %v7154_v54  ;;  %v7155_v63 = vmax.f32 %v7147_v31, 0.0  ;;  %v8634_v10 = vpop.f32.mrb[6].mxu0 }
 0x416   : >> { %7167 = vst.msk [vmem:[%s11989_s7 + $0x18] sm:$0xff] %vm627_vm6, %v7157_v24  ;;  %v8503_v20 = vpop.f32.mrb[4].mxu1  ;;  %v6962_v52 = vpop.f32.mrb[7].mxu0 }
 0x417   : >> { %7165 = vst.msk [vmem:[%s11989_s7 + $0x8] sm:$0xff] %vm627_vm6, %v7155_v63  ;;  %v8851_v33 = vadd.f32 %v8633_v3, %v8503_v20  ;;  %v5550_v37 = vpop.f32.mrb[5].mxu1 }
 0x418   : >> { %v8852_v11 = vadd.f32 %v6959_v46, %v5550_v37  ;;  %v8504_v25 = vpop.f32.mrb[6].mxu1 }
 0x419   : >> { %v7016_v1 = vadd.f32 %v8851_v33, %v11977_v57  ;;  %v8853_v49 = vadd.f32 %v8634_v10, %v8504_v25  ;;  %v5553_v9 = vpop.f32.mrb[7].mxu1 }
 0x41a   : >> { %v7014_v6 = vadd.f32 %v8852_v11, %v11977_v57  ;;  %v8854_v44 = vadd.f32 %v6962_v52, %v5553_v9 }
 0x41b   : >> { %v7152_v41 = vadd.f32 %v7144_v14, %v7016_v1  ;;  %v7017_v26 = vadd.f32 %v8853_v49, %v11977_v57 }
 0x41c   : >> { %v7150_v53 = vadd.f32 %v7142_v42, %v7014_v6  ;;  %v7015_v43 = vadd.f32 %v8854_v44, %v11977_v57  ;;  %3806 = sbr.rel (!%p3804_p5) target bundleno = 587 (0x24b), region = 152 }
 0x41d   : >> { %v7160_v27 = vmax.f32 %v7152_v41, 0.0  ;;  %v7153_v15 = vadd.f32 %v7145_v17, %v7017_v26 }
 0x41e   : >> { %v7158_v12 = vmax.f32 %v7150_v53, 0.0  ;;  %v7151_v18 = vadd.f32 %v7143_v4, %v7015_v43 }
 0x41f   : >> { %7170 = vst.msk [vmem:[%s11989_s7 + $0x30] sm:$0xff] %vm627_vm6, %v7160_v27  ;;  %v7161_v21 = vmax.f32 %v7153_v15, 0.0 }
 0x420   : >> { %7168 = vst.msk [vmem:[%s11989_s7 + $0x20] sm:$0xff] %vm627_vm6, %v7158_v12  ;;  %v7159_v58 = vmax.f32 %v7151_v18, 0.0 }
 0x421   : >> { %7171 = vst.msk [vmem:[%s11989_s7 + $0x38] sm:$0xff] %vm627_vm6, %v7161_v21 }
 0x422   : >> { %7169 = vst.msk [vmem:[%s11989_s7 + $0x28] sm:$0xff] %vm627_vm6, %v7159_v58 }
 0x423 PF: > { %s15_s18 = sadd.s32 1, %s9223_s18  }
 0x424   : > { %p12_p6 = scmp.ge.s32.totalorder %s15_s18, 4  }
 0x426   :  { %14 = sbr.rel (!%p12_p6) target bundleno = 1 (0x1), region = 163 }

</bundles_post_ra>
